<compile_context>
chip_gen: v5e
topology: v5e:2x2
jax: 0.10.0
libtpu: 0.0.40
codegen_flags: <defaults>
</compile_context>

<pallas_src>
import functools
import math

import jax
import jax.numpy as jnp
from jax.experimental import pallas as pl
from jax.experimental.pallas import tpu as pltpu

LN_EPS = 1e-5
BN_EPS = 1e-5


def _layer_norm(x, gamma, beta):
    mean = jnp.mean(x, axis=-1, keepdims=True)
    var = jnp.mean(jnp.square(x - mean), axis=-1, keepdims=True)
    return (x - mean) * jax.lax.rsqrt(var + LN_EPS) * gamma + beta


# ----------------------------- fused kernel -----------------------------------


def conformer_kernel(lens_ref, x_ref, pos_ref, *rest,
                     n_head, d_k, kernel_size, ff_scale):
    (ffm_g, ffm_b, ffm_w1, ffm_b1, ffm_w2, ffm_b2,
     att_g, att_b, wq, bq, wk, bk, wv, bv, wp, pbu, pbv, wo, bo,
     cv_g, cv_b, cw1a, cb1a, cw1b, cb1b, cwdw, cbdw, bns, bnb, cw2, cb2,
     ff_g, ff_b, ff_w1, ff_b1, ff_w2, ff_b2,
     nf_g, nf_b,
     o_ref) = rest

    f32 = jnp.float32
    b = pl.program_id(0)
    x = x_ref[0]                                     # (T, D)
    pos = pos_ref[0]                                 # (T, D)
    t, d = x.shape

    # ------------------ macaron feed-forward (0.5 * FFN) ------------------
    xn = _layer_norm(x, ffm_g[...], ffm_b[...])
    h = jnp.dot(xn, ffm_w1[...], preferred_element_type=f32) + ffm_b1[...]
    h = h * jax.nn.sigmoid(h)                        # Swish
    x = x + ff_scale * (jnp.dot(h, ffm_w2[...], preferred_element_type=f32) + ffm_b2[...])

    # ------------------ rel-pos multi-headed self-attention ---------------
    xn = _layer_norm(x, att_g[...], att_b[...])
    # fused, lane-dense projections: (T, D) @ (D, H*dk)
    q = jnp.dot(xn, wq[...], preferred_element_type=f32) + bq[...]
    k = jnp.dot(xn, wk[...], preferred_element_type=f32) + bk[...]
    v = jnp.dot(xn, wv[...], preferred_element_type=f32) + bv[...]
    p = jnp.dot(pos, wp[...], preferred_element_type=f32)
    qu = q + pbu[...]
    qv = q + pbv[...]

    def split_heads(a):                              # (T, H*dk) -> (H, T, dk)
        return jnp.stack([a[:, hh * d_k:(hh + 1) * d_k] for hh in range(n_head)], axis=0)

    quh = split_heads(qu)
    qvh = split_heads(qv)
    kh = split_heads(k)
    ph = split_heads(p)
    vh = split_heads(v)

    # batched (over heads) score matmuls
    ac = jnp.einsum('htd,hsd->hts', quh, kh, preferred_element_type=f32)
    bd = jnp.einsum('htd,hsd->hts', qvh, ph, preferred_element_type=f32)

    # key mask from sequence length (SMEM scalar), additive bias form
    length = lens_ref[b]
    col = jax.lax.broadcasted_iota(jnp.int32, (1, 1, t), 2)
    valid = col < length                             # (1, 1, T)
    neg = jnp.finfo(f32).min
    scores = (ac + bd) * (1.0 / math.sqrt(d_k)) + jnp.where(valid, 0.0, neg)

    # manual softmax; reciprocal goes to the EUP slot
    m = jnp.max(scores, axis=-1, keepdims=True)
    e = jnp.exp(scores - m)
    l = jnp.sum(e, axis=-1, keepdims=True)
    attn = e * pl.reciprocal(l, approx=True)
    attn = attn * valid.astype(f32)                  # masked_fill(attn, 0.0) equivalent

    ctx = jnp.einsum('hts,hsd->htd', attn, vh, preferred_element_type=f32)   # (H, T, dk)
    ctx2 = jnp.concatenate([ctx[hh] for hh in range(n_head)], axis=-1)       # (T, H*dk)
    x = x + jnp.dot(ctx2, wo[...], preferred_element_type=f32) + bo[...]     # output proj

    # ------------------ convolution module --------------------------------
    xn = _layer_norm(x, cv_g[...], cv_b[...])
    # pointwise_conv1 (split into the two GLU halves) + GLU
    a_half = jnp.dot(xn, cw1a[...], preferred_element_type=f32) + cb1a[...]
    g_half = jnp.dot(xn, cw1b[...], preferred_element_type=f32) + cb1b[...]
    hc = a_half * jax.nn.sigmoid(g_half)
    # depthwise conv along time via XLU rolls + edge masks ("same" zero padding)
    pad = (kernel_size - 1) // 2
    row = jax.lax.broadcasted_iota(jnp.int32, (t, d), 0)
    acc = jnp.zeros((t, d), f32)
    for j in range(kernel_size):
        s = pad - j                                  # out[t] += w[j] * hc[t - s]
        if s == 0:
            shifted = hc
        else:
            shifted = pltpu.roll(hc, shift=s % t, axis=0)
            vmask = (row >= s) & (row < t + s)       # zero the wrapped-around rows
            shifted = jnp.where(vmask, shifted, 0.0)
        acc = acc + shifted * cwdw[j]
    acc = acc + cbdw[...]
    # BatchNorm1d in eval mode (precomputed affine), then Swish
    acc = acc * bns[...] + bnb[...]
    acc = acc * jax.nn.sigmoid(acc)
    # pointwise_conv2
    x = x + jnp.dot(acc, cw2[...], preferred_element_type=f32) + cb2[...]

    # ------------------ final feed-forward (0.5 * FFN) + norm_final -------
    xn = _layer_norm(x, ff_g[...], ff_b[...])
    h = jnp.dot(xn, ff_w1[...], preferred_element_type=f32) + ff_b1[...]
    h = h * jax.nn.sigmoid(h)
    x = x + ff_scale * (jnp.dot(h, ff_w2[...], preferred_element_type=f32) + ff_b2[...])
    o_ref[0] = _layer_norm(x, nf_g[...], nf_b[...])


# ----------------------------- wrapper -----------------------------------------


def _flatten_params(p):
    ffm = p['ff_macaron']
    mha = p['mha']
    cv = p['conv']
    ff = p['ff']
    nf = p['norm_final']
    return (ffm[0], ffm[1], ffm[2], ffm[3], ffm[4], ffm[5],
            mha['g'], mha['b'], mha['wq'], mha['bq'], mha['wk'], mha['bk'],
            mha['wv'], mha['bv'], mha['wp'], mha['pbu'], mha['pbv'],
            mha['wo'], mha['bo'],
            cv['g'], cv['b'], cv['w1a'], cv['b1a'], cv['w1b'], cv['b1b'],
            cv['wdw'], cv['bdw'], cv['bn_scale'], cv['bn_shift'], cv['w2'], cv['b2'],
            ff[0], ff[1], ff[2], ff[3], ff[4], ff[5],
            nf[0], nf[1])


def conformer_encoder_layer(x, pos_emb, mask, params, *, n_head, d_k,
                            conv_kernel_size, ff_scale=0.5,
                            vmem_limit_bytes=64 * 1024 * 1024):
    """normalize_before=True, concat_after=False, eval mode, cache=None."""
    B, T, D = x.shape
    # sequence lengths (int32, SMEM scalar prefetch) derived from the (B,1,T) padding mask
    lengths = jnp.sum((mask[:, 0, :] > 0.5), axis=-1).astype(jnp.int32)

    weights = _flatten_params(params)

    def batched_spec(shape):
        nd = len(shape)
        return pl.BlockSpec((1,) + tuple(shape[1:]),
                            lambda b, lens, _n=nd: (b,) + (0,) * (_n - 1))

    def full_spec(arr):
        nd = arr.ndim
        return pl.BlockSpec(tuple(arr.shape), lambda b, lens, _n=nd: (0,) * _n)

    in_specs = ([batched_spec(x.shape), full_spec(pos_emb)]
                + [full_spec(w) for w in weights])

    grid_spec = pltpu.PrefetchScalarGridSpec(
        num_scalar_prefetch=1,
        grid=(B,),
        in_specs=in_specs,
        out_specs=pl.BlockSpec((1, T, D), lambda b, lens: (b, 0, 0)),
    )

    kern = functools.partial(conformer_kernel, n_head=n_head, d_k=d_k,
                             kernel_size=conv_kernel_size, ff_scale=ff_scale)

    out = pl.pallas_call(
        kern,
        out_shape=jax.ShapeDtypeStruct((B, T, D), x.dtype),
        grid_spec=grid_spec,
        compiler_params=pltpu.CompilerParams(
            dimension_semantics=("parallel",),
            vmem_limit_bytes=vmem_limit_bytes),
    )(lengths, x, pos_emb, *weights)
    return out, pos_emb, mask


# ----------------------------- params / inputs --------------------------------


def make_params(D, Dff, H, dk, K):
    keys = iter(jax.random.split(jax.random.PRNGKey(0), 40))

    def nrm(shape, scale=0.1):
        return (scale * jax.random.normal(next(keys), shape)).astype(jnp.float32)

    ones = lambda s: jnp.ones(s, jnp.float32)
    zeros = lambda s: jnp.zeros(s, jnp.float32)
    Hdk = H * dk

    params = {}
    params['ff_macaron'] = (ones((1, D)), zeros((1, D)),
                            nrm((D, Dff)), nrm((1, Dff)), nrm((Dff, D)), nrm((1, D)))
    # attention weights stored fused over heads: columns [h*dk:(h+1)*dk] belong to head h
    params['mha'] = dict(
        g=ones((1, D)), b=zeros((1, D)),
        wq=nrm((D, Hdk)), bq=nrm((1, Hdk)),
        wk=nrm((D, Hdk)), bk=nrm((1, Hdk)),
        wv=nrm((D, Hdk)), bv=nrm((1, Hdk)),
        wp=nrm((D, Hdk)),
        pbu=nrm((1, Hdk)), pbv=nrm((1, Hdk)),
        wo=nrm((Hdk, D)), bo=nrm((1, D)),
    )
    # BatchNorm1d at fresh init in eval mode: mean=0, var=1, gamma=1, beta=0.
    bn_scale = ones((1, D)) / jnp.sqrt(1.0 + BN_EPS)
    bn_shift = zeros((1, D))
    params['conv'] = dict(
        g=ones((1, D)), b=zeros((1, D)),
        w1a=nrm((D, D)), b1a=nrm((1, D)),
        w1b=nrm((D, D)), b1b=nrm((1, D)),
        wdw=nrm((K, 1, D)), bdw=nrm((1, D)),
        bn_scale=bn_scale, bn_shift=bn_shift,
        w2=nrm((D, D)), b2=nrm((1, D)),
    )
    params['ff'] = (ones((1, D)), zeros((1, D)),
                    nrm((D, Dff)), nrm((1, Dff)), nrm((Dff, D)), nrm((1, D)))
    params['norm_final'] = (ones((1, D)), zeros((1, D)))
    return params


def sinusoidal_pos_emb(T, D):
    position = jnp.arange(T, dtype=jnp.float32)[:, None]
    div_term = jnp.exp(jnp.arange(0, D, 2, dtype=jnp.float32) * -(math.log(10000.0) / D))
    pe = jnp.zeros((T, D), jnp.float32)
    pe = pe.at[:, 0::2].set(jnp.sin(position * div_term))
    pe = pe.at[:, 1::2].set(jnp.cos(position * div_term))
    return pe[None]                                    # (1, T, D)


if __name__ == "__main__":
    B, T, D = 2, 8, 32
    H, dk = 4, 8
    Dff = 64
    K = 7

    key = jax.random.PRNGKey(0)
    x = jax.random.normal(key, (B, T, D), dtype=jnp.float32)
    pos_emb = sinusoidal_pos_emb(T, D)
    lengths = jnp.array([8, 6])
    mask = (jnp.arange(T)[None, :] < lengths[:, None]).astype(jnp.float32)[:, None, :]  # (B,1,T)

    params = make_params(D, Dff, H, dk, K)

    out_x, out_pos, out_mask = conformer_encoder_layer(
        x, pos_emb, mask, params, n_head=H, d_k=dk, conv_kernel_size=K)
    jax.block_until_ready(out_x)

    assert out_x.shape == (B, T, D)
    assert bool(jnp.all(jnp.isfinite(out_x)))
    print("KERNEL_OK")
</pallas_src>

<mosaic_0001>
module attributes {stable_mosaic.version = 11 : i64} {
  func.func @conformer_kernel(%arg0: i32, %arg1: memref<2xi32, #tpu.memory_space<smem>>, %arg2: memref<1x8x32xf32, #tpu.memory_space<vmem>>, %arg3: memref<1x8x32xf32, #tpu.memory_space<vmem>>, %arg4: memref<1x32xf32, #tpu.memory_space<vmem>>, %arg5: memref<1x32xf32, #tpu.memory_space<vmem>>, %arg6: memref<32x64xf32, #tpu.memory_space<vmem>>, %arg7: memref<1x64xf32, #tpu.memory_space<vmem>>, %arg8: memref<64x32xf32, #tpu.memory_space<vmem>>, %arg9: memref<1x32xf32, #tpu.memory_space<vmem>>, %arg10: memref<1x32xf32, #tpu.memory_space<vmem>>, %arg11: memref<1x32xf32, #tpu.memory_space<vmem>>, %arg12: memref<32x32xf32, #tpu.memory_space<vmem>>, %arg13: memref<1x32xf32, #tpu.memory_space<vmem>>, %arg14: memref<32x32xf32, #tpu.memory_space<vmem>>, %arg15: memref<1x32xf32, #tpu.memory_space<vmem>>, %arg16: memref<32x32xf32, #tpu.memory_space<vmem>>, %arg17: memref<1x32xf32, #tpu.memory_space<vmem>>, %arg18: memref<32x32xf32, #tpu.memory_space<vmem>>, %arg19: memref<1x32xf32, #tpu.memory_space<vmem>>, %arg20: memref<1x32xf32, #tpu.memory_space<vmem>>, %arg21: memref<32x32xf32, #tpu.memory_space<vmem>>, %arg22: memref<1x32xf32, #tpu.memory_space<vmem>>, %arg23: memref<1x32xf32, #tpu.memory_space<vmem>>, %arg24: memref<1x32xf32, #tpu.memory_space<vmem>>, %arg25: memref<32x32xf32, #tpu.memory_space<vmem>>, %arg26: memref<1x32xf32, #tpu.memory_space<vmem>>, %arg27: memref<32x32xf32, #tpu.memory_space<vmem>>, %arg28: memref<1x32xf32, #tpu.memory_space<vmem>>, %arg29: memref<7x1x32xf32, #tpu.memory_space<vmem>>, %arg30: memref<1x32xf32, #tpu.memory_space<vmem>>, %arg31: memref<1x32xf32, #tpu.memory_space<vmem>>, %arg32: memref<1x32xf32, #tpu.memory_space<vmem>>, %arg33: memref<32x32xf32, #tpu.memory_space<vmem>>, %arg34: memref<1x32xf32, #tpu.memory_space<vmem>>, %arg35: memref<1x32xf32, #tpu.memory_space<vmem>>, %arg36: memref<1x32xf32, #tpu.memory_space<vmem>>, %arg37: memref<32x64xf32, #tpu.memory_space<vmem>>, %arg38: memref<1x64xf32, #tpu.memory_space<vmem>>, %arg39: memref<64x32xf32, #tpu.memory_space<vmem>>, %arg40: memref<1x32xf32, #tpu.memory_space<vmem>>, %arg41: memref<1x32xf32, #tpu.memory_space<vmem>>, %arg42: memref<1x32xf32, #tpu.memory_space<vmem>>, %arg43: memref<1x8x32xf32, #tpu.memory_space<vmem>>) attributes {dimension_semantics = [#tpu.dimension_semantics<parallel>], iteration_bounds = array<i64: 2>, scalar_prefetch = 1 : i64, scratch_operands = 0 : i64, tpu.core_type = #tpu.core_type<tc>, window_params = [{transform_indices = @transform_0, window_bounds = array<i64: 1, 8, 32>}, {pipeline_mode = #tpu.pipeline_mode<synchronous>, transform_indices = @transform_1, window_bounds = array<i64: 1, 8, 32>}, {pipeline_mode = #tpu.pipeline_mode<synchronous>, transform_indices = @transform_2, window_bounds = array<i64: 1, 32>}, {pipeline_mode = #tpu.pipeline_mode<synchronous>, transform_indices = @transform_3, window_bounds = array<i64: 1, 32>}, {pipeline_mode = #tpu.pipeline_mode<synchronous>, transform_indices = @transform_4, window_bounds = array<i64: 32, 64>}, {pipeline_mode = #tpu.pipeline_mode<synchronous>, transform_indices = @transform_5, window_bounds = array<i64: 1, 64>}, {pipeline_mode = #tpu.pipeline_mode<synchronous>, transform_indices = @transform_6, window_bounds = array<i64: 64, 32>}, {pipeline_mode = #tpu.pipeline_mode<synchronous>, transform_indices = @transform_7, window_bounds = array<i64: 1, 32>}, {pipeline_mode = #tpu.pipeline_mode<synchronous>, transform_indices = @transform_8, window_bounds = array<i64: 1, 32>}, {pipeline_mode = #tpu.pipeline_mode<synchronous>, transform_indices = @transform_9, window_bounds = array<i64: 1, 32>}, {pipeline_mode = #tpu.pipeline_mode<synchronous>, transform_indices = @transform_10, window_bounds = array<i64: 32, 32>}, {pipeline_mode = #tpu.pipeline_mode<synchronous>, transform_indices = @transform_11, window_bounds = array<i64: 1, 32>}, {pipeline_mode = #tpu.pipeline_mode<synchronous>, transform_indices = @transform_12, window_bounds = array<i64: 32, 32>}, {pipeline_mode = #tpu.pipeline_mode<synchronous>, transform_indices = @transform_13, window_bounds = array<i64: 1, 32>}, {pipeline_mode = #tpu.pipeline_mode<synchronous>, transform_indices = @transform_14, window_bounds = array<i64: 32, 32>}, {pipeline_mode = #tpu.pipeline_mode<synchronous>, transform_indices = @transform_15, window_bounds = array<i64: 1, 32>}, {pipeline_mode = #tpu.pipeline_mode<synchronous>, transform_indices = @transform_16, window_bounds = array<i64: 32, 32>}, {pipeline_mode = #tpu.pipeline_mode<synchronous>, transform_indices = @transform_17, window_bounds = array<i64: 1, 32>}, {pipeline_mode = #tpu.pipeline_mode<synchronous>, transform_indices = @transform_18, window_bounds = array<i64: 1, 32>}, {pipeline_mode = #tpu.pipeline_mode<synchronous>, transform_indices = @transform_19, window_bounds = array<i64: 32, 32>}, {pipeline_mode = #tpu.pipeline_mode<synchronous>, transform_indices = @transform_20, window_bounds = array<i64: 1, 32>}, {pipeline_mode = #tpu.pipeline_mode<synchronous>, transform_indices = @transform_21, window_bounds = array<i64: 1, 32>}, {pipeline_mode = #tpu.pipeline_mode<synchronous>, transform_indices = @transform_22, window_bounds = array<i64: 1, 32>}, {pipeline_mode = #tpu.pipeline_mode<synchronous>, transform_indices = @transform_23, window_bounds = array<i64: 32, 32>}, {pipeline_mode = #tpu.pipeline_mode<synchronous>, transform_indices = @transform_24, window_bounds = array<i64: 1, 32>}, {pipeline_mode = #tpu.pipeline_mode<synchronous>, transform_indices = @transform_25, window_bounds = array<i64: 32, 32>}, {pipeline_mode = #tpu.pipeline_mode<synchronous>, transform_indices = @transform_26, window_bounds = array<i64: 1, 32>}, {pipeline_mode = #tpu.pipeline_mode<synchronous>, transform_indices = @transform_27, window_bounds = array<i64: 7, 1, 32>}, {pipeline_mode = #tpu.pipeline_mode<synchronous>, transform_indices = @transform_28, window_bounds = array<i64: 1, 32>}, {pipeline_mode = #tpu.pipeline_mode<synchronous>, transform_indices = @transform_29, window_bounds = array<i64: 1, 32>}, {pipeline_mode = #tpu.pipeline_mode<synchronous>, transform_indices = @transform_30, window_bounds = array<i64: 1, 32>}, {pipeline_mode = #tpu.pipeline_mode<synchronous>, transform_indices = @transform_31, window_bounds = array<i64: 32, 32>}, {pipeline_mode = #tpu.pipeline_mode<synchronous>, transform_indices = @transform_32, window_bounds = array<i64: 1, 32>}, {pipeline_mode = #tpu.pipeline_mode<synchronous>, transform_indices = @transform_33, window_bounds = array<i64: 1, 32>}, {pipeline_mode = #tpu.pipeline_mode<synchronous>, transform_indices = @transform_34, window_bounds = array<i64: 1, 32>}, {pipeline_mode = #tpu.pipeline_mode<synchronous>, transform_indices = @transform_35, window_bounds = array<i64: 32, 64>}, {pipeline_mode = #tpu.pipeline_mode<synchronous>, transform_indices = @transform_36, window_bounds = array<i64: 1, 64>}, {pipeline_mode = #tpu.pipeline_mode<synchronous>, transform_indices = @transform_37, window_bounds = array<i64: 64, 32>}, {pipeline_mode = #tpu.pipeline_mode<synchronous>, transform_indices = @transform_38, window_bounds = array<i64: 1, 32>}, {pipeline_mode = #tpu.pipeline_mode<synchronous>, transform_indices = @transform_39, window_bounds = array<i64: 1, 32>}, {pipeline_mode = #tpu.pipeline_mode<synchronous>, transform_indices = @transform_40, window_bounds = array<i64: 1, 32>}, {transform_indices = @transform_41, window_bounds = array<i64: 1, 8, 32>}]} {
    %c0 = arith.constant 0 : index
    %c0_0 = arith.constant 0 : index
    %c0_1 = arith.constant 0 : index
    %0 = vector.load %arg2[%c0, %c0_0, %c0_1] : memref<1x8x32xf32, #tpu.memory_space<vmem>>, vector<1x8x32xf32>
    %1 = vector.shape_cast %0 : vector<1x8x32xf32> to vector<8x32xf32>
    %c0_2 = arith.constant 0 : index
    %c0_3 = arith.constant 0 : index
    %c0_4 = arith.constant 0 : index
    %2 = vector.load %arg3[%c0_2, %c0_3, %c0_4] : memref<1x8x32xf32, #tpu.memory_space<vmem>>, vector<1x8x32xf32>
    %3 = vector.shape_cast %2 : vector<1x8x32xf32> to vector<8x32xf32>
    %c0_5 = arith.constant 0 : index
    %c0_6 = arith.constant 0 : index
    %4 = vector.load %arg4[%c0_5, %c0_6] : memref<1x32xf32, #tpu.memory_space<vmem>>, vector<1x32xf32>
    %c0_7 = arith.constant 0 : index
    %c0_8 = arith.constant 0 : index
    %5 = vector.load %arg5[%c0_7, %c0_8] : memref<1x32xf32, #tpu.memory_space<vmem>>, vector<1x32xf32>
    %cst = arith.constant dense<0.000000e+00> : vector<8xf32>
    %6 = vector.multi_reduction <add>, %1, %cst [1] : vector<8x32xf32> to vector<8xf32>
    %7 = vector.shape_cast %6 : vector<8xf32> to vector<8x1xf32>
    %cst_9 = arith.constant 3.200000e+01 : f32
    %8 = vector.broadcast %cst_9 : f32 to vector<8x1xf32>
    %9 = arith.divf %7, %8 : vector<8x1xf32>
    %10 = vector.broadcast %9 : vector<8x1xf32> to vector<8x32xf32>
    %11 = arith.subf %1, %10 : vector<8x32xf32>
    %12 = arith.mulf %11, %11 : vector<8x32xf32>
    %cst_10 = arith.constant dense<0.000000e+00> : vector<8xf32>
    %13 = vector.multi_reduction <add>, %12, %cst_10 [1] : vector<8x32xf32> to vector<8xf32>
    %14 = vector.shape_cast %13 : vector<8xf32> to vector<8x1xf32>
    %cst_11 = arith.constant 3.200000e+01 : f32
    %15 = vector.broadcast %cst_11 : f32 to vector<8x1xf32>
    %16 = arith.divf %14, %15 : vector<8x1xf32>
    %17 = vector.broadcast %9 : vector<8x1xf32> to vector<8x32xf32>
    %18 = arith.subf %1, %17 : vector<8x32xf32>
    %cst_12 = arith.constant 9.99999974E-6 : f32
    %19 = vector.broadcast %cst_12 : f32 to vector<8x1xf32>
    %20 = arith.addf %16, %19 : vector<8x1xf32>
    %21 = math.rsqrt %20 : vector<8x1xf32>
    %22 = vector.broadcast %21 : vector<8x1xf32> to vector<8x32xf32>
    %23 = arith.mulf %18, %22 : vector<8x32xf32>
    %24 = vector.broadcast %4 : vector<1x32xf32> to vector<8x32xf32>
    %25 = arith.mulf %23, %24 : vector<8x32xf32>
    %26 = vector.broadcast %5 : vector<1x32xf32> to vector<8x32xf32>
    %27 = arith.addf %25, %26 : vector<8x32xf32>
    %c0_13 = arith.constant 0 : index
    %c0_14 = arith.constant 0 : index
    %28 = vector.load %arg6[%c0_13, %c0_14] : memref<32x64xf32, #tpu.memory_space<vmem>>, vector<32x64xf32>
    %cst_15 = arith.constant dense<0.000000e+00> : vector<8x64xf32>
    %29 = tpu.matmul %27, %28, %cst_15 {dimension_numbers = #tpu.dot_dimension_numbers<[1], [0], [0], [1], [0, 0, 1, 1], [], []>} : vector<8x32xf32>, vector<32x64xf32>, vector<8x64xf32> -> vector<8x64xf32>
    %c0_16 = arith.constant 0 : index
    %c0_17 = arith.constant 0 : index
    %30 = vector.load %arg7[%c0_16, %c0_17] : memref<1x64xf32, #tpu.memory_space<vmem>>, vector<1x64xf32>
    %31 = vector.broadcast %30 : vector<1x64xf32> to vector<8x64xf32>
    %32 = arith.addf %29, %31 : vector<8x64xf32>
    %33 = arith.negf %32 : vector<8x64xf32>
    %34 = math.exp %33 : vector<8x64xf32>
    %cst_18 = arith.constant 1.000000e+00 : f32
    %35 = vector.broadcast %cst_18 : f32 to vector<8x64xf32>
    %36 = arith.addf %35, %34 : vector<8x64xf32>
    %37 = arith.divf %35, %36 : vector<8x64xf32>
    %38 = arith.mulf %32, %37 : vector<8x64xf32>
    %c0_19 = arith.constant 0 : index
    %c0_20 = arith.constant 0 : index
    %39 = vector.load %arg8[%c0_19, %c0_20] : memref<64x32xf32, #tpu.memory_space<vmem>>, vector<64x32xf32>
    %cst_21 = arith.constant dense<0.000000e+00> : vector<8x32xf32>
    %40 = tpu.matmul %38, %39, %cst_21 {dimension_numbers = #tpu.dot_dimension_numbers<[1], [0], [0], [1], [0, 0, 1, 1], [], []>} : vector<8x64xf32>, vector<64x32xf32>, vector<8x32xf32> -> vector<8x32xf32>
    %c0_22 = arith.constant 0 : index
    %c0_23 = arith.constant 0 : index
    %41 = vector.load %arg9[%c0_22, %c0_23] : memref<1x32xf32, #tpu.memory_space<vmem>>, vector<1x32xf32>
    %42 = vector.broadcast %41 : vector<1x32xf32> to vector<8x32xf32>
    %43 = arith.addf %40, %42 : vector<8x32xf32>
    %cst_24 = arith.constant 5.000000e-01 : f32
    %44 = vector.broadcast %cst_24 : f32 to vector<8x32xf32>
    %45 = arith.mulf %44, %43 : vector<8x32xf32>
    %46 = arith.addf %1, %45 : vector<8x32xf32>
    %c0_25 = arith.constant 0 : index
    %c0_26 = arith.constant 0 : index
    %47 = vector.load %arg10[%c0_25, %c0_26] : memref<1x32xf32, #tpu.memory_space<vmem>>, vector<1x32xf32>
    %c0_27 = arith.constant 0 : index
    %c0_28 = arith.constant 0 : index
    %48 = vector.load %arg11[%c0_27, %c0_28] : memref<1x32xf32, #tpu.memory_space<vmem>>, vector<1x32xf32>
    %cst_29 = arith.constant dense<0.000000e+00> : vector<8xf32>
    %49 = vector.multi_reduction <add>, %46, %cst_29 [1] : vector<8x32xf32> to vector<8xf32>
    %50 = vector.shape_cast %49 : vector<8xf32> to vector<8x1xf32>
    %cst_30 = arith.constant 3.200000e+01 : f32
    %51 = vector.broadcast %cst_30 : f32 to vector<8x1xf32>
    %52 = arith.divf %50, %51 : vector<8x1xf32>
    %53 = vector.broadcast %52 : vector<8x1xf32> to vector<8x32xf32>
    %54 = arith.subf %46, %53 : vector<8x32xf32>
    %55 = arith.mulf %54, %54 : vector<8x32xf32>
    %cst_31 = arith.constant dense<0.000000e+00> : vector<8xf32>
    %56 = vector.multi_reduction <add>, %55, %cst_31 [1] : vector<8x32xf32> to vector<8xf32>
    %57 = vector.shape_cast %56 : vector<8xf32> to vector<8x1xf32>
    %cst_32 = arith.constant 3.200000e+01 : f32
    %58 = vector.broadcast %cst_32 : f32 to vector<8x1xf32>
    %59 = arith.divf %57, %58 : vector<8x1xf32>
    %60 = vector.broadcast %52 : vector<8x1xf32> to vector<8x32xf32>
    %61 = arith.subf %46, %60 : vector<8x32xf32>
    %cst_33 = arith.constant 9.99999974E-6 : f32
    %62 = vector.broadcast %cst_33 : f32 to vector<8x1xf32>
    %63 = arith.addf %59, %62 : vector<8x1xf32>
    %64 = math.rsqrt %63 : vector<8x1xf32>
    %65 = vector.broadcast %64 : vector<8x1xf32> to vector<8x32xf32>
    %66 = arith.mulf %61, %65 : vector<8x32xf32>
    %67 = vector.broadcast %47 : vector<1x32xf32> to vector<8x32xf32>
    %68 = arith.mulf %66, %67 : vector<8x32xf32>
    %69 = vector.broadcast %48 : vector<1x32xf32> to vector<8x32xf32>
    %70 = arith.addf %68, %69 : vector<8x32xf32>
    %c0_34 = arith.constant 0 : index
    %c0_35 = arith.constant 0 : index
    %71 = vector.load %arg12[%c0_34, %c0_35] : memref<32x32xf32, #tpu.memory_space<vmem>>, vector<32x32xf32>
    %cst_36 = arith.constant dense<0.000000e+00> : vector<8x32xf32>
    %72 = tpu.matmul %70, %71, %cst_36 {dimension_numbers = #tpu.dot_dimension_numbers<[1], [0], [0], [1], [0, 0, 1, 1], [], []>} : vector<8x32xf32>, vector<32x32xf32>, vector<8x32xf32> -> vector<8x32xf32>
    %c0_37 = arith.constant 0 : index
    %c0_38 = arith.constant 0 : index
    %73 = vector.load %arg13[%c0_37, %c0_38] : memref<1x32xf32, #tpu.memory_space<vmem>>, vector<1x32xf32>
    %74 = vector.broadcast %73 : vector<1x32xf32> to vector<8x32xf32>
    %75 = arith.addf %72, %74 : vector<8x32xf32>
    %c0_39 = arith.constant 0 : index
    %c0_40 = arith.constant 0 : index
    %76 = vector.load %arg14[%c0_39, %c0_40] : memref<32x32xf32, #tpu.memory_space<vmem>>, vector<32x32xf32>
    %cst_41 = arith.constant dense<0.000000e+00> : vector<8x32xf32>
    %77 = tpu.matmul %70, %76, %cst_41 {dimension_numbers = #tpu.dot_dimension_numbers<[1], [0], [0], [1], [0, 0, 1, 1], [], []>} : vector<8x32xf32>, vector<32x32xf32>, vector<8x32xf32> -> vector<8x32xf32>
    %c0_42 = arith.constant 0 : index
    %c0_43 = arith.constant 0 : index
    %78 = vector.load %arg15[%c0_42, %c0_43] : memref<1x32xf32, #tpu.memory_space<vmem>>, vector<1x32xf32>
    %79 = vector.broadcast %78 : vector<1x32xf32> to vector<8x32xf32>
    %80 = arith.addf %77, %79 : vector<8x32xf32>
    %c0_44 = arith.constant 0 : index
    %c0_45 = arith.constant 0 : index
    %81 = vector.load %arg16[%c0_44, %c0_45] : memref<32x32xf32, #tpu.memory_space<vmem>>, vector<32x32xf32>
    %cst_46 = arith.constant dense<0.000000e+00> : vector<8x32xf32>
    %82 = tpu.matmul %70, %81, %cst_46 {dimension_numbers = #tpu.dot_dimension_numbers<[1], [0], [0], [1], [0, 0, 1, 1], [], []>} : vector<8x32xf32>, vector<32x32xf32>, vector<8x32xf32> -> vector<8x32xf32>
    %c0_47 = arith.constant 0 : index
    %c0_48 = arith.constant 0 : index
    %83 = vector.load %arg17[%c0_47, %c0_48] : memref<1x32xf32, #tpu.memory_space<vmem>>, vector<1x32xf32>
    %84 = vector.broadcast %83 : vector<1x32xf32> to vector<8x32xf32>
    %85 = arith.addf %82, %84 : vector<8x32xf32>
    %c0_49 = arith.constant 0 : index
    %c0_50 = arith.constant 0 : index
    %86 = vector.load %arg18[%c0_49, %c0_50] : memref<32x32xf32, #tpu.memory_space<vmem>>, vector<32x32xf32>
    %cst_51 = arith.constant dense<0.000000e+00> : vector<8x32xf32>
    %87 = tpu.matmul %3, %86, %cst_51 {dimension_numbers = #tpu.dot_dimension_numbers<[1], [0], [0], [1], [0, 0, 1, 1], [], []>} : vector<8x32xf32>, vector<32x32xf32>, vector<8x32xf32> -> vector<8x32xf32>
    %c0_52 = arith.constant 0 : index
    %c0_53 = arith.constant 0 : index
    %88 = vector.load %arg19[%c0_52, %c0_53] : memref<1x32xf32, #tpu.memory_space<vmem>>, vector<1x32xf32>
    %89 = vector.broadcast %88 : vector<1x32xf32> to vector<8x32xf32>
    %90 = arith.addf %75, %89 : vector<8x32xf32>
    %c0_54 = arith.constant 0 : index
    %c0_55 = arith.constant 0 : index
    %91 = vector.load %arg20[%c0_54, %c0_55] : memref<1x32xf32, #tpu.memory_space<vmem>>, vector<1x32xf32>
    %92 = vector.broadcast %91 : vector<1x32xf32> to vector<8x32xf32>
    %93 = arith.addf %75, %92 : vector<8x32xf32>
    %94 = vector.extract_strided_slice %90 {offsets = [0, 0], sizes = [8, 8], strides = [1, 1]} : vector<8x32xf32> to vector<8x8xf32>
    %95 = vector.extract_strided_slice %90 {offsets = [0, 8], sizes = [8, 8], strides = [1, 1]} : vector<8x32xf32> to vector<8x8xf32>
    %96 = vector.extract_strided_slice %90 {offsets = [0, 16], sizes = [8, 8], strides = [1, 1]} : vector<8x32xf32> to vector<8x8xf32>
    %97 = vector.extract_strided_slice %90 {offsets = [0, 24], sizes = [8, 8], strides = [1, 1]} : vector<8x32xf32> to vector<8x8xf32>
    %98 = vector.shape_cast %94 : vector<8x8xf32> to vector<1x8x8xf32>
    %99 = vector.shape_cast %95 : vector<8x8xf32> to vector<1x8x8xf32>
    %100 = vector.shape_cast %96 : vector<8x8xf32> to vector<1x8x8xf32>
    %101 = vector.shape_cast %97 : vector<8x8xf32> to vector<1x8x8xf32>
    %102 = tpu.concatenate %98, %99, %100, %101 in 0 : vector<1x8x8xf32>, vector<1x8x8xf32>, vector<1x8x8xf32>, vector<1x8x8xf32> -> vector<4x8x8xf32>
    %103 = vector.extract_strided_slice %93 {offsets = [0, 0], sizes = [8, 8], strides = [1, 1]} : vector<8x32xf32> to vector<8x8xf32>
    %104 = vector.extract_strided_slice %93 {offsets = [0, 8], sizes = [8, 8], strides = [1, 1]} : vector<8x32xf32> to vector<8x8xf32>
    %105 = vector.extract_strided_slice %93 {offsets = [0, 16], sizes = [8, 8], strides = [1, 1]} : vector<8x32xf32> to vector<8x8xf32>
    %106 = vector.extract_strided_slice %93 {offsets = [0, 24], sizes = [8, 8], strides = [1, 1]} : vector<8x32xf32> to vector<8x8xf32>
    %107 = vector.shape_cast %103 : vector<8x8xf32> to vector<1x8x8xf32>
    %108 = vector.shape_cast %104 : vector<8x8xf32> to vector<1x8x8xf32>
    %109 = vector.shape_cast %105 : vector<8x8xf32> to vector<1x8x8xf32>
    %110 = vector.shape_cast %106 : vector<8x8xf32> to vector<1x8x8xf32>
    %111 = tpu.concatenate %107, %108, %109, %110 in 0 : vector<1x8x8xf32>, vector<1x8x8xf32>, vector<1x8x8xf32>, vector<1x8x8xf32> -> vector<4x8x8xf32>
    %112 = vector.extract_strided_slice %80 {offsets = [0, 0], sizes = [8, 8], strides = [1, 1]} : vector<8x32xf32> to vector<8x8xf32>
    %113 = vector.extract_strided_slice %80 {offsets = [0, 8], sizes = [8, 8], strides = [1, 1]} : vector<8x32xf32> to vector<8x8xf32>
    %114 = vector.extract_strided_slice %80 {offsets = [0, 16], sizes = [8, 8], strides = [1, 1]} : vector<8x32xf32> to vector<8x8xf32>
    %115 = vector.extract_strided_slice %80 {offsets = [0, 24], sizes = [8, 8], strides = [1, 1]} : vector<8x32xf32> to vector<8x8xf32>
    %116 = vector.shape_cast %112 : vector<8x8xf32> to vector<1x8x8xf32>
    %117 = vector.shape_cast %113 : vector<8x8xf32> to vector<1x8x8xf32>
    %118 = vector.shape_cast %114 : vector<8x8xf32> to vector<1x8x8xf32>
    %119 = vector.shape_cast %115 : vector<8x8xf32> to vector<1x8x8xf32>
    %120 = tpu.concatenate %116, %117, %118, %119 in 0 : vector<1x8x8xf32>, vector<1x8x8xf32>, vector<1x8x8xf32>, vector<1x8x8xf32> -> vector<4x8x8xf32>
    %121 = vector.extract_strided_slice %87 {offsets = [0, 0], sizes = [8, 8], strides = [1, 1]} : vector<8x32xf32> to vector<8x8xf32>
    %122 = vector.extract_strided_slice %87 {offsets = [0, 8], sizes = [8, 8], strides = [1, 1]} : vector<8x32xf32> to vector<8x8xf32>
    %123 = vector.extract_strided_slice %87 {offsets = [0, 16], sizes = [8, 8], strides = [1, 1]} : vector<8x32xf32> to vector<8x8xf32>
    %124 = vector.extract_strided_slice %87 {offsets = [0, 24], sizes = [8, 8], strides = [1, 1]} : vector<8x32xf32> to vector<8x8xf32>
    %125 = vector.shape_cast %121 : vector<8x8xf32> to vector<1x8x8xf32>
    %126 = vector.shape_cast %122 : vector<8x8xf32> to vector<1x8x8xf32>
    %127 = vector.shape_cast %123 : vector<8x8xf32> to vector<1x8x8xf32>
    %128 = vector.shape_cast %124 : vector<8x8xf32> to vector<1x8x8xf32>
    %129 = tpu.concatenate %125, %126, %127, %128 in 0 : vector<1x8x8xf32>, vector<1x8x8xf32>, vector<1x8x8xf32>, vector<1x8x8xf32> -> vector<4x8x8xf32>
    %130 = vector.extract_strided_slice %85 {offsets = [0, 0], sizes = [8, 8], strides = [1, 1]} : vector<8x32xf32> to vector<8x8xf32>
    %131 = vector.extract_strided_slice %85 {offsets = [0, 8], sizes = [8, 8], strides = [1, 1]} : vector<8x32xf32> to vector<8x8xf32>
    %132 = vector.extract_strided_slice %85 {offsets = [0, 16], sizes = [8, 8], strides = [1, 1]} : vector<8x32xf32> to vector<8x8xf32>
    %133 = vector.extract_strided_slice %85 {offsets = [0, 24], sizes = [8, 8], strides = [1, 1]} : vector<8x32xf32> to vector<8x8xf32>
    %134 = vector.shape_cast %130 : vector<8x8xf32> to vector<1x8x8xf32>
    %135 = vector.shape_cast %131 : vector<8x8xf32> to vector<1x8x8xf32>
    %136 = vector.shape_cast %132 : vector<8x8xf32> to vector<1x8x8xf32>
    %137 = vector.shape_cast %133 : vector<8x8xf32> to vector<1x8x8xf32>
    %138 = tpu.concatenate %134, %135, %136, %137 in 0 : vector<1x8x8xf32>, vector<1x8x8xf32>, vector<1x8x8xf32>, vector<1x8x8xf32> -> vector<4x8x8xf32>
    "tpu.trace_start"() <{level = 10 : i32, message = "htd,hsd->hts"}> : () -> ()
    %cst_56 = arith.constant dense<0.000000e+00> : vector<4x8x8xf32>
    %139 = tpu.matmul %102, %120, %cst_56 {dimension_numbers = #tpu.dot_dimension_numbers<[2], [2], [1], [1], [0, 0, 0, 1, 1, 1], [0], [0]>} : vector<4x8x8xf32>, vector<4x8x8xf32>, vector<4x8x8xf32> -> vector<4x8x8xf32>
    %cst_57 = arith.constant dense<0.000000e+00> : vector<4x8x8xf32>
    %140 = tpu.matmul %111, %129, %cst_57 {dimension_numbers = #tpu.dot_dimension_numbers<[2], [2], [1], [1], [0, 0, 0, 1, 1, 1], [0], [0]>} : vector<4x8x8xf32>, vector<4x8x8xf32>, vector<4x8x8xf32> -> vector<4x8x8xf32>
    "tpu.trace_stop"() : () -> ()
    %141 = arith.index_cast %arg0 : i32 to index
    %142 = memref.load %arg1[%141] : memref<2xi32, #tpu.memory_space<smem>>
    %143 = tpu.iota {dimensions = array<i32: 2>} : vector<1x1x8xi32>
    %144 = vector.broadcast %142 : i32 to vector<1x1x8xi32>
    %145 = arith.cmpi slt, %143, %144 : vector<1x1x8xi32>
    %146 = arith.addf %139, %140 : vector<4x8x8xf32>
    %cst_58 = arith.constant 0.353553385 : f32
    %147 = vector.broadcast %cst_58 : f32 to vector<4x8x8xf32>
    %148 = arith.mulf %146, %147 : vector<4x8x8xf32>
    %cst_59 = arith.constant 0.000000e+00 : f32
    %cst_60 = arith.constant -3.40282347E+38 : f32
    %149 = vector.broadcast %cst_59 : f32 to vector<1x1x8xf32>
    %150 = vector.broadcast %cst_60 : f32 to vector<1x1x8xf32>
    %151 = arith.select %145, %149, %150 : vector<1x1x8xi1>, vector<1x1x8xf32>
    %152 = vector.broadcast %151 : vector<1x1x8xf32> to vector<4x8x8xf32>
    %153 = arith.addf %148, %152 : vector<4x8x8xf32>
    %cst_61 = arith.constant dense<0xFF800000> : vector<4x8xf32>
    %154 = vector.multi_reduction <maximumf>, %153, %cst_61 [2] : vector<4x8x8xf32> to vector<4x8xf32>
    %155 = vector.shape_cast %154 : vector<4x8xf32> to vector<4x8x1xf32>
    %156 = vector.broadcast %155 : vector<4x8x1xf32> to vector<4x8x8xf32>
    %157 = arith.subf %153, %156 : vector<4x8x8xf32>
    %158 = math.exp %157 : vector<4x8x8xf32>
    %cst_62 = arith.constant dense<0.000000e+00> : vector<4x8xf32>
    %159 = vector.multi_reduction <add>, %158, %cst_62 [2] : vector<4x8x8xf32> to vector<4x8xf32>
    %160 = vector.shape_cast %159 : vector<4x8xf32> to vector<4x8x1xf32>
    %161 = tpu.reciprocal %160 {approx = true} : vector<4x8x1xf32> -> vector<4x8x1xf32>
    %162 = vector.broadcast %161 : vector<4x8x1xf32> to vector<4x8x8xf32>
    %163 = arith.mulf %158, %162 : vector<4x8x8xf32>
    %164 = arith.extui %145 : vector<1x1x8xi1> to vector<1x1x8xi32>
    %165 = arith.sitofp %164 : vector<1x1x8xi32> to vector<1x1x8xf32>
    %166 = vector.broadcast %165 : vector<1x1x8xf32> to vector<4x8x8xf32>
    %167 = arith.mulf %163, %166 : vector<4x8x8xf32>
    "tpu.trace_start"() <{level = 10 : i32, message = "hts,hsd->htd"}> : () -> ()
    %cst_63 = arith.constant dense<0.000000e+00> : vector<4x8x8xf32>
    %168 = tpu.matmul %167, %138, %cst_63 {dimension_numbers = #tpu.dot_dimension_numbers<[2], [1], [1], [2], [0, 0, 0, 1, 1, 2], [0], [0]>} : vector<4x8x8xf32>, vector<4x8x8xf32>, vector<4x8x8xf32> -> vector<4x8x8xf32>
    "tpu.trace_stop"() : () -> ()
    %169 = vector.extract_strided_slice %168 {offsets = [0, 0, 0], sizes = [1, 8, 8], strides = [1, 1, 1]} : vector<4x8x8xf32> to vector<1x8x8xf32>
    %170 = vector.shape_cast %169 : vector<1x8x8xf32> to vector<8x8xf32>
    %171 = vector.extract_strided_slice %168 {offsets = [1, 0, 0], sizes = [1, 8, 8], strides = [1, 1, 1]} : vector<4x8x8xf32> to vector<1x8x8xf32>
    %172 = vector.shape_cast %171 : vector<1x8x8xf32> to vector<8x8xf32>
    %173 = vector.extract_strided_slice %168 {offsets = [2, 0, 0], sizes = [1, 8, 8], strides = [1, 1, 1]} : vector<4x8x8xf32> to vector<1x8x8xf32>
    %174 = vector.shape_cast %173 : vector<1x8x8xf32> to vector<8x8xf32>
    %175 = vector.extract_strided_slice %168 {offsets = [3, 0, 0], sizes = [1, 8, 8], strides = [1, 1, 1]} : vector<4x8x8xf32> to vector<1x8x8xf32>
    %176 = vector.shape_cast %175 : vector<1x8x8xf32> to vector<8x8xf32>
    %177 = tpu.concatenate %170, %172, %174, %176 in 1 : vector<8x8xf32>, vector<8x8xf32>, vector<8x8xf32>, vector<8x8xf32> -> vector<8x32xf32>
    %c0_64 = arith.constant 0 : index
    %c0_65 = arith.constant 0 : index
    %178 = vector.load %arg21[%c0_64, %c0_65] : memref<32x32xf32, #tpu.memory_space<vmem>>, vector<32x32xf32>
    %cst_66 = arith.constant dense<0.000000e+00> : vector<8x32xf32>
    %179 = tpu.matmul %177, %178, %cst_66 {dimension_numbers = #tpu.dot_dimension_numbers<[1], [0], [0], [1], [0, 0, 1, 1], [], []>} : vector<8x32xf32>, vector<32x32xf32>, vector<8x32xf32> -> vector<8x32xf32>
    %180 = arith.addf %46, %179 : vector<8x32xf32>
    %c0_67 = arith.constant 0 : index
    %c0_68 = arith.constant 0 : index
    %181 = vector.load %arg22[%c0_67, %c0_68] : memref<1x32xf32, #tpu.memory_space<vmem>>, vector<1x32xf32>
    %182 = vector.broadcast %181 : vector<1x32xf32> to vector<8x32xf32>
    %183 = arith.addf %180, %182 : vector<8x32xf32>
    %c0_69 = arith.constant 0 : index
    %c0_70 = arith.constant 0 : index
    %184 = vector.load %arg23[%c0_69, %c0_70] : memref<1x32xf32, #tpu.memory_space<vmem>>, vector<1x32xf32>
    %c0_71 = arith.constant 0 : index
    %c0_72 = arith.constant 0 : index
    %185 = vector.load %arg24[%c0_71, %c0_72] : memref<1x32xf32, #tpu.memory_space<vmem>>, vector<1x32xf32>
    %cst_73 = arith.constant dense<0.000000e+00> : vector<8xf32>
    %186 = vector.multi_reduction <add>, %183, %cst_73 [1] : vector<8x32xf32> to vector<8xf32>
    %187 = vector.shape_cast %186 : vector<8xf32> to vector<8x1xf32>
    %cst_74 = arith.constant 3.200000e+01 : f32
    %188 = vector.broadcast %cst_74 : f32 to vector<8x1xf32>
    %189 = arith.divf %187, %188 : vector<8x1xf32>
    %190 = vector.broadcast %189 : vector<8x1xf32> to vector<8x32xf32>
    %191 = arith.subf %183, %190 : vector<8x32xf32>
    %192 = arith.mulf %191, %191 : vector<8x32xf32>
    %cst_75 = arith.constant dense<0.000000e+00> : vector<8xf32>
    %193 = vector.multi_reduction <add>, %192, %cst_75 [1] : vector<8x32xf32> to vector<8xf32>
    %194 = vector.shape_cast %193 : vector<8xf32> to vector<8x1xf32>
    %cst_76 = arith.constant 3.200000e+01 : f32
    %195 = vector.broadcast %cst_76 : f32 to vector<8x1xf32>
    %196 = arith.divf %194, %195 : vector<8x1xf32>
    %197 = vector.broadcast %189 : vector<8x1xf32> to vector<8x32xf32>
    %198 = arith.subf %183, %197 : vector<8x32xf32>
    %cst_77 = arith.constant 9.99999974E-6 : f32
    %199 = vector.broadcast %cst_77 : f32 to vector<8x1xf32>
    %200 = arith.addf %196, %199 : vector<8x1xf32>
    %201 = math.rsqrt %200 : vector<8x1xf32>
    %202 = vector.broadcast %201 : vector<8x1xf32> to vector<8x32xf32>
    %203 = arith.mulf %198, %202 : vector<8x32xf32>
    %204 = vector.broadcast %184 : vector<1x32xf32> to vector<8x32xf32>
    %205 = arith.mulf %203, %204 : vector<8x32xf32>
    %206 = vector.broadcast %185 : vector<1x32xf32> to vector<8x32xf32>
    %207 = arith.addf %205, %206 : vector<8x32xf32>
    %c0_78 = arith.constant 0 : index
    %c0_79 = arith.constant 0 : index
    %208 = vector.load %arg25[%c0_78, %c0_79] : memref<32x32xf32, #tpu.memory_space<vmem>>, vector<32x32xf32>
    %cst_80 = arith.constant dense<0.000000e+00> : vector<8x32xf32>
    %209 = tpu.matmul %207, %208, %cst_80 {dimension_numbers = #tpu.dot_dimension_numbers<[1], [0], [0], [1], [0, 0, 1, 1], [], []>} : vector<8x32xf32>, vector<32x32xf32>, vector<8x32xf32> -> vector<8x32xf32>
    %c0_81 = arith.constant 0 : index
    %c0_82 = arith.constant 0 : index
    %210 = vector.load %arg26[%c0_81, %c0_82] : memref<1x32xf32, #tpu.memory_space<vmem>>, vector<1x32xf32>
    %211 = vector.broadcast %210 : vector<1x32xf32> to vector<8x32xf32>
    %212 = arith.addf %209, %211 : vector<8x32xf32>
    %c0_83 = arith.constant 0 : index
    %c0_84 = arith.constant 0 : index
    %213 = vector.load %arg27[%c0_83, %c0_84] : memref<32x32xf32, #tpu.memory_space<vmem>>, vector<32x32xf32>
    %cst_85 = arith.constant dense<0.000000e+00> : vector<8x32xf32>
    %214 = tpu.matmul %207, %213, %cst_85 {dimension_numbers = #tpu.dot_dimension_numbers<[1], [0], [0], [1], [0, 0, 1, 1], [], []>} : vector<8x32xf32>, vector<32x32xf32>, vector<8x32xf32> -> vector<8x32xf32>
    %c0_86 = arith.constant 0 : index
    %c0_87 = arith.constant 0 : index
    %215 = vector.load %arg28[%c0_86, %c0_87] : memref<1x32xf32, #tpu.memory_space<vmem>>, vector<1x32xf32>
    %216 = vector.broadcast %215 : vector<1x32xf32> to vector<8x32xf32>
    %217 = arith.addf %214, %216 : vector<8x32xf32>
    %218 = arith.negf %217 : vector<8x32xf32>
    %219 = math.exp %218 : vector<8x32xf32>
    %cst_88 = arith.constant 1.000000e+00 : f32
    %220 = vector.broadcast %cst_88 : f32 to vector<8x32xf32>
    %221 = arith.addf %220, %219 : vector<8x32xf32>
    %222 = arith.divf %220, %221 : vector<8x32xf32>
    %223 = arith.mulf %212, %222 : vector<8x32xf32>
    %224 = tpu.iota {dimensions = array<i32: 0>} : vector<8x32xi32>
    %cst_89 = arith.constant 0.000000e+00 : f32
    %225 = vector.broadcast %cst_89 : f32 to vector<8x32xf32>
    %c3_i32 = arith.constant 3 : i32
    %226 = tpu.dynamic_rotate %223 by %c3_i32 dim 0 : vector<8x32xf32>, i32 -> vector<8x32xf32>
    %c3_i32_90 = arith.constant 3 : i32
    %227 = vector.broadcast %c3_i32_90 : i32 to vector<8x32xi32>
    %228 = arith.cmpi sge, %224, %227 : vector<8x32xi32>
    %c11_i32 = arith.constant 11 : i32
    %229 = vector.broadcast %c11_i32 : i32 to vector<8x32xi32>
    %230 = arith.cmpi slt, %224, %229 : vector<8x32xi32>
    %231 = arith.andi %228, %230 : vector<8x32xi1>
    %cst_91 = arith.constant 0.000000e+00 : f32
    %232 = vector.broadcast %cst_91 : f32 to vector<8x32xf32>
    %233 = arith.select %231, %226, %232 : vector<8x32xi1>, vector<8x32xf32>
    %c0_92 = arith.constant 0 : index
    %c0_93 = arith.constant 0 : index
    %c0_94 = arith.constant 0 : index
    %234 = vector.load %arg29[%c0_92, %c0_93, %c0_94] : memref<7x1x32xf32, #tpu.memory_space<vmem>>, vector<1x1x32xf32>
    %235 = vector.shape_cast %234 : vector<1x1x32xf32> to vector<1x32xf32>
    %236 = vector.broadcast %235 : vector<1x32xf32> to vector<8x32xf32>
    %237 = arith.mulf %233, %236 : vector<8x32xf32>
    %238 = arith.addf %225, %237 : vector<8x32xf32>
    %c2_i32 = arith.constant 2 : i32
    %239 = tpu.dynamic_rotate %223 by %c2_i32 dim 0 : vector<8x32xf32>, i32 -> vector<8x32xf32>
    %c2_i32_95 = arith.constant 2 : i32
    %240 = vector.broadcast %c2_i32_95 : i32 to vector<8x32xi32>
    %241 = arith.cmpi sge, %224, %240 : vector<8x32xi32>
    %c10_i32 = arith.constant 10 : i32
    %242 = vector.broadcast %c10_i32 : i32 to vector<8x32xi32>
    %243 = arith.cmpi slt, %224, %242 : vector<8x32xi32>
    %244 = arith.andi %241, %243 : vector<8x32xi1>
    %cst_96 = arith.constant 0.000000e+00 : f32
    %245 = vector.broadcast %cst_96 : f32 to vector<8x32xf32>
    %246 = arith.select %244, %239, %245 : vector<8x32xi1>, vector<8x32xf32>
    %c1 = arith.constant 1 : index
    %c0_97 = arith.constant 0 : index
    %c0_98 = arith.constant 0 : index
    %247 = vector.load %arg29[%c1, %c0_97, %c0_98] : memref<7x1x32xf32, #tpu.memory_space<vmem>>, vector<1x1x32xf32>
    %248 = vector.shape_cast %247 : vector<1x1x32xf32> to vector<1x32xf32>
    %249 = vector.broadcast %248 : vector<1x32xf32> to vector<8x32xf32>
    %250 = arith.mulf %246, %249 : vector<8x32xf32>
    %251 = arith.addf %238, %250 : vector<8x32xf32>
    %c1_i32 = arith.constant 1 : i32
    %252 = tpu.dynamic_rotate %223 by %c1_i32 dim 0 : vector<8x32xf32>, i32 -> vector<8x32xf32>
    %c1_i32_99 = arith.constant 1 : i32
    %253 = vector.broadcast %c1_i32_99 : i32 to vector<8x32xi32>
    %254 = arith.cmpi sge, %224, %253 : vector<8x32xi32>
    %c9_i32 = arith.constant 9 : i32
    %255 = vector.broadcast %c9_i32 : i32 to vector<8x32xi32>
    %256 = arith.cmpi slt, %224, %255 : vector<8x32xi32>
    %257 = arith.andi %254, %256 : vector<8x32xi1>
    %cst_100 = arith.constant 0.000000e+00 : f32
    %258 = vector.broadcast %cst_100 : f32 to vector<8x32xf32>
    %259 = arith.select %257, %252, %258 : vector<8x32xi1>, vector<8x32xf32>
    %c2 = arith.constant 2 : index
    %c0_101 = arith.constant 0 : index
    %c0_102 = arith.constant 0 : index
    %260 = vector.load %arg29[%c2, %c0_101, %c0_102] : memref<7x1x32xf32, #tpu.memory_space<vmem>>, vector<1x1x32xf32>
    %261 = vector.shape_cast %260 : vector<1x1x32xf32> to vector<1x32xf32>
    %262 = vector.broadcast %261 : vector<1x32xf32> to vector<8x32xf32>
    %263 = arith.mulf %259, %262 : vector<8x32xf32>
    %264 = arith.addf %251, %263 : vector<8x32xf32>
    %c3 = arith.constant 3 : index
    %c0_103 = arith.constant 0 : index
    %c0_104 = arith.constant 0 : index
    %265 = vector.load %arg29[%c3, %c0_103, %c0_104] : memref<7x1x32xf32, #tpu.memory_space<vmem>>, vector<1x1x32xf32>
    %266 = vector.shape_cast %265 : vector<1x1x32xf32> to vector<1x32xf32>
    %267 = vector.broadcast %266 : vector<1x32xf32> to vector<8x32xf32>
    %268 = arith.mulf %223, %267 : vector<8x32xf32>
    %269 = arith.addf %264, %268 : vector<8x32xf32>
    %c7_i32 = arith.constant 7 : i32
    %270 = tpu.dynamic_rotate %223 by %c7_i32 dim 0 : vector<8x32xf32>, i32 -> vector<8x32xf32>
    %c-1_i32 = arith.constant -1 : i32
    %271 = vector.broadcast %c-1_i32 : i32 to vector<8x32xi32>
    %272 = arith.cmpi sge, %224, %271 : vector<8x32xi32>
    %c7_i32_105 = arith.constant 7 : i32
    %273 = vector.broadcast %c7_i32_105 : i32 to vector<8x32xi32>
    %274 = arith.cmpi slt, %224, %273 : vector<8x32xi32>
    %275 = arith.andi %272, %274 : vector<8x32xi1>
    %cst_106 = arith.constant 0.000000e+00 : f32
    %276 = vector.broadcast %cst_106 : f32 to vector<8x32xf32>
    %277 = arith.select %275, %270, %276 : vector<8x32xi1>, vector<8x32xf32>
    %c4 = arith.constant 4 : index
    %c0_107 = arith.constant 0 : index
    %c0_108 = arith.constant 0 : index
    %278 = vector.load %arg29[%c4, %c0_107, %c0_108] : memref<7x1x32xf32, #tpu.memory_space<vmem>>, vector<1x1x32xf32>
    %279 = vector.shape_cast %278 : vector<1x1x32xf32> to vector<1x32xf32>
    %280 = vector.broadcast %279 : vector<1x32xf32> to vector<8x32xf32>
    %281 = arith.mulf %277, %280 : vector<8x32xf32>
    %282 = arith.addf %269, %281 : vector<8x32xf32>
    %c6_i32 = arith.constant 6 : i32
    %283 = tpu.dynamic_rotate %223 by %c6_i32 dim 0 : vector<8x32xf32>, i32 -> vector<8x32xf32>
    %c-2_i32 = arith.constant -2 : i32
    %284 = vector.broadcast %c-2_i32 : i32 to vector<8x32xi32>
    %285 = arith.cmpi sge, %224, %284 : vector<8x32xi32>
    %c6_i32_109 = arith.constant 6 : i32
    %286 = vector.broadcast %c6_i32_109 : i32 to vector<8x32xi32>
    %287 = arith.cmpi slt, %224, %286 : vector<8x32xi32>
    %288 = arith.andi %285, %287 : vector<8x32xi1>
    %cst_110 = arith.constant 0.000000e+00 : f32
    %289 = vector.broadcast %cst_110 : f32 to vector<8x32xf32>
    %290 = arith.select %288, %283, %289 : vector<8x32xi1>, vector<8x32xf32>
    %c5 = arith.constant 5 : index
    %c0_111 = arith.constant 0 : index
    %c0_112 = arith.constant 0 : index
    %291 = vector.load %arg29[%c5, %c0_111, %c0_112] : memref<7x1x32xf32, #tpu.memory_space<vmem>>, vector<1x1x32xf32>
    %292 = vector.shape_cast %291 : vector<1x1x32xf32> to vector<1x32xf32>
    %293 = vector.broadcast %292 : vector<1x32xf32> to vector<8x32xf32>
    %294 = arith.mulf %290, %293 : vector<8x32xf32>
    %295 = arith.addf %282, %294 : vector<8x32xf32>
    %c5_i32 = arith.constant 5 : i32
    %296 = tpu.dynamic_rotate %223 by %c5_i32 dim 0 : vector<8x32xf32>, i32 -> vector<8x32xf32>
    %c-3_i32 = arith.constant -3 : i32
    %297 = vector.broadcast %c-3_i32 : i32 to vector<8x32xi32>
    %298 = arith.cmpi sge, %224, %297 : vector<8x32xi32>
    %c5_i32_113 = arith.constant 5 : i32
    %299 = vector.broadcast %c5_i32_113 : i32 to vector<8x32xi32>
    %300 = arith.cmpi slt, %224, %299 : vector<8x32xi32>
    %301 = arith.andi %298, %300 : vector<8x32xi1>
    %cst_114 = arith.constant 0.000000e+00 : f32
    %302 = vector.broadcast %cst_114 : f32 to vector<8x32xf32>
    %303 = arith.select %301, %296, %302 : vector<8x32xi1>, vector<8x32xf32>
    %c6 = arith.constant 6 : index
    %c0_115 = arith.constant 0 : index
    %c0_116 = arith.constant 0 : index
    %304 = vector.load %arg29[%c6, %c0_115, %c0_116] : memref<7x1x32xf32, #tpu.memory_space<vmem>>, vector<1x1x32xf32>
    %305 = vector.shape_cast %304 : vector<1x1x32xf32> to vector<1x32xf32>
    %306 = vector.broadcast %305 : vector<1x32xf32> to vector<8x32xf32>
    %307 = arith.mulf %303, %306 : vector<8x32xf32>
    %308 = arith.addf %295, %307 : vector<8x32xf32>
    %c0_117 = arith.constant 0 : index
    %c0_118 = arith.constant 0 : index
    %309 = vector.load %arg30[%c0_117, %c0_118] : memref<1x32xf32, #tpu.memory_space<vmem>>, vector<1x32xf32>
    %310 = vector.broadcast %309 : vector<1x32xf32> to vector<8x32xf32>
    %311 = arith.addf %308, %310 : vector<8x32xf32>
    %c0_119 = arith.constant 0 : index
    %c0_120 = arith.constant 0 : index
    %312 = vector.load %arg31[%c0_119, %c0_120] : memref<1x32xf32, #tpu.memory_space<vmem>>, vector<1x32xf32>
    %313 = vector.broadcast %312 : vector<1x32xf32> to vector<8x32xf32>
    %314 = arith.mulf %311, %313 : vector<8x32xf32>
    %c0_121 = arith.constant 0 : index
    %c0_122 = arith.constant 0 : index
    %315 = vector.load %arg32[%c0_121, %c0_122] : memref<1x32xf32, #tpu.memory_space<vmem>>, vector<1x32xf32>
    %316 = vector.broadcast %315 : vector<1x32xf32> to vector<8x32xf32>
    %317 = arith.addf %314, %316 : vector<8x32xf32>
    %318 = arith.negf %317 : vector<8x32xf32>
    %319 = math.exp %318 : vector<8x32xf32>
    %cst_123 = arith.constant 1.000000e+00 : f32
    %320 = vector.broadcast %cst_123 : f32 to vector<8x32xf32>
    %321 = arith.addf %320, %319 : vector<8x32xf32>
    %322 = arith.divf %320, %321 : vector<8x32xf32>
    %323 = arith.mulf %317, %322 : vector<8x32xf32>
    %c0_124 = arith.constant 0 : index
    %c0_125 = arith.constant 0 : index
    %324 = vector.load %arg33[%c0_124, %c0_125] : memref<32x32xf32, #tpu.memory_space<vmem>>, vector<32x32xf32>
    %cst_126 = arith.constant dense<0.000000e+00> : vector<8x32xf32>
    %325 = tpu.matmul %323, %324, %cst_126 {dimension_numbers = #tpu.dot_dimension_numbers<[1], [0], [0], [1], [0, 0, 1, 1], [], []>} : vector<8x32xf32>, vector<32x32xf32>, vector<8x32xf32> -> vector<8x32xf32>
    %326 = arith.addf %183, %325 : vector<8x32xf32>
    %c0_127 = arith.constant 0 : index
    %c0_128 = arith.constant 0 : index
    %327 = vector.load %arg34[%c0_127, %c0_128] : memref<1x32xf32, #tpu.memory_space<vmem>>, vector<1x32xf32>
    %328 = vector.broadcast %327 : vector<1x32xf32> to vector<8x32xf32>
    %329 = arith.addf %326, %328 : vector<8x32xf32>
    %c0_129 = arith.constant 0 : index
    %c0_130 = arith.constant 0 : index
    %330 = vector.load %arg35[%c0_129, %c0_130] : memref<1x32xf32, #tpu.memory_space<vmem>>, vector<1x32xf32>
    %c0_131 = arith.constant 0 : index
    %c0_132 = arith.constant 0 : index
    %331 = vector.load %arg36[%c0_131, %c0_132] : memref<1x32xf32, #tpu.memory_space<vmem>>, vector<1x32xf32>
    %cst_133 = arith.constant dense<0.000000e+00> : vector<8xf32>
    %332 = vector.multi_reduction <add>, %329, %cst_133 [1] : vector<8x32xf32> to vector<8xf32>
    %333 = vector.shape_cast %332 : vector<8xf32> to vector<8x1xf32>
    %cst_134 = arith.constant 3.200000e+01 : f32
    %334 = vector.broadcast %cst_134 : f32 to vector<8x1xf32>
    %335 = arith.divf %333, %334 : vector<8x1xf32>
    %336 = vector.broadcast %335 : vector<8x1xf32> to vector<8x32xf32>
    %337 = arith.subf %329, %336 : vector<8x32xf32>
    %338 = arith.mulf %337, %337 : vector<8x32xf32>
    %cst_135 = arith.constant dense<0.000000e+00> : vector<8xf32>
    %339 = vector.multi_reduction <add>, %338, %cst_135 [1] : vector<8x32xf32> to vector<8xf32>
    %340 = vector.shape_cast %339 : vector<8xf32> to vector<8x1xf32>
    %cst_136 = arith.constant 3.200000e+01 : f32
    %341 = vector.broadcast %cst_136 : f32 to vector<8x1xf32>
    %342 = arith.divf %340, %341 : vector<8x1xf32>
    %343 = vector.broadcast %335 : vector<8x1xf32> to vector<8x32xf32>
    %344 = arith.subf %329, %343 : vector<8x32xf32>
    %cst_137 = arith.constant 9.99999974E-6 : f32
    %345 = vector.broadcast %cst_137 : f32 to vector<8x1xf32>
    %346 = arith.addf %342, %345 : vector<8x1xf32>
    %347 = math.rsqrt %346 : vector<8x1xf32>
    %348 = vector.broadcast %347 : vector<8x1xf32> to vector<8x32xf32>
    %349 = arith.mulf %344, %348 : vector<8x32xf32>
    %350 = vector.broadcast %330 : vector<1x32xf32> to vector<8x32xf32>
    %351 = arith.mulf %349, %350 : vector<8x32xf32>
    %352 = vector.broadcast %331 : vector<1x32xf32> to vector<8x32xf32>
    %353 = arith.addf %351, %352 : vector<8x32xf32>
    %c0_138 = arith.constant 0 : index
    %c0_139 = arith.constant 0 : index
    %354 = vector.load %arg37[%c0_138, %c0_139] : memref<32x64xf32, #tpu.memory_space<vmem>>, vector<32x64xf32>
    %cst_140 = arith.constant dense<0.000000e+00> : vector<8x64xf32>
    %355 = tpu.matmul %353, %354, %cst_140 {dimension_numbers = #tpu.dot_dimension_numbers<[1], [0], [0], [1], [0, 0, 1, 1], [], []>} : vector<8x32xf32>, vector<32x64xf32>, vector<8x64xf32> -> vector<8x64xf32>
    %c0_141 = arith.constant 0 : index
    %c0_142 = arith.constant 0 : index
    %356 = vector.load %arg38[%c0_141, %c0_142] : memref<1x64xf32, #tpu.memory_space<vmem>>, vector<1x64xf32>
    %357 = vector.broadcast %356 : vector<1x64xf32> to vector<8x64xf32>
    %358 = arith.addf %355, %357 : vector<8x64xf32>
    %359 = arith.negf %358 : vector<8x64xf32>
    %360 = math.exp %359 : vector<8x64xf32>
    %cst_143 = arith.constant 1.000000e+00 : f32
    %361 = vector.broadcast %cst_143 : f32 to vector<8x64xf32>
    %362 = arith.addf %361, %360 : vector<8x64xf32>
    %363 = arith.divf %361, %362 : vector<8x64xf32>
    %364 = arith.mulf %358, %363 : vector<8x64xf32>
    %c0_144 = arith.constant 0 : index
    %c0_145 = arith.constant 0 : index
    %365 = vector.load %arg39[%c0_144, %c0_145] : memref<64x32xf32, #tpu.memory_space<vmem>>, vector<64x32xf32>
    %cst_146 = arith.constant dense<0.000000e+00> : vector<8x32xf32>
    %366 = tpu.matmul %364, %365, %cst_146 {dimension_numbers = #tpu.dot_dimension_numbers<[1], [0], [0], [1], [0, 0, 1, 1], [], []>} : vector<8x64xf32>, vector<64x32xf32>, vector<8x32xf32> -> vector<8x32xf32>
    %c0_147 = arith.constant 0 : index
    %c0_148 = arith.constant 0 : index
    %367 = vector.load %arg40[%c0_147, %c0_148] : memref<1x32xf32, #tpu.memory_space<vmem>>, vector<1x32xf32>
    %368 = vector.broadcast %367 : vector<1x32xf32> to vector<8x32xf32>
    %369 = arith.addf %366, %368 : vector<8x32xf32>
    %cst_149 = arith.constant 5.000000e-01 : f32
    %370 = vector.broadcast %cst_149 : f32 to vector<8x32xf32>
    %371 = arith.mulf %370, %369 : vector<8x32xf32>
    %372 = arith.addf %329, %371 : vector<8x32xf32>
    %c0_150 = arith.constant 0 : index
    %c0_151 = arith.constant 0 : index
    %373 = vector.load %arg41[%c0_150, %c0_151] : memref<1x32xf32, #tpu.memory_space<vmem>>, vector<1x32xf32>
    %c0_152 = arith.constant 0 : index
    %c0_153 = arith.constant 0 : index
    %374 = vector.load %arg42[%c0_152, %c0_153] : memref<1x32xf32, #tpu.memory_space<vmem>>, vector<1x32xf32>
    %cst_154 = arith.constant dense<0.000000e+00> : vector<8xf32>
    %375 = vector.multi_reduction <add>, %372, %cst_154 [1] : vector<8x32xf32> to vector<8xf32>
    %376 = vector.shape_cast %375 : vector<8xf32> to vector<8x1xf32>
    %cst_155 = arith.constant 3.200000e+01 : f32
    %377 = vector.broadcast %cst_155 : f32 to vector<8x1xf32>
    %378 = arith.divf %376, %377 : vector<8x1xf32>
    %379 = vector.broadcast %378 : vector<8x1xf32> to vector<8x32xf32>
    %380 = arith.subf %372, %379 : vector<8x32xf32>
    %381 = arith.mulf %380, %380 : vector<8x32xf32>
    %cst_156 = arith.constant dense<0.000000e+00> : vector<8xf32>
    %382 = vector.multi_reduction <add>, %381, %cst_156 [1] : vector<8x32xf32> to vector<8xf32>
    %383 = vector.shape_cast %382 : vector<8xf32> to vector<8x1xf32>
    %cst_157 = arith.constant 3.200000e+01 : f32
    %384 = vector.broadcast %cst_157 : f32 to vector<8x1xf32>
    %385 = arith.divf %383, %384 : vector<8x1xf32>
    %386 = vector.broadcast %378 : vector<8x1xf32> to vector<8x32xf32>
    %387 = arith.subf %372, %386 : vector<8x32xf32>
    %cst_158 = arith.constant 9.99999974E-6 : f32
    %388 = vector.broadcast %cst_158 : f32 to vector<8x1xf32>
    %389 = arith.addf %385, %388 : vector<8x1xf32>
    %390 = math.rsqrt %389 : vector<8x1xf32>
    %391 = vector.broadcast %390 : vector<8x1xf32> to vector<8x32xf32>
    %392 = arith.mulf %387, %391 : vector<8x32xf32>
    %393 = vector.broadcast %373 : vector<1x32xf32> to vector<8x32xf32>
    %394 = arith.mulf %392, %393 : vector<8x32xf32>
    %395 = vector.broadcast %374 : vector<1x32xf32> to vector<8x32xf32>
    %396 = arith.addf %394, %395 : vector<8x32xf32>
    %c0_159 = arith.constant 0 : index
    %c0_160 = arith.constant 0 : index
    %c0_161 = arith.constant 0 : index
    %397 = vector.load %arg43[%c0_159, %c0_160, %c0_161] : memref<1x8x32xf32, #tpu.memory_space<vmem>>, vector<1x8x32xf32>
    %398 = vector.shape_cast %397 : vector<1x8x32xf32> to vector<8x32xf32>
    %399 = vector.shape_cast %396 : vector<8x32xf32> to vector<1x8x32xf32>
    tpu.vector_store %arg43[%c0_159, %c0_160, %c0_161], %399 {strides = array<i32>} : memref<1x8x32xf32, #tpu.memory_space<vmem>>, vector<1x8x32xf32>,
    return
  }
  func.func @transform_0(%arg0: i32, %arg1: memref<2xi32, #tpu.memory_space<smem>>) -> (i32, i32, i32) {
    %c0_i32 = arith.constant 0 : i32
    %c0_i32_0 = arith.constant 0 : i32
    %c0_i32_1 = arith.constant 0 : i32
    return %arg0, %c0_i32, %c0_i32_0 : i32, i32, i32
  }
  func.func @transform_1(%arg0: i32, %arg1: memref<2xi32, #tpu.memory_space<smem>>) -> (i32, i32, i32) {
    %c0_i32 = arith.constant 0 : i32
    %c0_i32_0 = arith.constant 0 : i32
    %c0_i32_1 = arith.constant 0 : i32
    %c0_i32_2 = arith.constant 0 : i32
    return %c0_i32, %c0_i32_0, %c0_i32_1 : i32, i32, i32
  }
  func.func @transform_2(%arg0: i32, %arg1: memref<2xi32, #tpu.memory_space<smem>>) -> (i32, i32) {
    %c0_i32 = arith.constant 0 : i32
    %c0_i32_0 = arith.constant 0 : i32
    %c0_i32_1 = arith.constant 0 : i32
    return %c0_i32, %c0_i32_0 : i32, i32
  }
  func.func @transform_3(%arg0: i32, %arg1: memref<2xi32, #tpu.memory_space<smem>>) -> (i32, i32) {
    %c0_i32 = arith.constant 0 : i32
    %c0_i32_0 = arith.constant 0 : i32
    %c0_i32_1 = arith.constant 0 : i32
    return %c0_i32, %c0_i32_0 : i32, i32
  }
  func.func @transform_4(%arg0: i32, %arg1: memref<2xi32, #tpu.memory_space<smem>>) -> (i32, i32) {
    %c0_i32 = arith.constant 0 : i32
    %c0_i32_0 = arith.constant 0 : i32
    %c0_i32_1 = arith.constant 0 : i32
    return %c0_i32, %c0_i32_0 : i32, i32
  }
  func.func @transform_5(%arg0: i32, %arg1: memref<2xi32, #tpu.memory_space<smem>>) -> (i32, i32) {
    %c0_i32 = arith.constant 0 : i32
    %c0_i32_0 = arith.constant 0 : i32
    %c0_i32_1 = arith.constant 0 : i32
    return %c0_i32, %c0_i32_0 : i32, i32
  }
  func.func @transform_6(%arg0: i32, %arg1: memref<2xi32, #tpu.memory_space<smem>>) -> (i32, i32) {
    %c0_i32 = arith.constant 0 : i32
    %c0_i32_0 = arith.constant 0 : i32
    %c0_i32_1 = arith.constant 0 : i32
    return %c0_i32, %c0_i32_0 : i32, i32
  }
  func.func @transform_7(%arg0: i32, %arg1: memref<2xi32, #tpu.memory_space<smem>>) -> (i32, i32) {
    %c0_i32 = arith.constant 0 : i32
    %c0_i32_0 = arith.constant 0 : i32
    %c0_i32_1 = arith.constant 0 : i32
    return %c0_i32, %c0_i32_0 : i32, i32
  }
  func.func @transform_8(%arg0: i32, %arg1: memref<2xi32, #tpu.memory_space<smem>>) -> (i32, i32) {
    %c0_i32 = arith.constant 0 : i32
    %c0_i32_0 = arith.constant 0 : i32
    %c0_i32_1 = arith.constant 0 : i32
    return %c0_i32, %c0_i32_0 : i32, i32
  }
  func.func @transform_9(%arg0: i32, %arg1: memref<2xi32, #tpu.memory_space<smem>>) -> (i32, i32) {
    %c0_i32 = arith.constant 0 : i32
    %c0_i32_0 = arith.constant 0 : i32
    %c0_i32_1 = arith.constant 0 : i32
    return %c0_i32, %c0_i32_0 : i32, i32
  }
  func.func @transform_10(%arg0: i32, %arg1: memref<2xi32, #tpu.memory_space<smem>>) -> (i32, i32) {
    %c0_i32 = arith.constant 0 : i32
    %c0_i32_0 = arith.constant 0 : i32
    %c0_i32_1 = arith.constant 0 : i32
    return %c0_i32, %c0_i32_0 : i32, i32
  }
  func.func @transform_11(%arg0: i32, %arg1: memref<2xi32, #tpu.memory_space<smem>>) -> (i32, i32) {
    %c0_i32 = arith.constant 0 : i32
    %c0_i32_0 = arith.constant 0 : i32
    %c0_i32_1 = arith.constant 0 : i32
    return %c0_i32, %c0_i32_0 : i32, i32
  }
  func.func @transform_12(%arg0: i32, %arg1: memref<2xi32, #tpu.memory_space<smem>>) -> (i32, i32) {
    %c0_i32 = arith.constant 0 : i32
    %c0_i32_0 = arith.constant 0 : i32
    %c0_i32_1 = arith.constant 0 : i32
    return %c0_i32, %c0_i32_0 : i32, i32
  }
  func.func @transform_13(%arg0: i32, %arg1: memref<2xi32, #tpu.memory_space<smem>>) -> (i32, i32) {
    %c0_i32 = arith.constant 0 : i32
    %c0_i32_0 = arith.constant 0 : i32
    %c0_i32_1 = arith.constant 0 : i32
    return %c0_i32, %c0_i32_0 : i32, i32
  }
  func.func @transform_14(%arg0: i32, %arg1: memref<2xi32, #tpu.memory_space<smem>>) -> (i32, i32) {
    %c0_i32 = arith.constant 0 : i32
    %c0_i32_0 = arith.constant 0 : i32
    %c0_i32_1 = arith.constant 0 : i32
    return %c0_i32, %c0_i32_0 : i32, i32
  }
  func.func @transform_15(%arg0: i32, %arg1: memref<2xi32, #tpu.memory_space<smem>>) -> (i32, i32) {
    %c0_i32 = arith.constant 0 : i32
    %c0_i32_0 = arith.constant 0 : i32
    %c0_i32_1 = arith.constant 0 : i32
    return %c0_i32, %c0_i32_0 : i32, i32
  }
  func.func @transform_16(%arg0: i32, %arg1: memref<2xi32, #tpu.memory_space<smem>>) -> (i32, i32) {
    %c0_i32 = arith.constant 0 : i32
    %c0_i32_0 = arith.constant 0 : i32
    %c0_i32_1 = arith.constant 0 : i32
    return %c0_i32, %c0_i32_0 : i32, i32
  }
  func.func @transform_17(%arg0: i32, %arg1: memref<2xi32, #tpu.memory_space<smem>>) -> (i32, i32) {
    %c0_i32 = arith.constant 0 : i32
    %c0_i32_0 = arith.constant 0 : i32
    %c0_i32_1 = arith.constant 0 : i32
    return %c0_i32, %c0_i32_0 : i32, i32
  }
  func.func @transform_18(%arg0: i32, %arg1: memref<2xi32, #tpu.memory_space<smem>>) -> (i32, i32) {
    %c0_i32 = arith.constant 0 : i32
    %c0_i32_0 = arith.constant 0 : i32
    %c0_i32_1 = arith.constant 0 : i32
    return %c0_i32, %c0_i32_0 : i32, i32
  }
  func.func @transform_19(%arg0: i32, %arg1: memref<2xi32, #tpu.memory_space<smem>>) -> (i32, i32) {
    %c0_i32 = arith.constant 0 : i32
    %c0_i32_0 = arith.constant 0 : i32
    %c0_i32_1 = arith.constant 0 : i32
    return %c0_i32, %c0_i32_0 : i32, i32
  }
  func.func @transform_20(%arg0: i32, %arg1: memref<2xi32, #tpu.memory_space<smem>>) -> (i32, i32) {
    %c0_i32 = arith.constant 0 : i32
    %c0_i32_0 = arith.constant 0 : i32
    %c0_i32_1 = arith.constant 0 : i32
    return %c0_i32, %c0_i32_0 : i32, i32
  }
  func.func @transform_21(%arg0: i32, %arg1: memref<2xi32, #tpu.memory_space<smem>>) -> (i32, i32) {
    %c0_i32 = arith.constant 0 : i32
    %c0_i32_0 = arith.constant 0 : i32
    %c0_i32_1 = arith.constant 0 : i32
    return %c0_i32, %c0_i32_0 : i32, i32
  }
  func.func @transform_22(%arg0: i32, %arg1: memref<2xi32, #tpu.memory_space<smem>>) -> (i32, i32) {
    %c0_i32 = arith.constant 0 : i32
    %c0_i32_0 = arith.constant 0 : i32
    %c0_i32_1 = arith.constant 0 : i32
    return %c0_i32, %c0_i32_0 : i32, i32
  }
  func.func @transform_23(%arg0: i32, %arg1: memref<2xi32, #tpu.memory_space<smem>>) -> (i32, i32) {
    %c0_i32 = arith.constant 0 : i32
    %c0_i32_0 = arith.constant 0 : i32
    %c0_i32_1 = arith.constant 0 : i32
    return %c0_i32, %c0_i32_0 : i32, i32
  }
  func.func @transform_24(%arg0: i32, %arg1: memref<2xi32, #tpu.memory_space<smem>>) -> (i32, i32) {
    %c0_i32 = arith.constant 0 : i32
    %c0_i32_0 = arith.constant 0 : i32
    %c0_i32_1 = arith.constant 0 : i32
    return %c0_i32, %c0_i32_0 : i32, i32
  }
  func.func @transform_25(%arg0: i32, %arg1: memref<2xi32, #tpu.memory_space<smem>>) -> (i32, i32) {
    %c0_i32 = arith.constant 0 : i32
    %c0_i32_0 = arith.constant 0 : i32
    %c0_i32_1 = arith.constant 0 : i32
    return %c0_i32, %c0_i32_0 : i32, i32
  }
  func.func @transform_26(%arg0: i32, %arg1: memref<2xi32, #tpu.memory_space<smem>>) -> (i32, i32) {
    %c0_i32 = arith.constant 0 : i32
    %c0_i32_0 = arith.constant 0 : i32
    %c0_i32_1 = arith.constant 0 : i32
    return %c0_i32, %c0_i32_0 : i32, i32
  }
  func.func @transform_27(%arg0: i32, %arg1: memref<2xi32, #tpu.memory_space<smem>>) -> (i32, i32, i32) {
    %c0_i32 = arith.constant 0 : i32
    %c0_i32_0 = arith.constant 0 : i32
    %c0_i32_1 = arith.constant 0 : i32
    %c0_i32_2 = arith.constant 0 : i32
    return %c0_i32, %c0_i32_0, %c0_i32_1 : i32, i32, i32
  }
  func.func @transform_28(%arg0: i32, %arg1: memref<2xi32, #tpu.memory_space<smem>>) -> (i32, i32) {
    %c0_i32 = arith.constant 0 : i32
    %c0_i32_0 = arith.constant 0 : i32
    %c0_i32_1 = arith.constant 0 : i32
    return %c0_i32, %c0_i32_0 : i32, i32
  }
  func.func @transform_29(%arg0: i32, %arg1: memref<2xi32, #tpu.memory_space<smem>>) -> (i32, i32) {
    %c0_i32 = arith.constant 0 : i32
    %c0_i32_0 = arith.constant 0 : i32
    %c0_i32_1 = arith.constant 0 : i32
    return %c0_i32, %c0_i32_0 : i32, i32
  }
  func.func @transform_30(%arg0: i32, %arg1: memref<2xi32, #tpu.memory_space<smem>>) -> (i32, i32) {
    %c0_i32 = arith.constant 0 : i32
    %c0_i32_0 = arith.constant 0 : i32
    %c0_i32_1 = arith.constant 0 : i32
    return %c0_i32, %c0_i32_0 : i32, i32
  }
  func.func @transform_31(%arg0: i32, %arg1: memref<2xi32, #tpu.memory_space<smem>>) -> (i32, i32) {
    %c0_i32 = arith.constant 0 : i32
    %c0_i32_0 = arith.constant 0 : i32
    %c0_i32_1 = arith.constant 0 : i32
    return %c0_i32, %c0_i32_0 : i32, i32
  }
  func.func @transform_32(%arg0: i32, %arg1: memref<2xi32, #tpu.memory_space<smem>>) -> (i32, i32) {
    %c0_i32 = arith.constant 0 : i32
    %c0_i32_0 = arith.constant 0 : i32
    %c0_i32_1 = arith.constant 0 : i32
    return %c0_i32, %c0_i32_0 : i32, i32
  }
  func.func @transform_33(%arg0: i32, %arg1: memref<2xi32, #tpu.memory_space<smem>>) -> (i32, i32) {
    %c0_i32 = arith.constant 0 : i32
    %c0_i32_0 = arith.constant 0 : i32
    %c0_i32_1 = arith.constant 0 : i32
    return %c0_i32, %c0_i32_0 : i32, i32
  }
  func.func @transform_34(%arg0: i32, %arg1: memref<2xi32, #tpu.memory_space<smem>>) -> (i32, i32) {
    %c0_i32 = arith.constant 0 : i32
    %c0_i32_0 = arith.constant 0 : i32
    %c0_i32_1 = arith.constant 0 : i32
    return %c0_i32, %c0_i32_0 : i32, i32
  }
  func.func @transform_35(%arg0: i32, %arg1: memref<2xi32, #tpu.memory_space<smem>>) -> (i32, i32) {
    %c0_i32 = arith.constant 0 : i32
    %c0_i32_0 = arith.constant 0 : i32
    %c0_i32_1 = arith.constant 0 : i32
    return %c0_i32, %c0_i32_0 : i32, i32
  }
  func.func @transform_36(%arg0: i32, %arg1: memref<2xi32, #tpu.memory_space<smem>>) -> (i32, i32) {
    %c0_i32 = arith.constant 0 : i32
    %c0_i32_0 = arith.constant 0 : i32
    %c0_i32_1 = arith.constant 0 : i32
    return %c0_i32, %c0_i32_0 : i32, i32
  }
  func.func @transform_37(%arg0: i32, %arg1: memref<2xi32, #tpu.memory_space<smem>>) -> (i32, i32) {
    %c0_i32 = arith.constant 0 : i32
    %c0_i32_0 = arith.constant 0 : i32
    %c0_i32_1 = arith.constant 0 : i32
    return %c0_i32, %c0_i32_0 : i32, i32
  }
  func.func @transform_38(%arg0: i32, %arg1: memref<2xi32, #tpu.memory_space<smem>>) -> (i32, i32) {
    %c0_i32 = arith.constant 0 : i32
    %c0_i32_0 = arith.constant 0 : i32
    %c0_i32_1 = arith.constant 0 : i32
    return %c0_i32, %c0_i32_0 : i32, i32
  }
  func.func @transform_39(%arg0: i32, %arg1: memref<2xi32, #tpu.memory_space<smem>>) -> (i32, i32) {
    %c0_i32 = arith.constant 0 : i32
    %c0_i32_0 = arith.constant 0 : i32
    %c0_i32_1 = arith.constant 0 : i32
    return %c0_i32, %c0_i32_0 : i32, i32
  }
  func.func @transform_40(%arg0: i32, %arg1: memref<2xi32, #tpu.memory_space<smem>>) -> (i32, i32) {
    %c0_i32 = arith.constant 0 : i32
    %c0_i32_0 = arith.constant 0 : i32
    %c0_i32_1 = arith.constant 0 : i32
    return %c0_i32, %c0_i32_0 : i32, i32
  }
  func.func @transform_41(%arg0: i32, %arg1: memref<2xi32, #tpu.memory_space<smem>>) -> (i32, i32, i32) {
    %c0_i32 = arith.constant 0 : i32
    %c0_i32_0 = arith.constant 0 : i32
    %c0_i32_1 = arith.constant 0 : i32
    return %arg0, %c0_i32, %c0_i32_0 : i32, i32, i32
  }
}

</mosaic_0001>

<bundles_post_ra>
// kernel: tpu_custom_call.1
= control target key start
LH: loop header
LB: loop body
LE: loop exit
PB: predicated region body
PF: predicated region fallthrough
CT: control target
= control target key end

     0   :  { %s4584_s6 = smov 1   ;;  %s4585_s10 = smov 2   ;;  %s5532_s0 = inlined_call_operand.smem [shape: u32[43], index: -1, kind: input, shape index: {}] }
   0x1   :  { %s4675_s5 = sld [smem:[%s5532_s0]]   ;;  %s4586_s14 = smov 3  }
   0x2   :  { %s4680_s9 = sld [smem:[%s5532_s0 + %s4584_s6]]   ;;  %s4587_s18 = smov 4  }
   0x3   :  { %s4685_s13 = sld [smem:[%s5532_s0 + %s4585_s10]]   ;;  %s4588_s22 = smov 5  }
   0x4   :  { %s4690_s17 = sld [smem:[%s5532_s0 + %s4586_s14]]   ;;  %s4589_s26 = smov 6  }
   0x5   :  { %s4695_s21 = sld [smem:[%s5532_s0 + %s4587_s18]]   ;;  %s4590_s30 = smov 7  }
   0x6   :  { %s4700_s25 = sld [smem:[%s5532_s0 + %s4588_s22]]   ;;  %s4591_s4 = smov 8  }
   0x7   :  { %s4705_s29 = sld [smem:[%s5532_s0 + %s4589_s26]]   ;;  %s4592_s10 = smov 9  }
   0x8   :  { %5589 = sst [smem:[#allocation66_spill]] %s4680_s9  ;;  %s4593_s15 = smov 10  }
   0x9   :  { %s4710_s3 = sld [smem:[%s5532_s0 + %s4590_s30]]   ;;  %s4594_s20 = smov 11  }
   0xa   :  { %5590 = sst [smem:[#allocation67_spill]] %s4690_s17  ;;  %s4595_s26 = smov 12  }
   0xb   :  { %5591 = sst [smem:[#allocation68_spill]] %s4695_s21  ;;  %s4596_s1 = smov 13  }
   0xc   :  { %5592 = sst [smem:[#allocation69_spill]] %s4700_s25  ;;  %s4597_s7 = smov 14  }
   0xd   :  { %5593 = sst [smem:[#allocation70_spill]] %s4705_s29  ;;  %s4599_s22 = smov 16  }
   0xe   :  { %s4715_s8 = sld [smem:[%s5532_s0 + %s4591_s4]]   ;;  %s4600_s28 = smov 17  }
   0xf   :  { %5594 = sst [smem:[#allocation71_spill]] %s4710_s3  ;;  %s4624_s2 = smov 41  }
  0x10   :  { %s4720_s14 = sld [smem:[%s5532_s0 + %s4592_s10]]   ;;  %s4625_s11 = smov 42  }
  0x11   :  { %s4725_s19 = sld [smem:[%s5532_s0 + %s4593_s15]]   ;;  %s4598_s15 = smov 15  }
  0x12   :  { %s4730_s24 = sld [smem:[%s5532_s0 + %s4594_s20]]  }
  0x13   :  { %s4735_s30 = sld [smem:[%s5532_s0 + %s4595_s26]]  }
  0x14   :  { %5595 = sst [smem:[#allocation72_spill]] %s4715_s8 }
  0x15   :  { %s4740_s6 = sld [smem:[%s5532_s0 + %s4596_s1]]  }
  0x16   :  { %5596 = sst [smem:[#allocation73_spill]] %s4720_s14 }
  0x17   :  { %s4745_s12 = sld [smem:[%s5532_s0 + %s4597_s7]]   ;;  %s4601_s7 = smov 18  }
  0x18   :  { %5597 = sst [smem:[#allocation74_spill]] %s4730_s24 }
  0x19   :  { %5598 = sst [smem:[#allocation75_spill]] %s4735_s30 }
  0x1a   :  { %s4750_s20 = sld [smem:[%s5532_s0 + %s4598_s15]]   ;;  %s4602_s15 = smov 19  }
  0x1b   :  { %5599 = sst [smem:[#allocation76_spill]] %s4740_s6 }
  0x1c   :  { %s4755_s27 = sld [smem:[%s5532_s0 + %s4599_s22]]   ;;  %s4603_s22 = smov 20  }
  0x1d   :  { %s4760_s4 = sld [smem:[%s5532_s0 + %s4600_s28]]   ;;  %s4604_s28 = smov 21  }
  0x1e   :  { %s4765_s6 = sld [smem:[%s5532_s0 + %s4601_s7]]   ;;  %s4605_s7 = smov 22  }
  0x1f   :  { %s4775_s24 = sld [smem:[%s5532_s0 + %s4603_s22]]   ;;  %s4607_s22 = smov 24  }
  0x20   :  { %5600 = sst [smem:[#allocation77_spill]] %s4750_s20 }
  0x21   :  { %s4770_s20 = sld [smem:[%s5532_s0 + %s4602_s15]]   ;;  %s4606_s15 = smov 23  }
  0x22   :  { %5601 = sst [smem:[#allocation78_spill]] %s4755_s27 }
  0x23   :  { %5602 = sst [smem:[#allocation79_spill]] %s4760_s4 }
  0x24   :  { %5603 = sst [smem:[#allocation80_spill]] %s4765_s6 }
  0x25   :  { %s4780_s4 = sld [smem:[%s5532_s0 + %s4604_s28]]   ;;  %s4608_s28 = smov 25  }
  0x26   :  { %s4785_s3 = sld [smem:[%s5532_s0 + %s4605_s7]]   ;;  %s4609_s7 = smov 26  }
  0x27   :  { %5604 = sst [smem:[#allocation81_spill]] %s4770_s20 }
  0x28   :  { %s4790_s21 = sld [smem:[%s5532_s0 + %s4606_s15]]   ;;  %s4610_s15 = smov 27  }
  0x29   :  { %s4795_s17 = sld [smem:[%s5532_s0 + %s4607_s22]]   ;;  %s4611_s22 = smov 28  }
  0x2a   :  { %s4800_s25 = sld [smem:[%s5532_s0 + %s4608_s28]]   ;;  %s4612_s28 = smov 29  }
  0x2b   :  { %5605 = sst [smem:[#allocation82_spill]] %s4780_s4 }
  0x2c   :  { %5606 = sst [smem:[#allocation83_spill]] %s4785_s3 }
  0x2d   :  { %s4805_s9 = sld [smem:[%s5532_s0 + %s4609_s7]]   ;;  %s4613_s7 = smov 30  }
  0x2e   :  { %5607 = sst [smem:[#allocation84_spill]] %s4790_s21 }
  0x2f   :  { %s4810_s21 = sld [smem:[%s5532_s0 + %s4610_s15]]   ;;  %s4614_s15 = smov 31  }
  0x30   :  { %5608 = sst [smem:[#allocation85_spill]] %s4800_s25 }
  0x31   :  { %s4815_s4 = sld [smem:[%s5532_s0 + %s4611_s22]]   ;;  %s4615_s22 = smov 32  }
  0x32   :  { %s4820_s25 = sld [smem:[%s5532_s0 + %s4612_s28]]   ;;  %s4616_s28 = smov 33  }
  0x33   :  { %5609 = sst [smem:[#allocation86_spill]] %s4805_s9 }
  0x34   :  { %s4825_s20 = sld [smem:[%s5532_s0 + %s4613_s7]]   ;;  %s4617_s7 = smov 34  }
  0x35   :  { %5610 = sst [smem:[#allocation87_spill]] %s4810_s21 }
  0x36   :  { %s4830_s21 = sld [smem:[%s5532_s0 + %s4614_s15]]   ;;  %s4618_s15 = smov 35  }
  0x37   :  { %5611 = sst [smem:[#allocation88_spill]] %s4815_s4 }
  0x38   :  { %5612 = sst [smem:[#allocation89_spill]] %s4820_s25  ;;  %s4621_s25 = smov 38  }
  0x39   :  { %s4835_s27 = sld [smem:[%s5532_s0 + %s4615_s22]]   ;;  %s4619_s22 = smov 36  }
  0x3a   :  { %s4840_s10 = sld [smem:[%s5532_s0 + %s4616_s28]]   ;;  %s4620_s28 = smov 37  }
  0x3b   :  { %s4845_s16 = sld [smem:[%s5532_s0 + %s4617_s7]]  }
  0x3c   :  { %5613 = sst [smem:[#allocation90_spill]] %s4830_s21 }
  0x3d   :  { %s4850_s23 = sld [smem:[%s5532_s0 + %s4618_s15]]   ;;  %s4622_s15 = smov 39  }
  0x3e   :  { %s4855_s1 = sld [smem:[%s5532_s0 + %s4619_s22]]   ;;  %s4623_s22 = smov 40  }
  0x3f   :  { %s4860_s14 = sld [smem:[%s5532_s0 + %s4620_s28]]   ;;  %s91_s28 = sshll.u32 %s4675_s5, 4  ;;  %s92_s28 = int_to_ptr.hbm [resolvable:$true] %s91_s28 }
  0x40   :  { %5614 = sst [smem:[#allocation91_spill]] %s4840_s10 }
  0x41   :  { %s4865_s21 = sld [smem:[%s5532_s0 + %s4621_s25]]  }
  0x42   :  { %s4870_s30 = sld [smem:[%s5532_s0 + %s4622_s15]]   ;;  %s3660_s15 = sshra.s32 %s92_s28, 4  ;;  %s3661_s15 = int_to_ptr.hbm [resolvable:$true] %s3660_s15 }
  0x43   :  { %5615 = sst [smem:[#allocation92_spill]] %s4850_s23  ;;  %s3662_s18 = scalar_lea.hbm %s3661_s15, 1 }
  0x44   :  { %5616 = sst [smem:[#allocation93_spill]] %s4855_s1  ;;  %p3663_p0 = scmp.ne.s32.totalorder %s3661_s15, %s3662_s18 }
  0x45   :  { %5617 = sst [smem:[#allocation94_spill]] %s4860_s14  ;;  %s3664_s1 = scalar_lea.hbm %s4675_s5, 1 }
  0x46   :  { %s4875_s10 = sld [smem:[%s5532_s0 + %s4623_s22]]   ;;  %p3665_p1 = scmp.lt.s32.totalorder %s3661_s15, %s4675_s5 }
  0x47   :  { %5618 = sst [smem:[#allocation95_spill]] %s4865_s21  ;;  %p3666_p2 = scmp.lt.s32.totalorder %s3664_s1, %s3662_s18 }
  0x48   :  { %s4881_s25 = sld [smem:[%s5532_s0 + %s4624_s2]]  }
  0x49   :  { %s4886_s23 = sld [smem:[%s5532_s0 + %s4625_s11]]   ;;  %p3667_p3 = por %p3666_p2, %p3665_p1 }
  0x4b   :  { %p3668_p4 = pnand %p3667_p3, %p3663_p0 }
  0x4c   :  { %5619 = sst [smem:[#allocation96_spill]] %s4875_s10 }
  0x4e   :  { %5620 = sst [smem:[#allocation97_spill]] %s4881_s25 }
  0x4f   :  { %5621 = sst [smem:[#allocation98_spill]] %s4886_s23 }
  0x50   :  { %3671 = shalt.err (!%p3668_p4)  }
  0x51   :  { %s4626_s14 = smov [#allocation3]  }
  0x52   :  { %94 = dma.hbm_to_smem %s92_s28, 16, %s4626_s14, [#allocation2] }
  0x53   :  { %4502 = dma.done.wait [#allocation2], 16 }
  0x54   :  { %4503 = vsyncadd [#allocation2], 4294967280 }
  0x55   :  { %97 = sfence }
  0x56   :  { %98 = vsyncpa [#allocation5], 0 }
  0x57   :  { %100 = vsyncpa [#allocation5 + $0x1], 0 }
  0x58   :  { %101 = vsyncpa [#allocation8], 0 }
  0x59   :  { %102 = vsyncpa [#allocation11], 0 }
  0x5a   :  { %103 = vsyncpa [#allocation14], 0 }
  0x5b   :  { %104 = vsyncpa [#allocation17], 0 }
  0x5c   :  { %105 = vsyncpa [#allocation20], 0 }
  0x5d   :  { %106 = vsyncpa [#allocation23], 0 }
  0x5e   :  { %107 = vsyncpa [#allocation26], 0 }
  0x5f   :  { %108 = vsyncpa [#allocation29], 0 }
  0x60   :  { %109 = vsyncpa [#allocation32], 0 }
  0x61   :  { %110 = vsyncpa [#allocation35], 0 }
  0x62   :  { %111 = vsyncpa [#allocation38], 0 }
  0x63   :  { %112 = vsyncpa [#allocation41], 0 }
  0x64   :  { %113 = vsyncpa [#allocation44], 0 }
  0x65   :  { %114 = vsyncpa [#allocation47], 0 }
  0x66   :  { %115 = vsyncpa [#allocation6], 0 }
  0x67   :  { %117 = vsyncpa [#allocation6 + $0x1], 0  ;;  %s4890_s0 = smov 0   ;;  %s4892_s5 = smov 0  }
  0x68   :  { %s4894_s29 = smov 0   ;;  %s4896_s21 = smov 0  }
  0x69 LB: > { %s5622_s9 = sld [smem:[#allocation86_spill]]  ;;  %s4911_s22 = sadd.s32 4294967295, %s4582_s21   ;;  %s4570_s0 = sphi %s4890_s0, %s5706_s0   ;;  %s4582_s21 = sphi %s4896_s21, %s5704_s21   ;;  %s4578_s29 = sphi %s4894_s29, %s5708_s29   ;;  %s4574_s5 = sphi %s4892_s5, %s5707_s5  }
  0x6a   : > { %s5623_s8 = sld [smem:[#allocation72_spill]]  ;;  %s3189_s26 = sadd.s32 4294967294, %s4582_s21  }
  0x6b   : > { %s5624_s4 = sld [smem:[#allocation88_spill]]  ;;  %s4915_s28 = sadd.s32 1, %s4582_s21  }
  0x6c   : > { %s5625_s3 = sld [smem:[#allocation83_spill]]  ;;  %s130_s2 = sadd.s32 1, %s4578_s29 }
  0x6d   : > { %s5626_s6 = sld [smem:[#allocation80_spill]]  ;;  %s127_s7 = ssub.s32 %s4582_s21, %s4915_s28 }
  0x6e   : > { %5627 = sst [smem:[#allocation99_spill]] %s4570_s0  ;;  %p137_p5 = scmp.ne.s32.totalorder %s4578_s29, %s4574_s5 }
  0x6f   : > { %5628 = sst [smem:[#allocation100_spill]] %s4915_s28  ;;  %p128_p6 = scmp.eq.s32.totalorder %s127_s7, 0 }
  0x70   : > { %p138_p7 = scmp.eq.s32.totalorder %s4582_s21, 0  ;;  %p143_p8 = scmp.ne.s32.totalorder %s4574_s5, %s4570_s0 }
  0x71   : > { %p5582_p9 = scmp.eq.s32.totalorder %s4911_s22, 0  ;;  %p1007_p12 = scmp.eq.s32.totalorder %s4911_s22, 1 }
  0x72   : > { %s4927_s11 = scalar_select %p128_p6, %s4578_s29, %s130_s2  }
  0x73   : > { %p4929_p10 = por %p138_p7, %p137_p5  ;;  %p4935_p11 = por %p5582_p9, %p143_p8 }
  0x74   : > { %5629 = sst [smem:[#allocation101_spill]] %s4927_s11  ;;  %p1013_p13 = scmp.eq.s32.totalorder %s3189_s26, 1 }
  0x75   : > { %p3190_p0 = scmp.ge.s32.totalorder %s4582_s21, 1  ;;  %p1020_p1 = scmp.lt.s32.totalorder %s4582_s21, 3 }
  0x76   : > { %p4942_p2 = por %p1007_p12, %p137_p5  ;;  %p4946_p3 = por %p1013_p13, %p143_p8 }
  0x77   : > { %p4950_p4 = pnand %p3190_p0, %p1020_p1 }
  0x78   : > { %s5632_s1 = scalar_select %p4942_p2, 1, 0 }
  0x79   : > { %s5634_s14 = scalar_select %p4946_p3, 1, 0 }
  0x7a   : > { %5633 = sst [smem:[#allocation102_spill]] %s5632_s1  ;;  %1024 = sbr.rel (%p4950_p4) target bundleno = 477 (0x1dd), region = 12 }
  0x7b   : > { %5635 = sst [smem:[#allocation103_spill]] %s5634_s14  ;;  %s1032_s26 = sshll.u32 (!%p4950_p4), %s4685_s13, 4  ;;  %s1033_s26 = int_to_ptr.hbm [resolvable:$true] %s1032_s26 }
  0x7c   : > { %s4627_s7 = smov (!%p4950_p4), [#allocation7]   ;;  %s1068_s28 = sshll.u32 (!%p4950_p4), %s5623_s8, 4  ;;  %s4958_s28 = int_to_ptr.hbm [resolvable:$true] %s1068_s28 }
  0x7d   : > { %s1034_s11 = sshll.u32 (!%p4950_p4), %s4627_s7, 4  ;;  %s3672_s14 = sshra.s32 (!%p4950_p4), %s1033_s26, 4  ;;  %s1035_s11 = int_to_ptr.vmem [resolvable:$true] %s1034_s11  ;;  %s3673_s14 = int_to_ptr.hbm [resolvable:$true] %s3672_s14 }
  0x7e   : > { %s3674_s0 = scalar_lea.hbm (!%p4950_p4), %s3673_s14, 8  ;;  %s3678_s1 = scalar_lea.hbm (!%p4950_p4), %s4685_s13, 8 }
  0x7f   : > { %p3675_p5 = scmp.ne.s32.totalorder %s3673_s14, %s3674_s0  ;;  %p3679_p8 = scmp.lt.s32.totalorder %s3673_s14, %s4685_s13 }
  0x80   : > { %p3680_p12 = scmp.lt.s32.totalorder %s3678_s1, %s3674_s0 }
  0x81   : > { %p3676_p6 = pnand %p3675_p5, %p5582_p9 }
  0x82   : > { %p3681_p13 = por %p3680_p12, %p3679_p8 }
  0x83   : > { %p3677_p7 = pneg %p3676_p6 }
  0x85   : > { %p3682_p0 = pnand %p3681_p13, %p3677_p7 }
  0x87   : > { %3685 = shalt.err (!%p3682_p0)
}
  0x88   : > { %3293 = dma.hbm_to_vmem [thread:$0]  (%p5582_p9), %s1033_s26, 128, %s1035_s11, [#allocation8]  }
  0x89   : > { %s1092_s7 = sshll.u32 %s4725_s19, 4  ;;  %s4628_s25 = smov [#allocation10]   ;;  %s4967_s7 = int_to_ptr.hbm [resolvable:$true] %s1092_s7 }
  0x8a   : > { %s1070_s23 = sshll.u32 %s4628_s25, 4  ;;  %s3700_s10 = sshra.s32 %s4958_s28, 4  ;;  %s1071_s23 = int_to_ptr.vmem [resolvable:$true] %s1070_s23  ;;  %s3701_s10 = int_to_ptr.hbm [resolvable:$true] %s3700_s10 }
  0x8b   : > { %s3702_s0 = scalar_lea.hbm %s3701_s10, 1  ;;  %s3706_s1 = scalar_lea.hbm %s5623_s8, 1 }
  0x8c   : > { %p3703_p1 = scmp.ne.s32.totalorder %s3701_s10, %s3702_s0  ;;  %p3707_p7 = scmp.lt.s32.totalorder %s3701_s10, %s5623_s8 }
  0x8d   : > { %p3708_p8 = scmp.lt.s32.totalorder %s3706_s1, %s3702_s0 }
  0x8e   : > { %p3704_p5 = pnand %p3703_p1, %p5582_p9 }
  0x8f   : > { %p3709_p12 = por %p3708_p8, %p3707_p7 }
  0x90   : > { %p3705_p6 = pneg %p3704_p5 }
  0x92   : > { %p3710_p13 = pnand %p3709_p12, %p3705_p6 }
  0x94   : > { %3713 = shalt.err (!%p3710_p13)
}
  0x95   : > { %3297 = dma.hbm_to_vmem [thread:$0]  (%p5582_p9), %s4958_s28, 16, %s1071_s23, [#allocation11]  }
  0x96   : > { %s4629_s25 = smov [#allocation13]   ;;  %s1122_s14 = sshll.u32 %s4745_s12, 4  ;;  %s4978_s14 = int_to_ptr.hbm [resolvable:$true] %s1122_s14 }
  0x97   : > { %s1094_s11 = sshll.u32 %s4629_s25, 4  ;;  %s3728_s10 = sshra.s32 %s4967_s7, 4  ;;  %s1095_s11 = int_to_ptr.vmem [resolvable:$true] %s1094_s11  ;;  %s3729_s10 = int_to_ptr.hbm [resolvable:$true] %s3728_s10 }
  0x98   : > { %s3730_s26 = scalar_lea.hbm %s3729_s10, 1  ;;  %s3734_s0 = scalar_lea.hbm %s4725_s19, 1 }
  0x99   : > { %p3731_p0 = scmp.ne.s32.totalorder %s3729_s10, %s3730_s26  ;;  %p3735_p6 = scmp.lt.s32.totalorder %s3729_s10, %s4725_s19 }
  0x9a   : > { %p3736_p7 = scmp.lt.s32.totalorder %s3734_s0, %s3730_s26 }
  0x9b   : > { %p3732_p1 = pnand %p3731_p0, %p5582_p9 }
  0x9c   : > { %p3737_p8 = por %p3736_p7, %p3735_p6 }
  0x9d   : > { %p3733_p5 = pneg %p3732_p1 }
  0x9f   : > { %p3738_p12 = pnand %p3737_p8, %p3733_p5 }
  0xa1   : > { %3741 = shalt.err (!%p3738_p12)
}
  0xa2   : > { %3301 = dma.hbm_to_vmem [thread:$0]  (%p5582_p9), %s4967_s7, 16, %s1095_s11, [#allocation14]  }
  0xa3   : > { %s1152_s23 = sshll.u32 %s5626_s6, 4  ;;  %s4630_s28 = smov [#allocation16]   ;;  %s4989_s23 = int_to_ptr.hbm [resolvable:$true] %s1152_s23 }
  0xa4   : > { %s1124_s1 = sshll.u32 %s4630_s28, 4  ;;  %s3756_s25 = sshra.s32 %s4978_s14, 4  ;;  %s1125_s1 = int_to_ptr.vmem [resolvable:$true] %s1124_s1  ;;  %s3757_s25 = int_to_ptr.hbm [resolvable:$true] %s3756_s25 }
  0xa5   : > { %s3758_s10 = scalar_lea.hbm %s3757_s25, 1  ;;  %s3762_s26 = scalar_lea.hbm %s4745_s12, 1 }
  0xa6   : > { %p3759_p13 = scmp.ne.s32.totalorder %s3757_s25, %s3758_s10  ;;  %p3763_p5 = scmp.lt.s32.totalorder %s3757_s25, %s4745_s12 }
  0xa7   : > { %p3764_p6 = scmp.lt.s32.totalorder %s3762_s26, %s3758_s10 }
  0xa8   : > { %p3760_p0 = pnand %p3759_p13, %p5582_p9 }
  0xa9   : > { %p3765_p7 = por %p3764_p6, %p3763_p5 }
  0xaa   : > { %p3761_p1 = pneg %p3760_p0 }
  0xac   : > { %p3766_p8 = pnand %p3765_p7, %p3761_p1 }
  0xae   : > { %3769 = shalt.err (!%p3766_p8)
}
  0xaf   : > { %3305 = dma.hbm_to_vmem [thread:$0]  (%p5582_p9), %s4978_s14, 16, %s1125_s1, [#allocation17]  }
  0xb0   : > { %s4631_s7 = smov [#allocation19]   ;;  %s1175_s0 = sshll.u32 %s4775_s24, 4  ;;  %s5000_s0 = int_to_ptr.hbm [resolvable:$true] %s1175_s0 }
  0xb1   : > { %s1154_s11 = sshll.u32 %s4631_s7, 4  ;;  %s3784_s28 = sshra.s32 %s4989_s23, 4  ;;  %s1155_s11 = int_to_ptr.vmem [resolvable:$true] %s1154_s11  ;;  %s3785_s28 = int_to_ptr.hbm [resolvable:$true] %s3784_s28 }
  0xb2   : > { %s3786_s25 = scalar_lea.hbm %s3785_s28, 1  ;;  %s3790_s10 = scalar_lea.hbm %s5626_s6, 1 }
  0xb3   : > { %p3787_p12 = scmp.ne.s32.totalorder %s3785_s28, %s3786_s25  ;;  %p3791_p1 = scmp.lt.s32.totalorder %s3785_s28, %s5626_s6 }
  0xb4   : > { %p3792_p5 = scmp.lt.s32.totalorder %s3790_s10, %s3786_s25 }
  0xb5   : > { %p3788_p13 = pnand %p3787_p12, %p5582_p9 }
  0xb6   : > { %p3793_p6 = por %p3792_p5, %p3791_p1 }
  0xb7   : > { %p3789_p0 = pneg %p3788_p13 }
  0xb9   : > { %p3794_p7 = pnand %p3793_p6, %p3789_p0 }
  0xbb   : > { %3797 = shalt.err (!%p3794_p7)
}
  0xbc   : > { %3309 = dma.hbm_to_vmem [thread:$0]  (%p5582_p9), %s4989_s23, 16, %s1155_s11, [#allocation20]  }
  0xbd   : > { %s4632_s14 = smov [#allocation22]   ;;  %s1202_s26 = sshll.u32 %s5625_s3, 4  ;;  %s1203_s26 = int_to_ptr.hbm [resolvable:$true] %s1202_s26 }
  0xbe   : > { %s1177_s1 = sshll.u32 %s4632_s14, 4  ;;  %s3812_s7 = sshra.s32 %s5000_s0, 4  ;;  %s1178_s1 = int_to_ptr.vmem [resolvable:$true] %s1177_s1  ;;  %s3813_s7 = int_to_ptr.hbm [resolvable:$true] %s3812_s7 }
  0xbf   : > { %s3814_s28 = scalar_lea.hbm %s3813_s7, 32  ;;  %s3818_s25 = scalar_lea.hbm %s4775_s24, 32 }
  0xc0   : > { %p3815_p8 = scmp.ne.s32.totalorder %s3813_s7, %s3814_s28  ;;  %p3819_p0 = scmp.lt.s32.totalorder %s3813_s7, %s4775_s24 }
  0xc1   : > { %p3820_p1 = scmp.lt.s32.totalorder %s3818_s25, %s3814_s28 }
  0xc2   : > { %p3816_p12 = pnand %p3815_p8, %p5582_p9 }
  0xc3   : > { %p3821_p5 = por %p3820_p1, %p3819_p0 }
  0xc4   : > { %p3817_p13 = pneg %p3816_p12 }
  0xc6   : > { %p3822_p6 = pnand %p3821_p5, %p3817_p13 }
  0xc8   : > { %3825 = shalt.err (!%p3822_p6)
}
  0xc9   : > { %s5564_s10 = smov 128   ;;  %s5567_s23 = smov 8  }
  0xca   : > { %3313 = dma.hbm_to_vmem [thread:$0]  (%p5582_p9), %s5000_s0, 512, %s1178_s1, [#allocation23], %s5564_s10, %s5564_s10, %s5567_s23  }
  0xcb   : > { %s4635_s11 = smov [#allocation25]   ;;  %s1225_s7 = sshll.u32 %s4795_s17, 4  ;;  %s5023_s7 = int_to_ptr.hbm [resolvable:$true] %s1225_s7 }
  0xcc   : > { %s1204_s14 = sshll.u32 %s4635_s11, 4  ;;  %s3840_s28 = sshra.s32 %s1203_s26, 4  ;;  %s1205_s14 = int_to_ptr.vmem [resolvable:$true] %s1204_s14  ;;  %s3841_s28 = int_to_ptr.hbm [resolvable:$true] %s3840_s28 }
  0xcd   : > { %s3842_s25 = scalar_lea.hbm %s3841_s28, 1  ;;  %s3846_s6 = scalar_lea.hbm %s5625_s3, 1 }
  0xce   : > { %p3843_p7 = scmp.ne.s32.totalorder %s3841_s28, %s3842_s25  ;;  %p3847_p13 = scmp.lt.s32.totalorder %s3841_s28, %s5625_s3 }
  0xcf   : > { %p3848_p0 = scmp.lt.s32.totalorder %s3846_s6, %s3842_s25 }
  0xd0   : > { %p3844_p8 = pnand %p3843_p7, %p5582_p9 }
  0xd1   : > { %p3849_p1 = por %p3848_p0, %p3847_p13 }
  0xd2   : > { %p3845_p12 = pneg %p3844_p8 }
  0xd4   : > { %p3850_p5 = pnand %p3849_p1, %p3845_p12 }
  0xd6   : > { %3853 = shalt.err (!%p3850_p5)
}
  0xd7   : > { %3317 = dma.hbm_to_vmem [thread:$0]  (%p5582_p9), %s1203_s26, 16, %s1205_s14, [#allocation26]  }
  0xd8   : > { %s1251_s0 = sshll.u32 %s5622_s9, 4  ;;  %s4636_s1 = smov [#allocation28]   ;;  %s5032_s0 = int_to_ptr.hbm [resolvable:$true] %s1251_s0 }
  0xd9   : > { %s1227_s11 = sshll.u32 %s4636_s1, 4  ;;  %s3868_s10 = sshra.s32 %s5023_s7, 4  ;;  %s1228_s11 = int_to_ptr.vmem [resolvable:$true] %s1227_s11  ;;  %s3869_s10 = int_to_ptr.hbm [resolvable:$true] %s3868_s10 }
  0xda   : > { %s3870_s6 = scalar_lea.hbm %s3869_s10, 32  ;;  %s3874_s28 = scalar_lea.hbm %s4795_s17, 32 }
  0xdb   : > { %p3871_p6 = scmp.ne.s32.totalorder %s3869_s10, %s3870_s6  ;;  %p3875_p12 = scmp.lt.s32.totalorder %s3869_s10, %s4795_s17 }
  0xdc   : > { %p3876_p13 = scmp.lt.s32.totalorder %s3874_s28, %s3870_s6 }
  0xdd   : > { %p3872_p7 = pnand %p3871_p6, %p5582_p9 }
  0xde   : > { %p3877_p0 = por %p3876_p13, %p3875_p12 }
  0xdf   : > { %p3873_p8 = pneg %p3872_p7 }
  0xe1   : > { %p3878_p1 = pnand %p3877_p0, %p3873_p8 }
  0xe3   : > { %3881 = shalt.err (!%p3878_p1)
}
  0xe4   : > { %s5637_s26 = smov 128   ;;  %s4637_s14 = smov [#allocation31]  }
  0xe5   : > { %3321 = dma.hbm_to_vmem [thread:$0]  (%p5582_p9), %s5023_s7, 512, %s1228_s11, [#allocation29], %s5637_s26, %s5637_s26, %s5567_s23  }
  0xe6   : > { %s1253_s25 = sshll.u32 %s4637_s14, 4  ;;  %s1277_s1 = sshll.u32 %s5624_s4, 4  ;;  %s1254_s25 = int_to_ptr.vmem [resolvable:$true] %s1253_s25  ;;  %s5046_s1 = int_to_ptr.hbm [resolvable:$true] %s1277_s1 }
  0xe7   : > { %s3896_s10 = sshra.s32 %s5032_s0, 4  ;;  %s3902_s28 = scalar_lea.hbm %s5622_s9, 32  ;;  %s3897_s10 = int_to_ptr.hbm [resolvable:$true] %s3896_s10 }
  0xe8   : > { %s3898_s6 = scalar_lea.hbm %s3897_s10, 32  ;;  %p3903_p8 = scmp.lt.s32.totalorder %s3897_s10, %s5622_s9 }
  0xe9   : > { %p3899_p5 = scmp.ne.s32.totalorder %s3897_s10, %s3898_s6  ;;  %p3904_p12 = scmp.lt.s32.totalorder %s3902_s28, %s3898_s6 }
  0xeb   : > { %p3900_p6 = pnand %p3899_p5, %p5582_p9  ;;  %p3905_p13 = por %p3904_p12, %p3903_p8 }
  0xed   : > { %p3901_p7 = pneg %p3900_p6 }
  0xef   : > { %p3906_p0 = pnand %p3905_p13, %p3901_p7 }
  0xf1   : > { %3909 = shalt.err (!%p3906_p0)
}
  0xf2   : > { %3325 = dma.hbm_to_vmem [thread:$0]  (%p5582_p9), %s5032_s0, 512, %s1254_s25, [#allocation32], %s5637_s26, %s5637_s26, %s5567_s23  }
  0xf3   : > { %s4638_s7 = smov [#allocation34]   ;;  %s1304_s14 = sshll.u32 %s4825_s20, 4  ;;  %s1305_s14 = int_to_ptr.hbm [resolvable:$true] %s1304_s14 }
  0xf4   : > { %s1279_s11 = sshll.u32 %s4638_s7, 4  ;;  %s3924_s10 = sshra.s32 %s5046_s1, 4  ;;  %s1280_s11 = int_to_ptr.vmem [resolvable:$true] %s1279_s11  ;;  %s3925_s10 = int_to_ptr.hbm [resolvable:$true] %s3924_s10 }
  0xf5   : > { %s3926_s6 = scalar_lea.hbm %s3925_s10, 7  ;;  %s3930_s28 = scalar_lea.hbm %s5624_s4, 7 }
  0xf6   : > { %p3927_p1 = scmp.ne.s32.totalorder %s3925_s10, %s3926_s6  ;;  %p3931_p7 = scmp.lt.s32.totalorder %s3925_s10, %s5624_s4 }
  0xf7   : > { %p3932_p8 = scmp.lt.s32.totalorder %s3930_s28, %s3926_s6 }
  0xf8   : > { %p3928_p5 = pnand %p3927_p1, %p5582_p9 }
  0xf9   : > { %p3933_p12 = por %p3932_p8, %p3931_p7 }
  0xfa   : > { %p3929_p6 = pneg %p3928_p5 }
  0xfc   : > { %p3934_p13 = pnand %p3933_p12, %p3929_p6 }
  0xfe   : > { %3937 = shalt.err (!%p3934_p13)
}
  0xff   : > { %s4639_s3 = smov 16   ;;  %s4640_s0 = smov 1  }
 0x100   : > { %3329 = dma.hbm_to_vmem [thread:$0]  (%p5582_p9), %s5046_s1, 112, %s1280_s11, [#allocation35], %s4639_s3, %s4639_s3, %s4640_s0  }
 0x101   : > { %s4641_s25 = smov [#allocation37]   ;;  %s1327_s23 = sshll.u32 %s4835_s27, 4  ;;  %s5069_s23 = int_to_ptr.hbm [resolvable:$true] %s1327_s23 }
 0x102   : > { %s1306_s7 = sshll.u32 %s4641_s25, 4  ;;  %s3952_s10 = sshra.s32 %s1305_s14, 4  ;;  %s1307_s7 = int_to_ptr.vmem [resolvable:$true] %s1306_s7  ;;  %s3953_s10 = int_to_ptr.hbm [resolvable:$true] %s3952_s10 }
 0x103   : > { %s3954_s6 = scalar_lea.hbm %s3953_s10, 1  ;;  %s3958_s28 = scalar_lea.hbm %s4825_s20, 1 }
 0x104   : > { %p3955_p0 = scmp.ne.s32.totalorder %s3953_s10, %s3954_s6  ;;  %p3959_p6 = scmp.lt.s32.totalorder %s3953_s10, %s4825_s20 }
 0x105   : > { %p3960_p7 = scmp.lt.s32.totalorder %s3958_s28, %s3954_s6 }
 0x106   : > { %p3956_p1 = pnand %p3955_p0, %p5582_p9 }
 0x107   : > { %p3961_p8 = por %p3960_p7, %p3959_p6 }
 0x108   : > { %p3957_p5 = pneg %p3956_p1 }
 0x10a   : > { %p3962_p12 = pnand %p3961_p8, %p3957_p5 }
 0x10c   : > { %3965 = shalt.err (!%p3962_p12)
}
 0x10d   : > { %3333 = dma.hbm_to_vmem [thread:$0]  (%p5582_p9), %s1305_s14, 16, %s1307_s7, [#allocation38]  }
 0x10e   : > { %s1354_s3 = sshll.u32 %s4845_s16, 4  ;;  %s4642_s1 = smov [#allocation40]   ;;  %s5078_s3 = int_to_ptr.hbm [resolvable:$true] %s1354_s3 }
 0x10f   : > { %s1329_s11 = sshll.u32 %s4642_s1, 4  ;;  %s3980_s0 = sshra.s32 %s5069_s23, 4  ;;  %s1330_s11 = int_to_ptr.vmem [resolvable:$true] %s1329_s11  ;;  %s3981_s0 = int_to_ptr.hbm [resolvable:$true] %s3980_s0 }
 0x110   : > { %s3982_s25 = scalar_lea.hbm %s3981_s0, 32  ;;  %s3986_s10 = scalar_lea.hbm %s4835_s27, 32 }
 0x111   : > { %p3983_p13 = scmp.ne.s32.totalorder %s3981_s0, %s3982_s25  ;;  %p3987_p5 = scmp.lt.s32.totalorder %s3981_s0, %s4835_s27 }
 0x112   : > { %p3988_p6 = scmp.lt.s32.totalorder %s3986_s10, %s3982_s25 }
 0x113   : > { %p3984_p0 = pnand %p3983_p13, %p5582_p9 }
 0x114   : > { %p3989_p7 = por %p3988_p6, %p3987_p5 }
 0x115   : > { %p3985_p1 = pneg %p3984_p0 }
 0x117   : > { %p3990_p8 = pnand %p3989_p7, %p3985_p1 }
 0x119   : > { %3993 = shalt.err (!%p3990_p8)
}
 0x11a   : > { %s5638_s14 = smov 8   ;;  %s5639_s7 = sld [smem:[#allocation70_spill]] }
 0x11b   : > { %3337 = dma.hbm_to_vmem [thread:$0]  (%p5582_p9), %s5069_s23, 512, %s1330_s11, [#allocation41], %s5637_s26, %s5637_s26, %s5638_s14  }
 0x11c   : > { %s4643_s6 = smov [#allocation43]   ;;  %s4008_s0 = sshra.s32 %s5078_s3, 4  ;;  %s4009_s0 = int_to_ptr.hbm [resolvable:$true] %s4008_s0 }
 0x11d   : > { %s1356_s28 = sshll.u32 %s4643_s6, 4  ;;  %s4010_s25 = scalar_lea.hbm %s4009_s0, 1  ;;  %s1357_s28 = int_to_ptr.vmem [resolvable:$true] %s1356_s28 }
 0x11e   : > { %p4011_p12 = scmp.ne.s32.totalorder %s4009_s0, %s4010_s25  ;;  %s4014_s10 = scalar_lea.hbm %s4845_s16, 1 }
 0x11f   : > { %p4015_p1 = scmp.lt.s32.totalorder %s4009_s0, %s4845_s16  ;;  %p4016_p5 = scmp.lt.s32.totalorder %s4014_s10, %s4010_s25 }
 0x120   : > { %s1053_s1 = sshll.u32 %s5639_s7, 4  ;;  %p4012_p13 = pnand %p4011_p12, %p5582_p9  ;;  %s5092_s1 = int_to_ptr.hbm [resolvable:$true] %s1053_s1 }
 0x121   : > { %p4017_p6 = por %p4016_p5, %p4015_p1 }
 0x122   : > { %p4013_p0 = pneg %p4012_p13 }
 0x124   : > { %p4018_p7 = pnand %p4017_p6, %p4013_p0 }
 0x126   : > { %4021 = shalt.err (!%p4018_p7)
}
 0x127   : > { %s5640_s23 = sld [smem:[#allocation73_spill]]  ;;  %s4644_s11 = smov [#allocation9]  }
 0x128   : > { %3341 = dma.hbm_to_vmem [thread:$0]  (%p5582_p9), %s5078_s3, 16, %s1357_s28, [#allocation44]  }
 0x129   : > { %s1055_s14 = sshll.u32 %s4644_s11, 4  ;;  %s4036_s6 = sshra.s32 %s5092_s1, 4  ;;  %s1056_s14 = int_to_ptr.vmem [resolvable:$true] %s1055_s14  ;;  %s4037_s6 = int_to_ptr.hbm [resolvable:$true] %s4036_s6 }
 0x12a   : > { %s4038_s0 = scalar_lea.hbm %s4037_s6, 1  ;;  %s4042_s25 = scalar_lea.hbm %s5639_s7, 1 }
 0x12b   : > { %p4039_p8 = scmp.ne.s32.totalorder %s4037_s6, %s4038_s0  ;;  %p4043_p0 = scmp.lt.s32.totalorder %s4037_s6, %s5639_s7 }
 0x12c   : > { %p4044_p1 = scmp.lt.s32.totalorder %s4042_s25, %s4038_s0 }
 0x12d   : > { %s1080_s26 = sshll.u32 %s5640_s23, 4  ;;  %p4040_p12 = pnand %p4039_p8, %p5582_p9  ;;  %s5103_s26 = int_to_ptr.hbm [resolvable:$true] %s1080_s26 }
 0x12e   : > { %p4045_p5 = por %p4044_p1, %p4043_p0 }
 0x12f   : > { %p4041_p13 = pneg %p4040_p12 }
 0x131   : > { %p4046_p6 = pnand %p4045_p5, %p4041_p13 }
 0x133   : > { %4049 = shalt.err (!%p4046_p6)
}
 0x134   : > { %s5641_s3 = sld [smem:[#allocation75_spill]]  ;;  %s4645_s28 = smov [#allocation12]  }
 0x135   : > { %3295 = dma.hbm_to_vmem [thread:$0]  (%p5582_p9), %s5092_s1, 16, %s1056_s14, [#allocation8]  }
 0x136   : > { %s1082_s10 = sshll.u32 %s4645_s28, 4  ;;  %s4064_s6 = sshra.s32 %s5103_s26, 4  ;;  %s1083_s10 = int_to_ptr.vmem [resolvable:$true] %s1082_s10  ;;  %s4065_s6 = int_to_ptr.hbm [resolvable:$true] %s4064_s6 }
 0x137   : > { %s4066_s0 = scalar_lea.hbm %s4065_s6, 1  ;;  %s4070_s25 = scalar_lea.hbm %s5640_s23, 1 }
 0x138   : > { %p4067_p7 = scmp.ne.s32.totalorder %s4065_s6, %s4066_s0  ;;  %p4071_p13 = scmp.lt.s32.totalorder %s4065_s6, %s5640_s23 }
 0x139   : > { %p4072_p0 = scmp.lt.s32.totalorder %s4070_s25, %s4066_s0 }
 0x13a   : > { %s1107_s11 = sshll.u32 %s5641_s3, 4  ;;  %p4068_p8 = pnand %p4067_p7, %p5582_p9  ;;  %s5114_s11 = int_to_ptr.hbm [resolvable:$true] %s1107_s11 }
 0x13b   : > { %p4073_p1 = por %p4072_p0, %p4071_p13 }
 0x13c   : > { %p4069_p12 = pneg %p4068_p8 }
 0x13e   : > { %p4074_p5 = pnand %p4073_p1, %p4069_p12 }
 0x140   : > { %4077 = shalt.err (!%p4074_p5)
}
 0x141   : > { %s5642_s1 = sld [smem:[#allocation78_spill]]  ;;  %s4646_s28 = smov [#allocation15]  }
 0x142   : > { %3299 = dma.hbm_to_vmem [thread:$0]  (%p5582_p9), %s5103_s26, 16, %s1083_s10, [#allocation11]  }
 0x143   : > { %s1109_s4 = sshll.u32 %s4646_s28, 4  ;;  %s4092_s6 = sshra.s32 %s5114_s11, 4  ;;  %s1110_s4 = int_to_ptr.vmem [resolvable:$true] %s1109_s4  ;;  %s4093_s6 = int_to_ptr.hbm [resolvable:$true] %s4092_s6 }
 0x144   : > { %s4094_s0 = scalar_lea.hbm %s4093_s6, 1  ;;  %s4098_s25 = scalar_lea.hbm %s5641_s3, 1 }
 0x145   : > { %p4095_p6 = scmp.ne.s32.totalorder %s4093_s6, %s4094_s0  ;;  %p4099_p12 = scmp.lt.s32.totalorder %s4093_s6, %s5641_s3 }
 0x146   : > { %p4100_p13 = scmp.lt.s32.totalorder %s4098_s25, %s4094_s0 }
 0x147   : > { %s1137_s14 = sshll.u32 %s5642_s1, 4  ;;  %p4096_p7 = pnand %p4095_p6, %p5582_p9  ;;  %s5125_s14 = int_to_ptr.hbm [resolvable:$true] %s1137_s14 }
 0x148   : > { %p4101_p0 = por %p4100_p13, %p4099_p12 }
 0x149   : > { %p4097_p8 = pneg %p4096_p7 }
 0x14b   : > { %p4102_p1 = pnand %p4101_p0, %p4097_p8 }
 0x14d   : > { %4105 = shalt.err (!%p4102_p1)
}
 0x14e   : > { %s5643_s26 = sld [smem:[#allocation81_spill]]  ;;  %s4647_s10 = smov [#allocation18]  }
 0x14f   : > { %3303 = dma.hbm_to_vmem [thread:$0]  (%p5582_p9), %s5114_s11, 16, %s1110_s4, [#allocation14]  }
 0x150   : > { %s1139_s28 = sshll.u32 %s4647_s10, 4  ;;  %s4120_s6 = sshra.s32 %s5125_s14, 4  ;;  %s1140_s28 = int_to_ptr.vmem [resolvable:$true] %s1139_s28  ;;  %s4121_s6 = int_to_ptr.hbm [resolvable:$true] %s4120_s6 }
 0x151   : > { %s4122_s0 = scalar_lea.hbm %s4121_s6, 1  ;;  %s4126_s25 = scalar_lea.hbm %s5642_s1, 1 }
 0x152   : > { %p4123_p5 = scmp.ne.s32.totalorder %s4121_s6, %s4122_s0  ;;  %p4127_p8 = scmp.lt.s32.totalorder %s4121_s6, %s5642_s1 }
 0x153   : > { %p4128_p12 = scmp.lt.s32.totalorder %s4126_s25, %s4122_s0 }
 0x154   : > { %s1164_s7 = sshll.u32 %s5643_s26, 4  ;;  %p4124_p6 = pnand %p4123_p5, %p5582_p9  ;;  %s5136_s7 = int_to_ptr.hbm [resolvable:$true] %s1164_s7 }
 0x155   : > { %p4129_p13 = por %p4128_p12, %p4127_p8 }
 0x156   : > { %p4125_p7 = pneg %p4124_p6 }
 0x158   : > { %p4130_p0 = pnand %p4129_p13, %p4125_p7 }
 0x15a   : > { %4133 = shalt.err (!%p4130_p0)
}
 0x15b   : > { %s5644_s4 = sld [smem:[#allocation82_spill]]  ;;  %s4648_s10 = smov [#allocation21]  }
 0x15c   : > { %3307 = dma.hbm_to_vmem [thread:$0]  (%p5582_p9), %s5125_s14, 16, %s1140_s28, [#allocation17]  }
 0x15d   : > { %s1166_s3 = sshll.u32 %s4648_s10, 4  ;;  %s4148_s6 = sshra.s32 %s5136_s7, 4  ;;  %s1167_s3 = int_to_ptr.vmem [resolvable:$true] %s1166_s3  ;;  %s4149_s6 = int_to_ptr.hbm [resolvable:$true] %s4148_s6 }
 0x15e   : > { %s4150_s0 = scalar_lea.hbm %s4149_s6, 1  ;;  %s4154_s25 = scalar_lea.hbm %s5643_s26, 1 }
 0x15f   : > { %p4151_p1 = scmp.ne.s32.totalorder %s4149_s6, %s4150_s0  ;;  %p4155_p7 = scmp.lt.s32.totalorder %s4149_s6, %s5643_s26 }
 0x160   : > { %p4156_p8 = scmp.lt.s32.totalorder %s4154_s25, %s4150_s0 }
 0x161   : > { %s1190_s11 = sshll.u32 %s5644_s4, 4  ;;  %p4152_p5 = pnand %p4151_p1, %p5582_p9  ;;  %s5147_s11 = int_to_ptr.hbm [resolvable:$true] %s1190_s11 }
 0x162   : > { %p4157_p12 = por %p4156_p8, %p4155_p7 }
 0x163   : > { %p4153_p6 = pneg %p4152_p5 }
 0x165   : > { %p4158_p13 = pnand %p4157_p12, %p4153_p6 }
 0x167   : > { %4161 = shalt.err (!%p4158_p13)
}
 0x168   : > { %s5645_s14 = sld [smem:[#allocation84_spill]]  ;;  %s4649_s28 = smov [#allocation24]  }
 0x169   : > { %3311 = dma.hbm_to_vmem [thread:$0]  (%p5582_p9), %s5136_s7, 16, %s1167_s3, [#allocation20]  }
 0x16a   : > { %s1192_s10 = sshll.u32 %s4649_s28, 4  ;;  %s4176_s6 = sshra.s32 %s5147_s11, 4  ;;  %s1193_s10 = int_to_ptr.vmem [resolvable:$true] %s1192_s10  ;;  %s4177_s6 = int_to_ptr.hbm [resolvable:$true] %s4176_s6 }
 0x16b   : > { %s4178_s0 = scalar_lea.hbm %s4177_s6, 1  ;;  %s4182_s25 = scalar_lea.hbm %s5644_s4, 1 }
 0x16c   : > { %p4179_p0 = scmp.ne.s32.totalorder %s4177_s6, %s4178_s0  ;;  %p4183_p6 = scmp.lt.s32.totalorder %s4177_s6, %s5644_s4 }
 0x16d   : > { %p4184_p7 = scmp.lt.s32.totalorder %s4182_s25, %s4178_s0 }
 0x16e   : > { %s1214_s1 = sshll.u32 %s5645_s14, 4  ;;  %p4180_p1 = pnand %p4179_p0, %p5582_p9  ;;  %s5158_s1 = int_to_ptr.hbm [resolvable:$true] %s1214_s1 }
 0x16f   : > { %p4185_p8 = por %p4184_p7, %p4183_p6 }
 0x170   : > { %p4181_p5 = pneg %p4180_p1 }
 0x172   : > { %p4186_p12 = pnand %p4185_p8, %p4181_p5 }
 0x174   : > { %4189 = shalt.err (!%p4186_p12)
}
 0x175   : > { %s5646_s7 = sld [smem:[#allocation85_spill]]  ;;  %s4650_s28 = smov [#allocation27]  }
 0x176   : > { %3315 = dma.hbm_to_vmem [thread:$0]  (%p5582_p9), %s5147_s11, 16, %s1193_s10, [#allocation23]  }
 0x177   : > { %s1216_s8 = sshll.u32 %s4650_s28, 4  ;;  %s4204_s6 = sshra.s32 %s5158_s1, 4  ;;  %s1217_s8 = int_to_ptr.vmem [resolvable:$true] %s1216_s8  ;;  %s4205_s6 = int_to_ptr.hbm [resolvable:$true] %s4204_s6 }
 0x178   : > { %s4206_s0 = scalar_lea.hbm %s4205_s6, 1  ;;  %s4210_s25 = scalar_lea.hbm %s5645_s14, 1 }
 0x179   : > { %p4207_p13 = scmp.ne.s32.totalorder %s4205_s6, %s4206_s0  ;;  %p4211_p5 = scmp.lt.s32.totalorder %s4205_s6, %s5645_s14 }
 0x17a   : > { %p4212_p6 = scmp.lt.s32.totalorder %s4210_s25, %s4206_s0 }
 0x17b   : > { %s1240_s3 = sshll.u32 %s5646_s7, 4  ;;  %p4208_p0 = pnand %p4207_p13, %p5582_p9  ;;  %s5169_s3 = int_to_ptr.hbm [resolvable:$true] %s1240_s3 }
 0x17c   : > { %p4213_p7 = por %p4212_p6, %p4211_p5 }
 0x17d   : > { %p4209_p1 = pneg %p4208_p0 }
 0x17f   : > { %p4214_p8 = pnand %p4213_p7, %p4209_p1 }
 0x181   : > { %4217 = shalt.err (!%p4214_p8)
}
 0x182   : > { %s5647_s11 = sld [smem:[#allocation87_spill]]  ;;  %s4651_s10 = smov [#allocation30]  }
 0x183   : > { %3319 = dma.hbm_to_vmem [thread:$0]  (%p5582_p9), %s5158_s1, 16, %s1217_s8, [#allocation26]  }
 0x184   : > { %s1242_s28 = sshll.u32 %s4651_s10, 4  ;;  %s4232_s6 = sshra.s32 %s5169_s3, 4  ;;  %s1243_s28 = int_to_ptr.vmem [resolvable:$true] %s1242_s28  ;;  %s4233_s6 = int_to_ptr.hbm [resolvable:$true] %s4232_s6 }
 0x185   : > { %s4234_s0 = scalar_lea.hbm %s4233_s6, 1  ;;  %s4238_s25 = scalar_lea.hbm %s5646_s7, 1 }
 0x186   : > { %p4235_p12 = scmp.ne.s32.totalorder %s4233_s6, %s4234_s0  ;;  %p4239_p1 = scmp.lt.s32.totalorder %s4233_s6, %s5646_s7 }
 0x187   : > { %p4240_p5 = scmp.lt.s32.totalorder %s4238_s25, %s4234_s0 }
 0x188   : > { %s1266_s4 = sshll.u32 %s5647_s11, 4  ;;  %p4236_p13 = pnand %p4235_p12, %p5582_p9  ;;  %s5180_s4 = int_to_ptr.hbm [resolvable:$true] %s1266_s4 }
 0x189   : > { %p4241_p6 = por %p4240_p5, %p4239_p1 }
 0x18a   : > { %p4237_p0 = pneg %p4236_p13 }
 0x18c   : > { %p4242_p7 = pnand %p4241_p6, %p4237_p0 }
 0x18e   : > { %4245 = shalt.err (!%p4242_p7)
}
 0x18f   : > { %s5648_s8 = sld [smem:[#allocation89_spill]]  ;;  %s4652_s10 = smov [#allocation33]  }
 0x190   : > { %3323 = dma.hbm_to_vmem [thread:$0]  (%p5582_p9), %s5169_s3, 16, %s1243_s28, [#allocation29]  }
 0x191   : > { %s1268_s9 = sshll.u32 %s4652_s10, 4  ;;  %s4260_s6 = sshra.s32 %s5180_s4, 4  ;;  %s1269_s9 = int_to_ptr.vmem [resolvable:$true] %s1268_s9  ;;  %s4261_s6 = int_to_ptr.hbm [resolvable:$true] %s4260_s6 }
 0x192   : > { %s4262_s0 = scalar_lea.hbm %s4261_s6, 1  ;;  %s4266_s25 = scalar_lea.hbm %s5647_s11, 1 }
 0x193   : > { %p4263_p8 = scmp.ne.s32.totalorder %s4261_s6, %s4262_s0  ;;  %p4267_p0 = scmp.lt.s32.totalorder %s4261_s6, %s5647_s11 }
 0x194   : > { %p4268_p1 = scmp.lt.s32.totalorder %s4266_s25, %s4262_s0 }
 0x195   : > { %s1292_s1 = sshll.u32 %s5648_s8, 4  ;;  %p4264_p12 = pnand %p4263_p8, %p5582_p9  ;;  %s5191_s1 = int_to_ptr.hbm [resolvable:$true] %s1292_s1 }
 0x196   : > { %p4269_p5 = por %p4268_p1, %p4267_p0 }
 0x197   : > { %p4265_p13 = pneg %p4264_p12 }
 0x199   : > { %p4270_p6 = pnand %p4269_p5, %p4265_p13 }
 0x19b   : > { %4273 = shalt.err (!%p4270_p6)
}
 0x19c   : > { %s5649_s3 = sld [smem:[#allocation90_spill]]  ;;  %s4653_s28 = smov [#allocation36]  }
 0x19d   : > { %3327 = dma.hbm_to_vmem [thread:$0]  (%p5582_p9), %s5180_s4, 16, %s1269_s9, [#allocation32]  }
 0x19e   : > { %s1294_s10 = sshll.u32 %s4653_s28, 4  ;;  %s4288_s6 = sshra.s32 %s5191_s1, 4  ;;  %s1295_s10 = int_to_ptr.vmem [resolvable:$true] %s1294_s10  ;;  %s4289_s6 = int_to_ptr.hbm [resolvable:$true] %s4288_s6 }
 0x19f   : > { %s4290_s0 = scalar_lea.hbm %s4289_s6, 1  ;;  %s4294_s25 = scalar_lea.hbm %s5648_s8, 1 }
 0x1a0   : > { %p4291_p7 = scmp.ne.s32.totalorder %s4289_s6, %s4290_s0  ;;  %p4295_p13 = scmp.lt.s32.totalorder %s4289_s6, %s5648_s8 }
 0x1a1   : > { %p4296_p0 = scmp.lt.s32.totalorder %s4294_s25, %s4290_s0 }
 0x1a2   : > { %s1316_s7 = sshll.u32 %s5649_s3, 4  ;;  %p4292_p8 = pnand %p4291_p7, %p5582_p9  ;;  %s5202_s7 = int_to_ptr.hbm [resolvable:$true] %s1316_s7 }
 0x1a3   : > { %p4297_p1 = por %p4296_p0, %p4295_p13 }
 0x1a4   : > { %p4293_p12 = pneg %p4292_p8 }
 0x1a6   : > { %p4298_p5 = pnand %p4297_p1, %p4293_p12 }
 0x1a8   : > { %4301 = shalt.err (!%p4298_p5)
}
 0x1a9   : > { %s5650_s9 = sld [smem:[#allocation91_spill]]  ;;  %s4654_s28 = smov [#allocation39]  }
 0x1aa   : > { %3331 = dma.hbm_to_vmem [thread:$0]  (%p5582_p9), %s5191_s1, 16, %s1295_s10, [#allocation35]  }
 0x1ab   : > { %s1318_s11 = sshll.u32 %s4654_s28, 4  ;;  %s4316_s6 = sshra.s32 %s5202_s7, 4  ;;  %s1319_s11 = int_to_ptr.vmem [resolvable:$true] %s1318_s11  ;;  %s4317_s6 = int_to_ptr.hbm [resolvable:$true] %s4316_s6 }
 0x1ac   : > { %s4318_s0 = scalar_lea.hbm %s4317_s6, 1  ;;  %s4322_s25 = scalar_lea.hbm %s5649_s3, 1 }
 0x1ad   : > { %p4319_p6 = scmp.ne.s32.totalorder %s4317_s6, %s4318_s0  ;;  %p4323_p12 = scmp.lt.s32.totalorder %s4317_s6, %s5649_s3 }
 0x1ae   : > { %p4324_p13 = scmp.lt.s32.totalorder %s4322_s25, %s4318_s0 }
 0x1af   : > { %s1342_s4 = sshll.u32 %s5650_s9, 4  ;;  %p4320_p7 = pnand %p4319_p6, %p5582_p9  ;;  %s5213_s4 = int_to_ptr.hbm [resolvable:$true] %s1342_s4 }
 0x1b0   : > { %p4325_p0 = por %p4324_p13, %p4323_p12 }
 0x1b1   : > { %p4321_p8 = pneg %p4320_p7 }
 0x1b3   : > { %p4326_p1 = pnand %p4325_p0, %p4321_p8 }
 0x1b5   : > { %4329 = shalt.err (!%p4326_p1)
}
 0x1b6   : > { %s5651_s1 = sld [smem:[#allocation92_spill]]  ;;  %s4655_s10 = smov [#allocation42]  }
 0x1b7   : > { %3335 = dma.hbm_to_vmem [thread:$0]  (%p5582_p9), %s5202_s7, 16, %s1319_s11, [#allocation38]  }
 0x1b8   : > { %s1344_s28 = sshll.u32 %s4655_s10, 4  ;;  %s4344_s6 = sshra.s32 %s5213_s4, 4  ;;  %s1345_s28 = int_to_ptr.vmem [resolvable:$true] %s1344_s28  ;;  %s4345_s6 = int_to_ptr.hbm [resolvable:$true] %s4344_s6 }
 0x1b9   : > { %s4346_s0 = scalar_lea.hbm %s4345_s6, 1  ;;  %s4350_s25 = scalar_lea.hbm %s5650_s9, 1 }
 0x1ba   : > { %p4347_p5 = scmp.ne.s32.totalorder %s4345_s6, %s4346_s0  ;;  %p4351_p8 = scmp.lt.s32.totalorder %s4345_s6, %s5650_s9 }
 0x1bb   : > { %p4352_p12 = scmp.lt.s32.totalorder %s4350_s25, %s4346_s0 }
 0x1bc   : > { %s1366_s8 = sshll.u32 %s5651_s1, 4  ;;  %p4348_p6 = pnand %p4347_p5, %p5582_p9  ;;  %s5224_s8 = int_to_ptr.hbm [resolvable:$true] %s1366_s8 }
 0x1bd   : > { %p4353_p13 = por %p4352_p12, %p4351_p8 }
 0x1be   : > { %p4349_p7 = pneg %p4348_p6 }
 0x1c0   : > { %p4354_p0 = pnand %p4353_p13, %p4349_p7 }
 0x1c2   : > { %4357 = shalt.err (!%p4354_p0)
}
 0x1c3   : > { %s5652_s7 = sld [smem:[#allocation94_spill]]  ;;  %s4656_s10 = smov [#allocation45]  }
 0x1c4   : > { %3339 = dma.hbm_to_vmem [thread:$0]  (%p5582_p9), %s5213_s4, 16, %s1345_s28, [#allocation41]  }
 0x1c5   : > { %s1368_s3 = sshll.u32 %s4656_s10, 4  ;;  %s4372_s6 = sshra.s32 %s5224_s8, 4  ;;  %s1369_s3 = int_to_ptr.vmem [resolvable:$true] %s1368_s3  ;;  %s4373_s6 = int_to_ptr.hbm [resolvable:$true] %s4372_s6 }
 0x1c6   : > { %s4374_s0 = scalar_lea.hbm %s4373_s6, 1  ;;  %s4378_s25 = scalar_lea.hbm %s5651_s1, 1 }
 0x1c7   : > { %p4375_p1 = scmp.ne.s32.totalorder %s4373_s6, %s4374_s0  ;;  %p4379_p7 = scmp.lt.s32.totalorder %s4373_s6, %s5651_s1 }
 0x1c8   : > { %p4380_p8 = scmp.lt.s32.totalorder %s4378_s25, %s4374_s0 }
 0x1c9   : > { %s1381_s11 = sshll.u32 %s5652_s7, 4  ;;  %p4376_p5 = pnand %p4375_p1, %p5582_p9  ;;  %s5235_s11 = int_to_ptr.hbm [resolvable:$true] %s1381_s11 }
 0x1ca   : > { %p4381_p12 = por %p4380_p8, %p4379_p7 }
 0x1cb   : > { %p4377_p6 = pneg %p4376_p5 }
 0x1cd   : > { %p4382_p13 = pnand %p4381_p12, %p4377_p6 }
 0x1cf   : > { %4385 = shalt.err (!%p4382_p13)
}
 0x1d0   : > { %3343 = dma.hbm_to_vmem [thread:$0]  (%p5582_p9), %s5224_s8, 16, %s1369_s3, [#allocation44]  }
 0x1d1   : > { %s4657_s4 = smov [#allocation46]   ;;  %s4400_s10 = sshra.s32 %s5235_s11, 4  ;;  %s4401_s10 = int_to_ptr.hbm [resolvable:$true] %s4400_s10 }
 0x1d2   : > { %s1383_s28 = sshll.u32 %s4657_s4, 4  ;;  %s4402_s9 = scalar_lea.hbm %s4401_s10, 1  ;;  %s1384_s28 = int_to_ptr.vmem [resolvable:$true] %s1383_s28 }
 0x1d3   : > { %p4403_p0 = scmp.ne.s32.totalorder %s4401_s10, %s4402_s9  ;;  %s4406_s6 = scalar_lea.hbm %s5652_s7, 1 }
 0x1d4   : > { %p4407_p6 = scmp.lt.s32.totalorder %s4401_s10, %s5652_s7  ;;  %p4408_p7 = scmp.lt.s32.totalorder %s4406_s6, %s4402_s9 }
 0x1d5   : > { %p4404_p1 = pnand %p4403_p0, %p5582_p9 }
 0x1d6   : > { %p4409_p8 = por %p4408_p7, %p4407_p6 }
 0x1d7   : > { %p4405_p5 = pneg %p4404_p1 }
 0x1d9   : > { %p4410_p12 = pnand %p4409_p8, %p4405_p5 }
 0x1db   : > { %4413 = shalt.err (!%p4410_p12)
}
 0x1dc   : > { %3345 = dma.hbm_to_vmem [thread:$0]  (%p5582_p9), %s5235_s11, 16, %s1384_s28, [#allocation47]  }
 0x1dd PF: > { %s5653_s8 = sld [smem:[#allocation66_spill]]  ;;  %s1406_s3 = sand.u32 1, %s4578_s29  }
 0x1de   : > { %s3220_s0 = sshll.u32 %s4582_s21, 3  ;;  %p3439_p0 = scmp.lt.s32.totalorder %s4582_s21, 2 }
 0x1df   : > { %s3219_s25 = sshll.u32 %s1406_s3, 3  ;;  %s1407_s28 = scalar_lea.sflag [#allocation5], %s1406_s3 }
 0x1e0   : > { %s1410_s10 = scalar_lea.vmem [#allocation4], %s3219_s25  ;;  %p5260_p1 = pnand %p3439_p0, %p4929_p10 }
 0x1e1   : > { %s1418_s6 = sshll.u32 %s1410_s10, 4  ;;  %s1419_s6 = int_to_ptr.vmem [resolvable:$true] %s1418_s6 }
 0x1e2   : > { %p4432_p6 = pneg %p5260_p1 }
 0x1e3   : > { %s1414_s9 = scalar_lea.hbm %s5653_s8, %s3220_s0  ;;  %s4435_s0 = scalar_lea.hbm %s5653_s8, 16 }
 0x1e4   : > { %s1416_s4 = sshll.u32 %s1414_s9, 4  ;;  %s1417_s4 = int_to_ptr.hbm [resolvable:$true] %s1416_s4 }
 0x1e5   : > { %s4428_s1 = sshra.s32 %s1417_s4, 4  ;;  %s4429_s1 = int_to_ptr.hbm [resolvable:$true] %s4428_s1 }
 0x1e6   : > { %s4430_s7 = scalar_lea.hbm %s4429_s1, 8  ;;  %p4436_p12 = scmp.lt.s32.totalorder %s4429_s1, %s5653_s8 }
 0x1e7   : > { %p4431_p5 = scmp.ne.s32.totalorder %s4429_s1, %s4430_s7  ;;  %p4437_p13 = scmp.lt.s32.totalorder %s4435_s0, %s4430_s7 }
 0x1e9   : > { %p4433_p7 = pnand %p4432_p6, %p4431_p5  ;;  %p4438_p9 = por %p4437_p13, %p4436_p12 }
 0x1eb   : > { %p4434_p8 = pneg %p4433_p7 }
 0x1ed   : > { %p4439_p3 = pnand %p4438_p9, %p4434_p8 }
 0x1ef   : > { %4442 = shalt.err (!%p4439_p3)
}
 0x1f0   : > { %3407 = dma.hbm_to_vmem [thread:$0]  (!%p5260_p1), %s1417_s4, 128, %s1419_s6, %s1407_s28  }
 0x1f1   : > { %1427 = sbr.rel (%p4950_p4) target bundleno = 3878 (0xf26), region = 184  ;;  %s5273_s15 = sand.u32 (!%p4950_p4), 1, %s4574_s5  }
 0x1f2   : > { %s5583_s3 = sshll.u32 (!%p4950_p4), %s5273_s15, 3  ;;  %s1430_s25 = scalar_lea.sflag (!%p4950_p4), [#allocation5], %s5273_s15 }
 0x1f3   : > { %s5279_s1 = scalar_lea.vmem (!%p4950_p4), [#allocation4], %s5583_s3 }
 0x1f6   : > { %4505 = dma.done.wait (%p4935_p11), %s1430_s25, 128  }
 0x1f7   : > { %4507 = vsyncadd (%p4935_p11), %s1430_s25, 4294967168  ;;  %p5655_p9 = scmp.eq.s32.totalorder %s4911_s22, 0 }
 0x1f9   : > { %4509 = dma.done.wait (%p5655_p9), [#allocation8], 144   ;;  %p5656_p10 = pmov %p5655_p9 }
 0x1fa   : > { %p5657_p3 = pmov %p5655_p9 }
 0x1fb   : > { %4511 = vsyncadd (%p5656_p10), [#allocation8], 4294967152 }
 0x1fc   : > { %4513 = dma.done.wait (%p5657_p3), [#allocation11], 32   ;;  %p5658_p4 = pmov %p5657_p3 }
 0x1fd   : > { %p5659_p13 = pmov %p5657_p3 }
 0x1fe   : > { %4515 = vsyncadd (%p5658_p4), [#allocation11], 4294967264 }
 0x1ff   : > { %4517 = dma.done.wait (%p5659_p13), [#allocation14], 32   ;;  %p5660_p0 = pmov %p5657_p3 }
 0x201   : > { %4519 = vsyncadd (%p5660_p0), [#allocation14], 4294967264  ;;  %p5661_p11 = pmov %p5660_p0 }
 0x202   : > { %p5662_p1 = pmov %p5660_p0 }
 0x203   : > { %4521 = dma.done.wait (%p5661_p11), [#allocation17], 32  }
 0x204   : > { %4523 = vsyncadd (%p5662_p1), [#allocation17], 4294967264  ;;  %p5663_p5 = pmov %p5660_p0 }
 0x205   : > { %p5664_p6 = pmov %p5660_p0 }
 0x206   : > { %4525 = dma.done.wait (%p5663_p5), [#allocation20], 32  }
 0x207   : > { %4527 = vsyncadd (%p5664_p6), [#allocation20], 4294967264  ;;  %p5665_p7 = pmov %p5660_p0 }
 0x208   : > { %p5666_p8 = pmov %p5660_p0 }
 0x209   : > { %4529 = dma.done.wait (%p5665_p7), [#allocation23], 528  }
 0x20a   : > { %4531 = vsyncadd (%p5666_p8), [#allocation23], 4294966768  ;;  %p5667_p12 = pmov %p5660_p0 }
 0x20b   : > { %p5668_p9 = pmov %p5660_p0 }
 0x20c   : > { %4533 = dma.done.wait (%p5667_p12), [#allocation26], 32  }
 0x20d   : > { %4535 = vsyncadd (%p5668_p9), [#allocation26], 4294967264  ;;  %p5669_p10 = pmov %p5660_p0 }
 0x20e   : > { %p5670_p3 = pmov %p5660_p0 }
 0x20f   : > { %4537 = dma.done.wait (%p5669_p10), [#allocation29], 528  }
 0x210   : > { %4539 = vsyncadd (%p5670_p3), [#allocation29], 4294966768  ;;  %p5671_p4 = pmov %p5660_p0 }
 0x211   : > { %p5672_p13 = pmov %p5660_p0 }
 0x212   : > { %4541 = dma.done.wait (%p5671_p4), [#allocation32], 528  }
 0x213   : > { %4543 = vsyncadd (%p5672_p13), [#allocation32], 4294966768 }
 0x214   : > { %4545 = dma.done.wait (%p5660_p0), [#allocation35], 128   ;;  %p5673_p11 = pmov %p5660_p0 }
 0x215   : > { %p5674_p1 = pmov %p5660_p0 }
 0x216   : > { %4547 = vsyncadd (%p5673_p11), [#allocation35], 4294967168 }
 0x217   : > { %4549 = dma.done.wait (%p5674_p1), [#allocation38], 32   ;;  %p5675_p5 = pmov %p5660_p0 }
 0x218   : > { %p5676_p6 = pmov %p5660_p0 }
 0x219   : > { %4551 = vsyncadd (%p5675_p5), [#allocation38], 4294967264 }
 0x21a   : > { %4553 = dma.done.wait (%p5676_p6), [#allocation41], 528   ;;  %p5677_p7 = pmov %p5660_p0 }
 0x21b   : > { %p5678_p8 = pmov %p5660_p0 }
 0x21c   : > { %4555 = vsyncadd (%p5677_p7), [#allocation41], 4294966768 }
 0x21d   : > { %4557 = dma.done.wait (%p5678_p8), [#allocation44], 32   ;;  %p5679_p12 = pmov %p5660_p0 }
 0x21e   : > { %p5680_p9 = pmov %p5660_p0 }
 0x21f   : > { %4559 = vsyncadd (%p5679_p12), [#allocation44], 4294967264 }
 0x220   : > { %4561 = dma.done.wait (%p5680_p9), [#allocation47], 16   ;;  %p5681_p10 = pmov %p5660_p0 }
 0x221   : > { %vm1672_vm0 = vcmask 261120   ;;  %v5342_v0 = vld [vmem:[%s5279_s1] sm:$0xff]  ;;  %s5682_s18 = sld [smem:[#allocation69_spill]]  ;;  %v4658_v2 = vmov 32.0   ;;  %v3585_v39 = vld [vmem:[#allocation9] ss:$0 sm:$0xff] }
 0x222   : > { %4563 = vsyncadd (%p5681_p10), [#allocation47], 4294967280  ;;  %v1673_v1 = vsel %vm1672_vm0, %v5342_v0, 0.0  ;;  %3616 = vrcp.f32 %v4658_v2  ;;  %s5683_s2 = sld [smem:[#allocation67_spill]]  ;;  %vm1773_vm9 = vcmask 523264   ;;  %s4659_s28 = smov 104  }
 0x223   : > { %1674 = vadd.xlane.f32.xlu0 %v1673_v1  ;;  %s5684_s7 = sld [smem:[#allocation68_spill]]  ;;  %v3586_v58 = vld [vmem:[#allocation10] ss:$0 sm:$0xff]  ;;  %vm1993_vm13 = vcmask 64512   ;;  %s4660_s0 = smov 120   ;;  %vm2355_vm15 = vcmask 130048  }
 0x224   : > { %s5685_s9 = sld [smem:[#allocation71_spill]]  ;;  %s4661_s25 = smov 112  }
 0x225   : > { %s5686_s4 = sld [smem:[#allocation74_spill]] }
 0x226   : > { %s5687_s10 = sld [smem:[#allocation76_spill]] }
 0x227   : > { %v1713_v14 = vld [vmem:[%s5682_s18 + $0x18] sm:$0xff]  ;;  %v1712_v15 = vld [vmem:[%s5682_s18 + $0x10] sm:$0xff]  ;;  %v1711_v16 = vld [vmem:[%s5682_s18 + $0x8] sm:$0xff]  ;;  %s5688_s6 = sld [smem:[#allocation77_spill]] }
 0x228   : > { %v3617_v3 = vpop.eup %3616  ;;  %1733 = vmatpush.msra.mxu1 %v1713_v14  ;;  %v1710_v17 = vld [vmem:[%s5682_s18] sm:$0xff]  ;;  %s5689_s11 = sld [smem:[#allocation79_spill]] }
 0x229   : > { %v1677_v4 = vmul.f32 32.0, %v3617_v3  ;;  %vm1681_vm1 = vweird.f32 %v3617_v3  ;;  %v3583_v27 = vld [vmem:[%s5683_s2] ss:$0 sm:$0xff]  ;;  %s2090_s1 = sld [smem:[#allocation3 + %s4911_s22]]  ;;  %s4664_s2 = smov 8  }
 0x22a   : > { %1734 = vmatpush.msra.mxu1 %v1712_v15  ;;  %v3584_v30 = vld [vmem:[%s5684_s7] ss:$0 sm:$0xff]  ;;  %v1768_v33 = vld [vmem:[%s5685_s9 + $0x38] sm:$0xff]  ;;  %v1767_v34 = vld [vmem:[%s5685_s9 + $0x30] sm:$0xff]  ;;  %s4665_s7 = smov 24  }
 0x22b   : > { %v1678_v5 = vsub.f32 1.0, %v1677_v4  ;;  %v1766_v35 = vld [vmem:[%s5685_s9 + $0x28] sm:$0xff]  ;;  %v1765_v36 = vld [vmem:[%s5685_s9 + $0x20] sm:$0xff]  ;;  %v1764_v37 = vld [vmem:[%s5685_s9 + $0x18] sm:$0xff] }
 0x22c   : > { %1735 = vmatpush.msra.mxu1 %v1711_v16  ;;  %v1763_v38 = vld [vmem:[%s5685_s9 + $0x10] sm:$0xff]  ;;  %v1762_v40 = vld [vmem:[%s5685_s9 + $0x8] sm:$0xff]  ;;  %v1761_v41 = vld [vmem:[%s5685_s9] sm:$0xff] }
 0x22d   : > { %v1679_v6 = vmul.f32 %v3617_v3, %v1678_v5  ;;  %v1891_v14 = vld [vmem:[%s5688_s6 + $0x8] sm:$0xff]  ;;  %v1831_v15 = vld [vmem:[%s5686_s4] sm:$0xff] }
 0x22e   : > { %1736 = vmatpush.msra.mxu1 %v1710_v17  ;;  %v1862_v16 = vld [vmem:[%s5687_s10] sm:$0xff] }
 0x22f   : > { %v1680_v7 = vadd.f32 %v3617_v3, %v1679_v6  ;;  %v1865_v6 = vld [vmem:[%s5687_s10 + $0x18] sm:$0xff]  ;;  %v1890_v17 = vld [vmem:[%s5688_s6] sm:$0xff] }
 0x230   : > { %1785 = vmatpush.msrb.mxu1 %v1768_v33  ;;  %1882 = vmatpush.msra.mxu3 %v1865_v6 }
 0x231   : > { %v5346_v8 = vsel %vm1681_vm1, %v3617_v3, %v1680_v7  ;;  %v1893_v7 = vld [vmem:[%s5688_s6 + $0x18] sm:$0xff]  ;;  %vm2357_vm1 = vcmask 195584  }
 0x232   : > { %1786 = vmatpush.msrb.mxu1 %v1767_v34  ;;  %1910 = vmatpush.msra.mxu0 %v1893_v7  ;;  %v3588_v34 = vld [vmem:[#allocation13] ss:$0 sm:$0xff] }
 0x234   : > { %1787 = vmatpush.msrb.mxu1 %v1766_v35 }
 0x236   : > { %1788 = vmatpush.msrb.mxu1 %v1765_v36 }
 0x238   : > { %1789 = vmatpush.msrb.mxu1 %v1764_v37  ;;  %v1669_v37 = vld [vmem:[#allocation7] sm:$0xff] }
 0x23a   : > { %1790 = vmatpush.msrb.mxu1 %v1763_v38  ;;  %v3590_v38 = vld [vmem:[#allocation15] ss:$0 sm:$0xff] }
 0x23c   : > { %1791 = vmatpush.msrb.mxu1 %v1762_v40  ;;  %v3592_v40 = vld [vmem:[#allocation21] ss:$0 sm:$0xff] }
 0x23e   : > { %1792 = vmatpush.msrb.mxu1 %v1761_v41 }
 0x296   : > { %v1675_v9 = vpop.xlane.xlu0 %1674 }
 0x297   : > { %v1683_v10 = vmul.f32 %v5346_v8, %v1675_v9  ;;  %v1833_v9 = vld [vmem:[%s5686_s4 + $0x10] sm:$0xff] }
 0x299   : > { %v1684_v11 = vsub.f32 %v5342_v0, %v1683_v10  ;;  %v1864_v10 = vld [vmem:[%s5687_s10 + $0x10] sm:$0xff] }
 0x29a   : > { %1883 = vmatpush.msra.mxu3 %v1864_v10 }
 0x29b   : > { %v1685_v12 = vmul.f32 %v1684_v11, %v1684_v11 }
 0x29d   : > { %v1686_v13 = vsel %vm1672_vm0, %v1685_v12, 0.0  ;;  %v1832_v12 = vld [vmem:[%s5686_s4 + $0x8] sm:$0xff] }
 0x29e   : > { %1687 = vadd.xlane.f32.xlu0 %v1686_v13  ;;  %v1863_v13 = vld [vmem:[%s5687_s10 + $0x8] sm:$0xff] }
 0x29f   : > { %1884 = vmatpush.msra.mxu3 %v1863_v13 }
 0x2a1   : > { %1885 = vmatpush.msra.mxu3 %v1862_v16 }
 0x311   : > { %v1688_v18 = vpop.xlane.xlu0 %1687 }
 0x312   : > { %v1689_v19 = vmul.f32 %v1688_v18, %v5346_v8  ;;  %v1921_v18 = vld [vmem:[%s5689_s11 + $0x18] sm:$0xff] }
 0x314   : > { %v1690_v20 = vadd.f32 1e-05, %v1689_v19  ;;  %v1920_v19 = vld [vmem:[%s5689_s11 + $0x10] sm:$0xff] }
 0x316   : > { %3618 = vrsqrt.f32 %v1690_v20  ;;  %vm1697_vm3 = vweird.f32 %v1690_v20 }
 0x31c   : > { %v3619_v21 = vpop.eup %3618 }
 0x31d   : > { %v1692_v22 = vmul.f32 %v3619_v21, %v1690_v20  ;;  %vm1698_vm2 = vweird.f32 %v3619_v21 }
 0x31e   : > { %vm1699_vm4 = vmor %vm1697_vm3, %vm1698_vm2 }
 0x31f   : > { %v1693_v23 = vmul.f32 %v3619_v21, %v1692_v22 }
 0x321   : > { %v1694_v24 = vmul.f32 0.5, %v1693_v23  ;;  %v1918_v23 = vld [vmem:[%s5689_s11] sm:$0xff] }
 0x323   : > { %v1695_v25 = vsub.f32 1.5, %v1694_v24 }
 0x325   : > { %v1696_v26 = vmul.f32 %v3619_v21, %v1695_v25 }
 0x327   : > { %v1700_v28 = vsel %vm1699_vm4, %v3619_v21, %v1696_v26  ;;  %v1919_v21 = vld [vmem:[%s5689_s11 + $0x8] sm:$0xff] }
 0x328   : > { %v1701_v29 = vmul.f32 %v1700_v28, %v1684_v11  ;;  %v1892_v11 = vld [vmem:[%s5688_s6 + $0x10] sm:$0xff] }
 0x329   : > { %1911 = vmatpush.msra.mxu0 %v1892_v11 }
 0x32a   : > { %v1705_v31 = vmul.f32 %v3583_v27, %v1701_v29 }
 0x32b   : > { %1912 = vmatpush.msra.mxu0 %v1891_v14  ;;  %v4662_v14 = vmov -3.4028235e+38  }
 0x32c   : > { %v1709_v32 = vadd.f32 %v3584_v30, %v1705_v31  ;;  %v3587_v31 = vld [vmem:[#allocation12] ss:$0 sm:$0xff] }
 0x32d   : > { %1913 = vmatpush.msra.mxu0 %v1890_v17 }
 0x32e   : > { %3251 = vmatmul.msk.f32.vlgmr.msra.gmra.mxu1 %vm1672_vm0, %v1709_v32 }
 0x3ab   : > { %v1738_v42 = vpop.f32.mrf.mxu1 }
 0x3ac   : > { %v1739_v43 = vadd.f32 %v3585_v39, %v1738_v42  ;;  %v3593_v39 = vld [vmem:[#allocation16] ss:$0 sm:$0xff] }
 0x3ae   : > { %v3252_v44 = vmul.f32 -1.442695, %v1739_v43 }
 0x3b0   : > { %3620 = vpow2.f32 %v3252_v44 }
 0x3b6   : > { %v3621_v45 = vpop.eup %3620 }
 0x3b7   : > { %v1744_v46 = vadd.f32 1.0, %v3621_v45 }
 0x3b9   : > { %3622 = vrcp.f32 %v1744_v46  ;;  %v1756_v50 = vand.u32 2147483648, %v1744_v46  ;;  %v1754_v52 = vand.u32 2147483647, %v1744_v46  ;;  %vm1750_vm6 = vweird.f32 %v1744_v46 }
 0x3bb   : > { %v1757_v54 = vor.u32 1.1754944e-38, %v1756_v50  ;;  %vm1755_vm8 = vcmp.eq.f32.partialorder %v1754_v52, 8.507059e+37  ;;  %v3591_v50 = vld [vmem:[#allocation19] ss:$0 sm:$0xff] }
 0x3bf   : > { %v3623_v47 = vpop.eup %3622 }
 0x3c0   : > { %v1746_v48 = vmul.f32 %v3623_v47, %v1744_v46  ;;  %vm1751_vm5 = vweird.f32 %v3623_v47  ;;  %v3589_v46 = vld [vmem:[#allocation18] ss:$0 sm:$0xff] }
 0x3c1   : > { %vm1752_vm7 = vmor %vm1750_vm6, %vm1751_vm5 }
 0x3c2   : > { %v1747_v49 = vsub.f32 1.0, %v1746_v48 }
 0x3c4   : > { %v1748_v51 = vmul.f32 %v3623_v47, %v1747_v49 }
 0x3c6   : > { %v1749_v53 = vadd.f32 %v3623_v47, %v1748_v51 }
 0x3c8   : > { %v1753_v55 = vsel %vm1752_vm7, %v3623_v47, %v1749_v53 }
 0x3c9   : > { %v1758_v56 = vsel %vm1755_vm8, %v1757_v54, %v1753_v55 }
 0x3ca   : > { %v1760_v57 = vmul.f32 %v1758_v56, %v1739_v43 }
 0x3cc   : > { %3253 = vmatmul.msk.f32.vlgmr.msrb.gmra.mxu1 %vm1773_vm9, %v1760_v57 }
 0x449   : > { %v1794_v59 = vpop.f32.mrf.mxu1 }
 0x44a   : > { %v1795_v60 = vadd.f32 %v3586_v58, %v1794_v59 }
 0x44c   : > { %v1797_v61 = vmul.f32 0.5, %v1795_v60 }
 0x44e   : > { %v5369_v62 = vadd.f32 %v1797_v61, %v5342_v0  ;;  %v1834_v0 = vld [vmem:[%s5686_s4 + $0x18] sm:$0xff]  ;;  %s5699_s4 = sshll.u32 %s5273_s15, 3 }
 0x44f   : > { %1854 = vmatpush.msra.mxu2 %v1834_v0  ;;  %v2093_v0 = vstv %s2090_s1  ;;  %s5694_s1 = sld [smem:[#allocation95_spill]]  ;;  %s1667_s6 = scalar_lea.vmem [#allocation48], %s5699_s4 }
 0x450   : > { %v1801_v63 = vsel %vm1672_vm0, %v5369_v62, 0.0  ;;  %s2817_s8 = sshll.u32 %s1667_s6, 4  ;;  %s2818_s8 = int_to_ptr.vmem [resolvable:$true] %s2817_s8 }
 0x451   : > { %1802 = vadd.xlane.f32.xlu1 %v1801_v63  ;;  %1855 = vmatpush.msra.mxu2 %v1833_v9 }
 0x453   : > { %1856 = vmatpush.msra.mxu2 %v1832_v12 }
 0x455   : > { %1857 = vmatpush.msra.mxu2 %v1831_v15 }
 0x457   : > { %1937 = vmatpush.msrb.mxu2 %v1921_v18 }
 0x459   : > { %1938 = vmatpush.msrb.mxu2 %v1920_v19 }
 0x45b   : > { %1939 = vmatpush.msrb.mxu2 %v1919_v21 }
 0x45d   : > { %1940 = vmatpush.msrb.mxu2 %v1918_v23 }
 0x4c4   : > { %v1803_v1 = vpop.xlane.xlu1 %1802 }
 0x4c5   : > { %v1804_v2 = vmul.f32 %v1803_v1, %v5346_v8 }
 0x4c7   : > { %v1805_v3 = vsub.f32 %v5369_v62, %v1804_v2 }
 0x4c9   : > { %v1806_v4 = vmul.f32 %v1805_v3, %v1805_v3 }
 0x4cb   : > { %v1807_v5 = vsel %vm1672_vm0, %v1806_v4, 0.0  ;;  %v2091_v4 = vlaneseq }
 0x4cc   : > { %1808 = vadd.xlane.f32.xlu1 %v1807_v5 }
 0x4cd   : > { %v2092_v5 = vand.u32 127, %v2091_v4 }
 0x4cf   : > { %vm5430_vm14 = vcmp.lt.s32.totalorder %v2092_v5, %v2093_v0 }
 0x4d0   : > { %v2195_v15 = vsel %vm5430_vm14, 0.0, %v4662_v14 }
 0x53f   : > { %v1809_v20 = vpop.xlane.xlu1 %1808 }
 0x540   : > { %v1810_v22 = vmul.f32 %v1809_v20, %v5346_v8 }
 0x542   : > { %v1811_v24 = vadd.f32 1e-05, %v1810_v22 }
 0x544   : > { %3624 = vrsqrt.f32 %v1811_v24  ;;  %vm1818_vm11 = vweird.f32 %v1811_v24 }
 0x54a   : > { %v3625_v25 = vpop.eup %3624 }
 0x54b   : > { %v1813_v26 = vmul.f32 %v3625_v25, %v1811_v24  ;;  %vm1819_vm10 = vweird.f32 %v3625_v25 }
 0x54c   : > { %vm1820_vm12 = vmor %vm1818_vm11, %vm1819_vm10 }
 0x54d   : > { %v1814_v27 = vmul.f32 %v3625_v25, %v1813_v26 }
 0x54f   : > { %v1815_v28 = vmul.f32 0.5, %v1814_v27 }
 0x551   : > { %v1816_v29 = vsub.f32 1.5, %v1815_v28 }
 0x553   : > { %v1817_v30 = vmul.f32 %v3625_v25, %v1816_v29 }
 0x555   : > { %v1821_v32 = vsel %vm1820_vm12, %v3625_v25, %v1817_v30 }
 0x556   : > { %v1822_v33 = vmul.f32 %v1821_v32, %v1805_v3 }
 0x558   : > { %v1826_v35 = vmul.f32 %v3587_v31, %v1822_v33 }
 0x55a   : > { %v1830_v36 = vadd.f32 %v3588_v34, %v1826_v35 }
 0x55c   : > { %3254 = vmatmul.msk.f32.vlgmr.msra.gmra.mxu2 %vm1672_vm0, %v1830_v36  ;;  %3255 = vmatmul.msk.f32.vlgmr.msra.gmra.mxu3 %vm1672_vm0, %v1830_v36 }
 0x55d   : > { %3256 = vmatmul.msk.f32.vlgmr.msra.gmra.mxu0 %vm1672_vm0, %v1830_v36 }
 0x564   : > { %3257 = vmatmul.msk.f32.vlgmr.msrb.gmra.mxu2 %vm1672_vm0, %v1669_v37 }
 0x5da   : > { %v1915_v47 = vpop.f32.mrf.mxu0 }
 0x5db   : > { %v5402_v49 = vadd.f32 %v3589_v46, %v1915_v47 }
 0x5df   : > { %v1859_v41 = vpop.f32.mrf.mxu2  ;;  %v1887_v42 = vpop.f32.mrf.mxu3 }
 0x5e0   : > { %v1860_v43 = vadd.f32 %v3590_v38, %v1859_v41  ;;  %v1888_v44 = vadd.f32 %v3593_v39, %v1887_v42 }
 0x5e2   : > { %v1954_v45 = vadd.f32 %v3592_v40, %v1860_v43  ;;  %1974 = vrot.lane.b32.xlu0 %v1888_v44, %s4659_s28  ;;  %v1949_v51 = vadd.f32 %v3591_v50, %v1860_v43 }
 0x5e4   : > { %1967 = vrot.lane.b32.xlu2 %v1954_v45, %s4659_s28 }
 0x5e7   : > { %v1942_v48 = vpop.f32.mrf.mxu2 }
 0x5e8   : > { %1977 = vrot.lane.b32.xlu1 %v1942_v48, %s4660_s0  ;;  %3258 = vmatpush.xpose.msk.msrb.mxu3 %vm1993_vm13, %v1942_v48 }
 0x5ea   : > { %1965 = vrot.lane.b32.xlu0 %v1954_v45, %s4661_s25 }
 0x5eb   : > { %3259 = vmatmul.msk.f32.vlgmr.msrb.gmra.mxu3 %vm1993_vm13, %v1954_v45 }
 0x5ec   : > { %3266 = vmatpush.xpose.msk.msra.mxu3 %vm1993_vm13, %v1888_v44  ;;  %1981 = vrot.lane.b32.xlu2 %v1942_v48, %s4659_s28 }
 0x5f0   : > { %2268 = vmatpush.msrb.mxu3 %v5402_v49  ;;  %1972 = vrot.lane.b32.xlu1 %v1888_v44, %s4661_s25 }
 0x5f2   : > { %1956 = vrot.lane.b32.xlu0 %v1949_v51, %s4660_s0 }
 0x5f3   : > { %3267 = vmatmul.msk.f32.vlgmr.msra.gmra.mxu3 %vm1993_vm13, %v1949_v51 }
 0x5f4   : > { %1960 = vrot.lane.b32.xlu2 %v1949_v51, %s4659_s28 }
 0x5fc   : > { %1963 = vrot.lane.b32.xlu2 %v1954_v45, %s4660_s0 }
 0x604   : > { %1979 = vrot.lane.b32.xlu2 %v1942_v48, %s4661_s25 }
 0x60c   : > { %1970 = vrot.lane.b32.xlu2 %v1888_v44, %s4660_s0 }
 0x614   : > { %1958 = vrot.lane.b32.xlu2 %v1949_v51, %s4661_s25 }
 0x63e   : > { %v1968_v52 = vpop.permute.xlu2 %1967 }
 0x646   : > { %v1982_v53 = vpop.permute.xlu2 %1981 }
 0x647   : > { %3264 = vmatpush.xpose.msk.msra.mxu2 %vm1993_vm13, %v1982_v53 }
 0x64a   : > { %3265 = vmatmul.msk.f32.vlgmr.msra.gmra.mxu2 %vm1993_vm13, %v1968_v52 }
 0x64e   : > { %v1961_v54 = vpop.permute.xlu2 %1960 }
 0x654   : > { %v1975_v55 = vpop.permute.xlu0 %1974 }
 0x655   : > { %3272 = vmatpush.xpose.msk.msrb.mxu2 %vm1993_vm13, %v1975_v55 }
 0x656   : > { %v1964_v56 = vpop.permute.xlu2 %1963 }
 0x658   : > { %3273 = vmatmul.msk.f32.vlgmr.msrb.gmra.mxu2 %vm1993_vm13, %v1961_v54 }
 0x65a   : > { %v1978_v57 = vpop.permute.xlu1 %1977 }
 0x65b   : > { %3260 = vmatpush.xpose.msk.msrb.mxu0 %vm1993_vm13, %v1978_v57  ;;  %v4663_v57 = vmov 0.0  }
 0x65c   : > { %v1966_v59 = vpop.permute.xlu0 %1965 }
 0x65e   : > { %3261 = vmatmul.msk.f32.vlgmr.msrb.gmra.mxu0 %vm1993_vm13, %v1964_v56  ;;  %v1980_v58 = vpop.permute.xlu2 %1979 }
 0x65f   : > { %3262 = vmatpush.xpose.msk.msra.mxu1 %vm1993_vm13, %v1980_v58  ;;  %v3274_v58 = vsel %vm5430_vm14, 1.0, %v4663_v57 }
 0x662   : > { %v1973_v60 = vpop.permute.xlu1 %1972  ;;  %3263 = vmatmul.msk.f32.vlgmr.msra.gmra.mxu1 %vm1993_vm13, %v1966_v59 }
 0x663   : > { %3270 = vmatpush.xpose.msk.msrb.mxu1 %vm1993_vm13, %v1973_v60 }
 0x664   : > { %v1957_v63 = vpop.permute.xlu0 %1956 }
 0x666   : > { %v1971_v61 = vpop.permute.xlu2 %1970 }
 0x667   : > { %3268 = vmatpush.xpose.msk.msra.mxu0 %vm1993_vm13, %v1971_v61 }
 0x66a   : > { %3269 = vmatmul.msk.f32.vlgmr.msra.gmra.mxu0 %vm1993_vm13, %v1957_v63 }
 0x66e   : > { %v1959_v1 = vpop.permute.xlu2 %1958  ;;  %v2015_v2 = vpop.f32.mrf.mxu3 }
 0x66f   : > { %3271 = vmatmul.msk.f32.vlgmr.msrb.gmra.mxu1 %vm1993_vm13, %v1959_v1 }
 0x676   : > { %v2116_v6 = vpop.f32.mrf.mxu3 }
 0x677   : > { %v2117_v11 = vadd.f32 %v2116_v6, %v2015_v2 }
 0x679   : > { %v2191_v17 = vmul.f32 0.35355338, %v2117_v11 }
 0x67b   : > { %v2196_v20 = vadd.f32 %v2195_v15, %v2191_v17  ;;  %v2360_v17 = vld [vmem:[#allocation22 + $0x8] sm:$0xff] }
 0x67d   : > { %v2200_v24 = vsel %vm1993_vm13, %v2196_v20, -inf }
 0x6cd   : > { %v2087_v3 = vpop.f32.mrf.mxu2 }
 0x6db   : > { %v2188_v7 = vpop.f32.mrf.mxu2  ;;  %v2039_v13 = vpop.f32.mrf.mxu0 }
 0x6dc   : > { %v2189_v9 = vadd.f32 %v2188_v7, %v2087_v3 }
 0x6de   : > { %v2194_v12 = vmul.f32 0.35355338, %v2189_v9 }
 0x6df   : > { %v2063_v19 = vpop.f32.mrf.mxu1 }
 0x6e0   : > { %v2199_v16 = vadd.f32 %v2195_v15, %v2194_v12 }
 0x6e2   : > { %v2209_v18 = vsel %vm1993_vm13, %v2199_v16, -inf }
 0x6e3   : > { %2210 = vmax.xlane.f32.xlu1 %v2209_v18  ;;  %v2359_v18 = vld [vmem:[#allocation22] sm:$0xff] }
 0x6e7   : > { %v2140_v21 = vpop.f32.mrf.mxu0 }
 0x6e8   : > { %v2141_v22 = vadd.f32 %v2140_v21, %v2039_v13 }
 0x6ea   : > { %v2192_v23 = vmul.f32 0.35355338, %v2141_v22 }
 0x6eb   : > { %2201 = vmax.xlane.f32.xlu1 %v2200_v24 }
 0x6ec   : > { %v2164_v25 = vpop.f32.mrf.mxu1  ;;  %v2197_v26 = vadd.f32 %v2195_v15, %v2192_v23 }
 0x6ed   : > { %v2165_v27 = vadd.f32 %v2164_v25, %v2063_v19 }
 0x6ee   : > { %v2203_v28 = vsel %vm1993_vm13, %v2197_v26, -inf }
 0x6ef   : > { %v2193_v29 = vmul.f32 0.35355338, %v2165_v27  ;;  %2204 = vmax.xlane.f32.xlu0 %v2203_v28 }
 0x6f1   : > { %v2198_v30 = vadd.f32 %v2195_v15, %v2193_v29  ;;  %v2362_v15 = vld [vmem:[#allocation22 + $0x18] sm:$0xff] }
 0x6f2   : > { %2378 = vmatpush.msra.mxu3 %v2362_v15  ;;  %v2504_v15 = vshrl.u32 %v2091_v4, 7 }
 0x6f3   : > { %v2206_v31 = vsel %vm1993_vm13, %v2198_v30, -inf }
 0x6f4   : > { %2207 = vmax.xlane.f32.xlu2 %v2206_v31  ;;  %vm2506_vm10 = vcmp.ge.s32.totalorder %v2504_v15, 3  ;;  %vm2517_vm11 = vcmp.ge.s32.totalorder %v2504_v15, 2  ;;  %vm2529_vm12 = vcmp.ge.s32.totalorder %v2504_v15, 1  ;;  %vm2561_vm14 = vcmp.lt.s32.totalorder %v2504_v15, 6 }
 0x756   : > { %v2211_v32 = vpop.xlane.xlu1 %2210 }
 0x757   : > { %v2215_v33 = vsub.f32 %v2199_v16, %v2211_v32  ;;  %v2361_v16 = vld [vmem:[#allocation22 + $0x10] sm:$0xff] }
 0x758   : > { %2379 = vmatpush.msra.mxu3 %v2361_v16 }
 0x759   : > { %v2222_v34 = vmul.f32 1.442695, %v2215_v33 }
 0x75a   : > { %2380 = vmatpush.msra.mxu3 %v2360_v17 }
 0x75b   : > { %3626 = vpow2.f32 %v2222_v34 }
 0x75c   : > { %2381 = vmatpush.msra.mxu3 %v2359_v18 }
 0x75e   : > { %v2202_v47 = vpop.xlane.xlu1 %2201 }
 0x75f   : > { %v2212_v48 = vsub.f32 %v2196_v20, %v2202_v47 }
 0x761   : > { %v3627_v35 = vpop.eup %3626  ;;  %v2216_v50 = vmul.f32 1.442695, %v2212_v48 }
 0x762   : > { %v2205_v36 = vpop.xlane.xlu0 %2204  ;;  %v2233_v37 = vsel %vm1993_vm13, %v3627_v35, 0.0 }
 0x763   : > { %v2213_v38 = vsub.f32 %v2197_v26, %v2205_v36  ;;  %2234 = vadd.xlane.f32.xlu0 %v2233_v37  ;;  %v3594_v26 = vld [vmem:[#allocation24] ss:$0 sm:$0xff] }
 0x764   : > { %v2427_v36 = vld [vmem:[#allocation28 + $0x18] sm:$0xff] }
 0x765   : > { %v2218_v39 = vmul.f32 1.442695, %v2213_v38  ;;  %v2458_v37 = vld [vmem:[#allocation31 + $0x18] sm:$0xff]  ;;  %v2457_v38 = vld [vmem:[#allocation31 + $0x10] sm:$0xff] }
 0x767   : > { %3628 = vpow2.f32 %v2218_v39  ;;  %v2208_v40 = vpop.xlane.xlu2 %2207  ;;  %v2425_v39 = vld [vmem:[#allocation28 + $0x8] sm:$0xff] }
 0x768   : > { %v2214_v41 = vsub.f32 %v2198_v30, %v2208_v40  ;;  %v2456_v40 = vld [vmem:[#allocation31 + $0x8] sm:$0xff] }
 0x76a   : > { %v2220_v42 = vmul.f32 1.442695, %v2214_v41  ;;  %v2424_v41 = vld [vmem:[#allocation28] sm:$0xff] }
 0x76c   : > { %3630 = vpow2.f32 %v2220_v42  ;;  %v2455_v42 = vld [vmem:[#allocation31] sm:$0xff] }
 0x76d   : > { %v3629_v43 = vpop.eup %3628  ;;  %3632 = vpow2.f32 %v2216_v50 }
 0x76e   : > { %v2227_v44 = vsel %vm1993_vm13, %v3629_v43, 0.0 }
 0x76f   : > { %2228 = vadd.xlane.f32.xlu2 %v2227_v44 }
 0x772   : > { %v3631_v45 = vpop.eup %3630 }
 0x773   : > { %v2230_v46 = vsel %vm1993_vm13, %v3631_v45, 0.0  ;;  %v3633_v51 = vpop.eup %3632 }
 0x774   : > { %2231 = vadd.xlane.f32.xlu1 %v2230_v46  ;;  %v2224_v52 = vsel %vm1993_vm13, %v3633_v51, 0.0 }
 0x777   : > { %1990 = vrot.lane.b32.xlu0 %v5402_v49, %s4659_s28  ;;  %s4666_s28 = smov 16  }
 0x787   : > { %1984 = vrot.lane.b32.xlu2 %v5402_v49, %s4660_s0  ;;  %s5692_s0 = sld [smem:[#allocation93_spill]] }
 0x78d   : > { %1987 = vrot.lane.b32.xlu1 %v5402_v49, %s4661_s25  ;;  %s5693_s25 = smov %s5692_s0 }
 0x7a1   : > { %2225 = vadd.xlane.f32.xlu0 %v2224_v52 }
 0x7d6   : > { %v2235_v53 = vpop.xlane.xlu0 %2234 }
 0x7d7   : > { %3634 = vrcp.f32 %v2235_v53  ;;  %v3595_v53 = vld [vmem:[#allocation25] ss:$0 sm:$0xff] }
 0x7dd   : > { %v3635_v54 = vpop.eup %3634 }
 0x7de   : > { %v2243_v56 = vmul.f32 %v3635_v54, %v3627_v35 }
 0x7e0   : > { %v2249_v60 = vmul.f32 %v3274_v58, %v2243_v56  ;;  %v3596_v56 = vld [vmem:[#allocation27] ss:$0 sm:$0xff] }
 0x7e2   : > { %v2229_v55 = vpop.xlane.xlu2 %2228 }
 0x7e3   : > { %3636 = vrcp.f32 %v2229_v55 }
 0x7e7   : > { %v2232_v2 = vpop.xlane.xlu1 %2231 }
 0x7e8   : > { %3638 = vrcp.f32 %v2232_v2 }
 0x7e9   : > { %v3637_v59 = vpop.eup %3636  ;;  %v1991_v49 = vpop.permute.xlu0 %1990 }
 0x7ea   : > { %v2241_v61 = vmul.f32 %v3637_v59, %v3629_v43  ;;  %2337 = vmatpush.msra.mxu2 %v1991_v49  ;;  %v1985_v63 = vpop.permute.xlu2 %1984  ;;  %v3598_v59 = vld [vmem:[#allocation33] ss:$0 sm:$0xff] }
 0x7eb   : > { %2291 = vmatpush.msrb.mxu0 %v1985_v63  ;;  %3278 = vmatmul.msk.f32.vlgmr.msra.gmra.mxu2 %vm1993_vm13, %v2249_v60  ;;  %v2621_v60 = vld [vmem:[#allocation40 + $0x18] sm:$0xff]  ;;  %v2620_v49 = vld [vmem:[#allocation40 + $0x10] sm:$0xff] }
 0x7ec   : > { %v2247_v1 = vmul.f32 %v3274_v58, %v2241_v61  ;;  %2637 = vmatpush.msrb.mxu2 %v2621_v60 }
 0x7ed   : > { %2447 = vmatpush.msra.mxu0 %v2427_v36 }
 0x7ee   : > { %3276 = vmatmul.msk.f32.vlgmr.msrb.gmra.mxu0 %vm1993_vm13, %v2247_v1  ;;  %v3639_v3 = vpop.eup %3638  ;;  %v2619_v1 = vld [vmem:[#allocation40 + $0x8] sm:$0xff]  ;;  %2638 = vmatpush.msrb.mxu2 %v2620_v49 }
 0x7ef   : > { %v2242_v5 = vmul.f32 %v3639_v3, %v3631_v45  ;;  %v2618_v3 = vld [vmem:[#allocation40] sm:$0xff] }
 0x7f0   : > { %2639 = vmatpush.msrb.mxu2 %v2619_v1 }
 0x7f1   : > { %v2248_v0 = vmul.f32 %v3274_v58, %v2242_v5 }
 0x7f2   : > { %2640 = vmatpush.msrb.mxu2 %v2618_v3 }
 0x7ff   : > { %v1988_v6 = vpop.permute.xlu1 %1987 }
 0x800   : > { %2314 = vmatpush.msra.mxu1 %v1988_v6 }
 0x801   : > { %3277 = vmatmul.msk.f32.vlgmr.msra.gmra.mxu1 %vm1993_vm13, %v2248_v0 }
 0x802   : > { %2475 = vmatpush.msrb.mxu1 %v2458_v37 }
 0x804   : > { %2476 = vmatpush.msrb.mxu1 %v2457_v38 }
 0x806   : > { %2477 = vmatpush.msrb.mxu1 %v2456_v40 }
 0x808   : > { %2478 = vmatpush.msrb.mxu1 %v2455_v42  ;;  %v3604_v42 = vld [vmem:[#allocation34 + $0x5] ss:$0 sm:$0xff] }
 0x814   : > { %v2226_v7 = vpop.xlane.xlu0 %2225 }
 0x815   : > { %3640 = vrcp.f32 %v2226_v7 }
 0x81b   : > { %v3641_v9 = vpop.eup %3640 }
 0x81c   : > { %v2240_v10 = vmul.f32 %v3641_v9, %v3633_v51 }
 0x81e   : > { %v2246_v11 = vmul.f32 %v3274_v58, %v2240_v10 }
 0x820   : > { %3275 = vmatmul.msk.f32.vlgmr.msrb.gmra.mxu3 %vm1993_vm13, %v2246_v11  ;;  %v3597_v11 = vld [vmem:[#allocation30] ss:$0 sm:$0xff] }
 0x86b   : > { %v2293_v12 = vpop.f32.mrf.mxu0 }
 0x86c   : > { %2343 = vrot.lane.b32.xlu2 %v2293_v12, %s4664_s2  ;;  %s5695_s2 = sld [smem:[#allocation96_spill]] }
 0x86e   : > { %v2339_v13 = vpop.f32.mrf.mxu2 }
 0x874   : > { %2351 = vrot.lane.b32.xlu2 %v2339_v13, %s4665_s7  ;;  %s5696_s7 = sld [smem:[#allocation98_spill]] }
 0x87e   : > { %v2316_v14 = vpop.f32.mrf.mxu1 }
 0x87f   : > { %2347 = vrot.lane.b32.xlu1 %v2316_v14, %s4666_s28  ;;  %s5697_s28 = sld [smem:[#allocation97_spill]] }
 0x8a3   : > { %v2270_v20 = vpop.f32.mrf.mxu3 }
 0x8c6   : > { %v2344_v19 = vpop.permute.xlu2 %2343 }
 0x8c7   : > { %v2354_v21 = vsel %vm1993_vm13, %v2270_v20, %v2344_v19  ;;  %vm2549_vm13 = vcmp.lt.s32.totalorder %v2504_v15, 7 }
 0x8ce   : > { %v2352_v23 = vpop.permute.xlu2 %2351 }
 0x8f1   : > { %v2348_v22 = vpop.permute.xlu1 %2347 }
 0x8f2   : > { %v2356_v24 = vsel %vm2355_vm15, %v2354_v21, %v2348_v22  ;;  %v3599_v22 = vld [vmem:[#allocation34] ss:$0 sm:$0xff]  ;;  %vm2573_vm15 = vcmp.lt.s32.totalorder %v2504_v15, 5 }
 0x8f3   : > { %v2358_v25 = vsel %vm2357_vm1, %v2356_v24, %v2352_v23  ;;  %v3600_v23 = vld [vmem:[#allocation34 + $0x1] ss:$0 sm:$0xff] }
 0x8f4   : > { %3279 = vmatmul.msk.f32.vlgmr.msra.gmra.mxu3 %vm1672_vm0, %v2358_v25 }
 0x977   : > { %v2383_v27 = vpop.f32.mrf.mxu3 }
 0x978   : > { %v2386_v28 = vadd.f32 %v2383_v27, %v5369_v62  ;;  %v2426_v62 = vld [vmem:[#allocation28 + $0x10] sm:$0xff]  ;;  %v3601_v27 = vld [vmem:[#allocation34 + $0x2] ss:$0 sm:$0xff] }
 0x979   : > { %2448 = vmatpush.msra.mxu0 %v2426_v62  ;;  %v3603_v62 = vld [vmem:[#allocation34 + $0x4] ss:$0 sm:$0xff] }
 0x97a   : > { %v5459_v29 = vadd.f32 %v3594_v26, %v2386_v28 }
 0x97b   : > { %2449 = vmatpush.msra.mxu0 %v2425_v39 }
 0x97c   : > { %v2394_v30 = vsel %vm1672_vm0, %v5459_v29, 0.0 }
 0x97d   : > { %2395 = vadd.xlane.f32.xlu1 %v2394_v30  ;;  %2450 = vmatpush.msra.mxu0 %v2424_v41 }
 0x9f0   : > { %v2396_v31 = vpop.xlane.xlu1 %2395 }
 0x9f1   : > { %v2397_v32 = vmul.f32 %v2396_v31, %v5346_v8 }
 0x9f3   : > { %v2398_v33 = vsub.f32 %v5459_v29, %v2397_v32 }
 0x9f5   : > { %v2399_v34 = vmul.f32 %v2398_v33, %v2398_v33 }
 0x9f7   : > { %v2400_v35 = vsel %vm1672_vm0, %v2399_v34, 0.0  ;;  %v3602_v34 = vld [vmem:[#allocation34 + $0x3] ss:$0 sm:$0xff] }
 0x9f8   : > { %2401 = vadd.xlane.f32.xlu2 %v2400_v35 }
 0xa6b   : > { %v2402_v43 = vpop.xlane.xlu2 %2401 }
 0xa6c   : > { %v2403_v44 = vmul.f32 %v2402_v43, %v5346_v8 }
 0xa6e   : > { %v2404_v45 = vadd.f32 1e-05, %v2403_v44 }
 0xa70   : > { %3642 = vrsqrt.f32 %v2404_v45  ;;  %vm2411_vm3 = vweird.f32 %v2404_v45 }
 0xa76   : > { %v3643_v46 = vpop.eup %3642 }
 0xa77   : > { %v2406_v47 = vmul.f32 %v3643_v46, %v2404_v45  ;;  %vm2412_vm2 = vweird.f32 %v3643_v46 }
 0xa78   : > { %vm2413_vm4 = vmor %vm2411_vm3, %vm2412_vm2 }
 0xa79   : > { %v2407_v48 = vmul.f32 %v3643_v46, %v2406_v47 }
 0xa7b   : > { %v2408_v50 = vmul.f32 0.5, %v2407_v48 }
 0xa7d   : > { %v2409_v51 = vsub.f32 1.5, %v2408_v50 }
 0xa7f   : > { %v2410_v52 = vmul.f32 %v3643_v46, %v2409_v51 }
 0xa81   : > { %v2414_v54 = vsel %vm2413_vm4, %v3643_v46, %v2410_v52  ;;  %v3605_v46 = vld [vmem:[#allocation34 + $0x6] ss:$0 sm:$0xff] }
 0xa82   : > { %v2415_v55 = vmul.f32 %v2414_v54, %v2398_v33 }
 0xa84   : > { %v2419_v57 = vmul.f32 %v3595_v53, %v2415_v55  ;;  %v3606_v53 = vld [vmem:[#allocation36] ss:$0 sm:$0xff]  ;;  %v3607_v55 = vld [vmem:[#allocation37] ss:$0 sm:$0xff] }
 0xa86   : > { %v2423_v58 = vadd.f32 %v3596_v56, %v2419_v57  ;;  %v3608_v57 = vld [vmem:[#allocation39] ss:$0 sm:$0xff] }
 0xa88   : > { %3280 = vmatmul.msk.f32.vlgmr.msra.gmra.mxu0 %vm1672_vm0, %v2423_v58  ;;  %3281 = vmatmul.msk.f32.vlgmr.msrb.gmra.mxu1 %vm1672_vm0, %v2423_v58 }
 0xb05   : > { %v2480_v61 = vpop.f32.mrf.mxu1  ;;  %v2452_v14 = vpop.f32.mrf.mxu0 }
 0xb06   : > { %v2481_v63 = vadd.f32 %v3598_v59, %v2480_v61  ;;  %v2453_v18 = vadd.f32 %v3597_v11, %v2452_v14 }
 0xb08   : > { %v3282_v2 = vmul.f32 -1.442695, %v2481_v63 }
 0xb0a   : > { %3644 = vpow2.f32 %v3282_v2 }
 0xb10   : > { %v3645_v5 = vpop.eup %3644 }
 0xb11   : > { %v2486_v0 = vadd.f32 1.0, %v3645_v5 }
 0xb13   : > { %3646 = vrcp.f32 %v2486_v0  ;;  %v2498_v10 = vand.u32 2147483648, %v2486_v0  ;;  %v2496_v13 = vand.u32 2147483647, %v2486_v0  ;;  %vm2492_vm6 = vweird.f32 %v2486_v0 }
 0xb15   : > { %v2499_v17 = vor.u32 1.1754944e-38, %v2498_v10  ;;  %vm2497_vm8 = vcmp.eq.f32.partialorder %v2496_v13, 8.507059e+37 }
 0xb19   : > { %v3647_v6 = vpop.eup %3646 }
 0xb1a   : > { %v2488_v7 = vmul.f32 %v3647_v6, %v2486_v0  ;;  %vm2493_vm5 = vweird.f32 %v3647_v6 }
 0xb1b   : > { %vm2494_vm7 = vmor %vm2492_vm6, %vm2493_vm5 }
 0xb1c   : > { %v2489_v9 = vsub.f32 1.0, %v2488_v7 }
 0xb1e   : > { %v2490_v12 = vmul.f32 %v3647_v6, %v2489_v9 }
 0xb20   : > { %v2491_v16 = vadd.f32 %v3647_v6, %v2490_v12  ;;  %v3609_v12 = vld [vmem:[#allocation42] ss:$0 sm:$0xff] }
 0xb22   : > { %v2495_v19 = vsel %vm2494_vm7, %v3647_v6, %v2491_v16 }
 0xb23   : > { %v2500_v20 = vsel %vm2497_vm8, %v2499_v17, %v2495_v19 }
 0xb24   : > { %v2502_v21 = vmul.f32 %v2500_v20, %v2453_v18 }
 0xb26   : > { %v2505_v24 = vrot.slane %v2502_v21, 5  ;;  %v2516_v25 = vrot.slane %v2502_v21, 6  ;;  %v2528_v26 = vrot.slane %v2502_v21, 7  ;;  %v2547_v31 = vrot.slane %v2502_v21, 1 }
 0xb27   : > { %v2559_v35 = vrot.slane %v2502_v21, 2  ;;  %v2571_v39 = vrot.slane %v2502_v21, 3  ;;  %v2545_v41 = vmul.f32 %v3602_v34, %v2502_v21  ;;  %v3610_v34 = vld [vmem:[#allocation43] ss:$0 sm:$0xff] }
 0xb28   : > { %v2509_v28 = vsel %vm2506_vm10, %v2505_v24, 0.0  ;;  %v2520_v4 = vsel %vm2517_vm11, %v2516_v25, 0.0  ;;  %v2532_v30 = vsel %vm2529_vm12, %v2528_v26, 0.0  ;;  %v2551_v38 = vsel %vm2549_vm13, %v2547_v31, 0.0  ;;  %v2684_v24 = vld [vmem:[%s5693_s25 + $0x8] sm:$0xff] }
 0xb29   : > { %v2514_v32 = vmul.f32 %v3599_v22, %v2509_v28  ;;  %v2526_v33 = vmul.f32 %v3600_v23, %v2520_v4  ;;  %v2538_v37 = vmul.f32 %v3601_v27, %v2532_v30  ;;  %v2563_v43 = vsel %vm2561_vm14, %v2559_v35, 0.0  ;;  %v2686_v22 = vld [vmem:[%s5692_s0 + $0x18] sm:$0xff]  ;;  %v2685_v23 = vld [vmem:[%s5693_s25 + $0x10] sm:$0xff]  ;;  %s3289_s0 = sshll.u32 %s4911_s22, 3  ;;  %s2805_s22 = scalar_lea.sflag [#allocation6], %s5273_s15 }
 0xb2a   : > { %v2557_v45 = vmul.f32 %v3603_v62, %v2551_v38  ;;  %v2575_v47 = vsel %vm2573_vm15, %v2571_v39, 0.0  ;;  %v2569_v50 = vmul.f32 %v3604_v42, %v2563_v43  ;;  %2706 = vmatpush.msrb.mxu3 %v2686_v22  ;;  %v2741_v39 = vld [vmem:[%s5694_s1 + $0x38] sm:$0xff]  ;;  %v2738_v42 = vld [vmem:[%s5694_s1 + $0x20] sm:$0xff]  ;;  %s2815_s3 = scalar_lea.hbm %s5696_s7, %s3289_s0 }
 0xb2b   : > { %v2527_v36 = vadd.f32 %v2526_v33, %v2514_v32  ;;  %v2581_v52 = vmul.f32 %v3605_v46, %v2575_v47  ;;  %2757 = vmatpush.msrb.mxu0 %v2741_v39  ;;  %v2737_v43 = vld [vmem:[%s5694_s1 + $0x18] sm:$0xff]  ;;  %v2735_v46 = vld [vmem:[%s5694_s1 + $0x8] sm:$0xff]  ;;  %v2734_v47 = vld [vmem:[%s5694_s1] sm:$0xff]  ;;  %s2819_s9 = sshll.u32 %s2815_s3, 4  ;;  %s2820_s9 = int_to_ptr.hbm [resolvable:$true] %s2819_s9 }
 0xb2c   : > { %2707 = vmatpush.msrb.mxu3 %v2685_v23  ;;  %v3614_v23 = vld [vmem:[%s5695_s2] ss:$0 sm:$0xff]  ;;  %s4472_s2 = sshra.s32 %s2820_s9, 4  ;;  %s4473_s2 = int_to_ptr.hbm [resolvable:$true] %s4472_s2 }
 0xb2d   : > { %v2539_v40 = vadd.f32 %v2538_v37, %v2527_v36  ;;  %v3611_v37 = vld [vmem:[#allocation45] ss:$0 sm:$0xff]  ;;  %s4474_s0 = scalar_lea.hbm %s4473_s2, 8  ;;  %p4479_p0 = scmp.lt.s32.totalorder %s4473_s2, %s5696_s7 }
 0xb2e   : > { %2708 = vmatpush.msrb.mxu3 %v2684_v24  ;;  %p4475_p3 = scmp.ne.s32.totalorder %s4473_s2, %s4474_s0 }
 0xb2f   : > { %v2546_v44 = vadd.f32 %v2545_v41, %v2539_v40  ;;  %v2740_v40 = vld [vmem:[%s5694_s1 + $0x30] sm:$0xff]  ;;  %v2739_v41 = vld [vmem:[%s5694_s1 + $0x28] sm:$0xff] }
 0xb30   : > { %2758 = vmatpush.msrb.mxu0 %v2740_v40  ;;  %p4476_p4 = pnand %p4475_p3, %p4942_p2 }
 0xb31   : > { %v2558_v48 = vadd.f32 %v2557_v45, %v2546_v44  ;;  %v3612_v44 = vld [vmem:[#allocation46] ss:$0 sm:$0xff]  ;;  %v2736_v45 = vld [vmem:[%s5694_s1 + $0x10] sm:$0xff] }
 0xb32   : > { %2759 = vmatpush.msrb.mxu0 %v2739_v41  ;;  %p4477_p13 = pneg %p4476_p4 }
 0xb33   : > { %v2570_v51 = vadd.f32 %v2569_v50, %v2558_v48 }
 0xb34   : > { %2760 = vmatpush.msrb.mxu0 %v2738_v42 }
 0xb35   : > { %v2582_v54 = vadd.f32 %v2581_v52, %v2570_v51 }
 0xb36   : > { %2761 = vmatpush.msrb.mxu0 %v2737_v43 }
 0xb37   : > { %v2587_v56 = vadd.f32 %v3606_v53, %v2582_v54 }
 0xb38   : > { %2762 = vmatpush.msrb.mxu0 %v2736_v45 }
 0xb39   : > { %v2592_v58 = vmul.f32 %v3607_v55, %v2587_v56 }
 0xb3a   : > { %2763 = vmatpush.msrb.mxu0 %v2735_v46 }
 0xb3b   : > { %v2597_v59 = vadd.f32 %v3608_v57, %v2592_v58 }
 0xb3c   : > { %2764 = vmatpush.msrb.mxu0 %v2734_v47 }
 0xb3d   : > { %v3283_v60 = vmul.f32 -1.442695, %v2597_v59 }
 0xb3f   : > { %3648 = vpow2.f32 %v3283_v60 }
 0xb45   : > { %v3649_v49 = vpop.eup %3648 }
 0xb46   : > { %v2601_v61 = vadd.f32 1.0, %v3649_v49 }
 0xb48   : > { %3650 = vrcp.f32 %v2601_v61  ;;  %v2613_v3 = vand.u32 2147483648, %v2601_v61  ;;  %v2611_v0 = vand.u32 2147483647, %v2601_v61  ;;  %vm2607_vm2 = vweird.f32 %v2601_v61 }
 0xb4a   : > { %v2614_v7 = vor.u32 1.1754944e-38, %v2613_v3  ;;  %vm2612_vm4 = vcmp.eq.f32.partialorder %v2611_v0, 8.507059e+37 }
 0xb4e   : > { %v3651_v63 = vpop.eup %3650 }
 0xb4f   : > { %v2603_v1 = vmul.f32 %v3651_v63, %v2601_v61  ;;  %vm2608_vm1 = vweird.f32 %v3651_v63 }
 0xb50   : > { %vm2609_vm3 = vmor %vm2607_vm2, %vm2608_vm1 }
 0xb51   : > { %v2604_v2 = vsub.f32 1.0, %v2603_v1 }
 0xb53   : > { %v2605_v5 = vmul.f32 %v3651_v63, %v2604_v2  ;;  %v3613_v2 = vld [vmem:[%s4870_s30] ss:$0 sm:$0xff] }
 0xb55   : > { %v2606_v6 = vadd.f32 %v3651_v63, %v2605_v5 }
 0xb57   : > { %v2610_v9 = vsel %vm2609_vm3, %v3651_v63, %v2606_v6 }
 0xb58   : > { %v2615_v10 = vsel %vm2612_vm4, %v2614_v7, %v2610_v9 }
 0xb59   : > { %v2617_v11 = vmul.f32 %v2615_v10, %v2597_v59 }
 0xb5b   : > { %3284 = vmatmul.msk.f32.vlgmr.msrb.gmra.mxu2 %vm1672_vm0, %v2617_v11 }
 0xbde   : > { %v2642_v13 = vpop.f32.mrf.mxu2 }
 0xbdf   : > { %v2645_v14 = vadd.f32 %v2642_v13, %v5459_v29  ;;  %v2683_v29 = vld [vmem:[%s5693_s25] sm:$0xff] }
 0xbe0   : > { %2709 = vmatpush.msrb.mxu3 %v2683_v29  ;;  %v3615_v29 = vld [vmem:[%s5697_s28] ss:$0 sm:$0xff]  ;;  %s4478_s28 = scalar_lea.hbm %s5696_s7, 16 }
 0xbe1   : > { %v5472_v15 = vadd.f32 %v3609_v12, %v2645_v14  ;;  %p4480_p11 = scmp.lt.s32.totalorder %s4478_s28, %s4474_s0 }
 0xbe3   : > { %v2653_v16 = vsel %vm1672_vm0, %v5472_v15, 0.0  ;;  %p4481_p1 = por %p4480_p11, %p4479_p0 }
 0xbe4   : > { %2654 = vadd.xlane.f32.xlu0 %v2653_v16 }
 0xbe5   : > { %p4482_p5 = pnand %p4481_p1, %p4477_p13 }
 0xc57   : > { %v2655_v17 = vpop.xlane.xlu0 %2654 }
 0xc58   : > { %v2656_v18 = vmul.f32 %v2655_v17, %v5346_v8 }
 0xc5a   : > { %v2657_v19 = vsub.f32 %v5472_v15, %v2656_v18 }
 0xc5c   : > { %v2658_v20 = vmul.f32 %v2657_v19, %v2657_v19 }
 0xc5e   : > { %v2659_v21 = vsel %vm1672_vm0, %v2658_v20, 0.0 }
 0xc5f   : > { %2660 = vadd.xlane.f32.xlu0 %v2659_v21 }
 0xcd2   : > { %v2661_v25 = vpop.xlane.xlu0 %2660 }
 0xcd3   : > { %v2662_v26 = vmul.f32 %v2661_v25, %v5346_v8 }
 0xcd5   : > { %v2663_v27 = vadd.f32 1e-05, %v2662_v26 }
 0xcd7   : > { %3652 = vrsqrt.f32 %v2663_v27  ;;  %vm2670_vm6 = vweird.f32 %v2663_v27 }
 0xcdd   : > { %v3653_v28 = vpop.eup %3652 }
 0xcde   : > { %v2665_v4 = vmul.f32 %v3653_v28, %v2663_v27  ;;  %vm2671_vm5 = vweird.f32 %v3653_v28 }
 0xcdf   : > { %vm2672_vm7 = vmor %vm2670_vm6, %vm2671_vm5 }
 0xce0   : > { %v2666_v30 = vmul.f32 %v3653_v28, %v2665_v4 }
 0xce2   : > { %v2667_v31 = vmul.f32 0.5, %v2666_v30 }
 0xce4   : > { %v2668_v32 = vsub.f32 1.5, %v2667_v31 }
 0xce6   : > { %v2669_v33 = vmul.f32 %v3653_v28, %v2668_v32 }
 0xce8   : > { %v2673_v35 = vsel %vm2672_vm7, %v3653_v28, %v2669_v33 }
 0xce9   : > { %v2674_v36 = vmul.f32 %v2673_v35, %v2657_v19 }
 0xceb   : > { %v2678_v62 = vmul.f32 %v3610_v34, %v2674_v36 }
 0xced   : > { %v2682_v38 = vadd.f32 %v3611_v37, %v2678_v62 }
 0xcef   : > { %3285 = vmatmul.msk.f32.vlgmr.msrb.gmra.mxu3 %vm1672_vm0, %v2682_v38 }
 0xd72   : > { %v2711_v48 = vpop.f32.mrf.mxu3 }
 0xd73   : > { %v2712_v50 = vadd.f32 %v3612_v44, %v2711_v48 }
 0xd75   : > { %v3286_v51 = vmul.f32 -1.442695, %v2712_v50 }
 0xd77   : > { %3654 = vpow2.f32 %v3286_v51 }
 0xd7d   : > { %v3655_v52 = vpop.eup %3654 }
 0xd7e   : > { %v2717_v53 = vadd.f32 1.0, %v3655_v52 }
 0xd80   : > { %3656 = vrcp.f32 %v2717_v53  ;;  %v2729_v57 = vand.u32 2147483648, %v2717_v53  ;;  %v2727_v59 = vand.u32 2147483647, %v2717_v53  ;;  %vm2723_vm10 = vweird.f32 %v2717_v53 }
 0xd82   : > { %v2730_v49 = vor.u32 1.1754944e-38, %v2729_v57  ;;  %vm2728_vm12 = vcmp.eq.f32.partialorder %v2727_v59, 8.507059e+37 }
 0xd86   : > { %v3657_v54 = vpop.eup %3656 }
 0xd87   : > { %v2719_v55 = vmul.f32 %v3657_v54, %v2717_v53  ;;  %vm2724_vm8 = vweird.f32 %v3657_v54 }
 0xd88   : > { %vm2725_vm11 = vmor %vm2723_vm10, %vm2724_vm8 }
 0xd89   : > { %v2720_v56 = vsub.f32 1.0, %v2719_v55 }
 0xd8b   : > { %v2721_v58 = vmul.f32 %v3657_v54, %v2720_v56 }
 0xd8d   : > { %v2722_v60 = vadd.f32 %v3657_v54, %v2721_v58 }
 0xd8f   : > { %v2726_v61 = vsel %vm2725_vm11, %v3657_v54, %v2722_v60 }
 0xd90   : > { %v2731_v63 = vsel %vm2728_vm12, %v2730_v49, %v2726_v61 }
 0xd91   : > { %v2733_v1 = vmul.f32 %v2731_v63, %v2712_v50 }
 0xd93   : > { %3287 = vmatmul.msk.f32.vlgmr.msrb.gmra.mxu0 %vm1773_vm9, %v2733_v1 }
 0xe10   : > { %v2766_v3 = vpop.f32.mrf.mxu0 }
 0xe11   : > { %v2767_v5 = vadd.f32 %v3613_v2, %v2766_v3 }
 0xe13   : > { %v2769_v0 = vmul.f32 0.5, %v2767_v5 }
 0xe15   : > { %v2770_v6 = vadd.f32 %v2769_v0, %v5472_v15 }
 0xe17   : > { %v2773_v7 = vsel %vm1672_vm0, %v2770_v6, 0.0 }
 0xe18   : > { %2774 = vadd.xlane.f32.xlu0 %v2773_v7 }
 0xe8b   : > { %v2775_v9 = vpop.xlane.xlu0 %2774 }
 0xe8c   : > { %v2776_v10 = vmul.f32 %v2775_v9, %v5346_v8 }
 0xe8e   : > { %v2777_v11 = vsub.f32 %v2770_v6, %v2776_v10 }
 0xe90   : > { %v2778_v12 = vmul.f32 %v2777_v11, %v2777_v11 }
 0xe92   : > { %v2779_v13 = vsel %vm1672_vm0, %v2778_v12, 0.0 }
 0xe93   : > { %2780 = vadd.xlane.f32.xlu1 %v2779_v13 }
 0xf06   : > { %v2781_v14 = vpop.xlane.xlu1 %2780 }
 0xf07   : > { %v2782_v16 = vmul.f32 %v2781_v14, %v5346_v8 }
 0xf09   : > { %v2783_v17 = vadd.f32 1e-05, %v2782_v16 }
 0xf0b   : > { %3658 = vrsqrt.f32 %v2783_v17  ;;  %vm2790_vm13 = vweird.f32 %v2783_v17 }
 0xf11   : > { %v3659_v15 = vpop.eup %3658 }
 0xf12   : > { %v2785_v18 = vmul.f32 %v3659_v15, %v2783_v17  ;;  %vm2791_vm9 = vweird.f32 %v3659_v15 }
 0xf13   : > { %vm2792_vm14 = vmor %vm2790_vm13, %vm2791_vm9 }
 0xf14   : > { %v2786_v19 = vmul.f32 %v3659_v15, %v2785_v18 }
 0xf16   : > { %v2787_v20 = vmul.f32 0.5, %v2786_v19 }
 0xf18   : > { %v2788_v21 = vsub.f32 1.5, %v2787_v20 }
 0xf1a   : > { %v2789_v22 = vmul.f32 %v3659_v15, %v2788_v21 }
 0xf1c   : > { %v2793_v24 = vsel %vm2792_vm14, %v3659_v15, %v2789_v22 }
 0xf1d   : > { %v2794_v8 = vmul.f32 %v2793_v24, %v2777_v11 }
 0xf1f   : > { %v2798_v25 = vmul.f32 %v3614_v23, %v2794_v8 }
 0xf21   : > { %v2802_v26 = vadd.f32 %v3615_v29, %v2798_v25 }
 0xf23   : > { %2803 = vst.msk [vmem:[%s1667_s6] sm:$0xff] %vm1672_vm0, %v2802_v26 }
 0xf24   : > { %4485 = shalt.err (!%p4482_p5)
}
 0xf25   : > { %3402 = dma.vmem_to_hbm [thread:$0]  (%p4942_p2), %s2818_s8, 128, %s2820_s9, %s2805_s22  }
 0xf26 PF: > { %s5700_s3 = sld [smem:[#allocation99_spill]]  ;;  %p5703_p7 = scmp.ge.s32.totalorder %s4582_s21, 2 }
 0xf27   : > { %s5701_s4 = sld [smem:[#allocation103_spill]] }
 0xf2c   : > { %s2831_s15 = sand.u32 1, %s5700_s3  }
 0xf2d   : > { %p5702_p6 = scmp.ne.s32.totalorder %s5701_s4, 0  ;;  %s2832_s6 = scalar_lea.sflag [#allocation6], %s2831_s15 }
 0xf2f   : > { %p3409_p8 = pnand %p5703_p7, %p5702_p6 }
 0xf31   : > { %p3410_p12 = pneg %p3409_p8 }
 0xf33   : > { %4565 = dma.done.wait (%p3410_p12), %s2832_s6, 128  }
 0xf34   : > { %4567 = vsyncadd (%p3410_p12), %s2832_s6, 4294967168  ;;  %s5704_s21 = sld [smem:[#allocation100_spill]]  ;;  %s5706_s0 = smov %s4574_s5 }
 0xf35   : > { %s5705_s2 = sld [smem:[#allocation101_spill]]  ;;  %s5707_s5 = smov %s4578_s29 }
 0xf3a   : > { %p120_p9 = scmp.ge.s32.totalorder %s5704_s21, 4  }
 0xf3b   : > { %s5708_s29 = smov %s5705_s2 }
 0xf3c   :  { %122 = sbr.rel (!%p120_p9) target bundleno = 105 (0x69), region = 385 }
 0xf41   :  { %2838 = vsyncpa [#allocation5], 1 }
 0xf42   :  { %2840 = vsyncpa [#allocation5 + $0x1], 1 }
 0xf43   :  { %2841 = vsyncpa [#allocation8], 1 }
 0xf44   :  { %2842 = vsyncpa [#allocation11], 1 }
 0xf45   :  { %2843 = vsyncpa [#allocation14], 1 }
 0xf46   :  { %2844 = vsyncpa [#allocation17], 1 }
 0xf47   :  { %2845 = vsyncpa [#allocation20], 1 }
 0xf48   :  { %2846 = vsyncpa [#allocation23], 1 }
 0xf49   :  { %2847 = vsyncpa [#allocation26], 1 }
 0xf4a   :  { %2848 = vsyncpa [#allocation29], 1 }
 0xf4b   :  { %2849 = vsyncpa [#allocation32], 1 }
 0xf4c   :  { %2850 = vsyncpa [#allocation35], 1 }
 0xf4d   :  { %2851 = vsyncpa [#allocation38], 1 }
 0xf4e   :  { %2852 = vsyncpa [#allocation41], 1 }
 0xf4f   :  { %2853 = vsyncpa [#allocation44], 1 }
 0xf50   :  { %2854 = vsyncpa [#allocation47], 1 }
 0xf51   :  { %2855 = vsyncpa [#allocation6], 1 }
 0xf52   :  { %2857 = vsyncpa [#allocation6 + $0x1], 1 }

</bundles_post_ra>
